<compile_context>
chip_gen: v6e
topology: v6e:2x2x1
jax: 0.10.0
libtpu: 0.0.40
codegen_flags: <defaults>
</compile_context>

<pallas_src>
import functools

import jax
import jax.numpy as jnp
from jax.experimental import pallas as pl
from jax.experimental.pallas import tpu as pltpu


# ----------------------------------------------------------------------------
# Fused forward kernel
# ----------------------------------------------------------------------------

def _fused_bilstm_kernel(
        gin_f_ref, gin_r_ref, mask_ref,
        whh_f_ref, whh_r_ref,
        w_tok_ref, b_tok_ref, w_dense_ref, b_dense_ref,
        w_proj_ref, b_proj_ref,
        tok_lab_ref, tok_valid_ref, tok_w_ref, seq_lab_ref, seq_w_ref,
        tok_logits_ref, seq_logits_ref, loss_ref,
        h_scr,
        *, T, B, H, coef_tok, coef_seq):
    f32 = jnp.float32

    def lstm_cell(gates, c):
        # PyTorch gate order: i, f, g, o.
        i = jax.nn.sigmoid(gates[:, 0:H])
        f = jax.nn.sigmoid(gates[:, H:2 * H])
        g = jnp.tanh(gates[:, 2 * H:3 * H])
        o = jax.nn.sigmoid(gates[:, 3 * H:4 * H])
        c_new = f * c + i * g
        h_new = o * jnp.tanh(c_new)
        return h_new, c_new

    # Recurrent weights loaded once; the per-step critical path is only the
    # tiny (B,H)x(H,4H) matmul + VPU/EUP gate math.
    whh_f = whh_f_ref[...]
    whh_r = whh_r_ref[...]

    h_f = jnp.zeros((B, H), f32)
    c_f = jnp.zeros((B, H), f32)
    h_r = jnp.zeros((B, H), f32)
    c_r = jnp.zeros((B, H), f32)

    # Statically unrolled time loop; both directions advance in lock-step.
    for s in range(T):
        p = T - 1 - s                      # position processed by reverse dir
        m_f = mask_ref[:, s:s + 1]         # (B, 1)
        m_r = mask_ref[:, p:p + 1]

        gates_f = gin_f_ref[s] + jnp.dot(h_f, whh_f,
                                         preferred_element_type=f32)
        gates_r = gin_r_ref[p] + jnp.dot(h_r, whh_r,
                                         preferred_element_type=f32)

        hf_new, cf_new = lstm_cell(gates_f, c_f)
        hr_new, cr_new = lstm_cell(gates_r, c_r)

        # Mask-frozen state update == packed-sequence semantics.
        h_f = m_f * hf_new + (1.0 - m_f) * h_f
        c_f = m_f * cf_new + (1.0 - m_f) * c_f
        h_r = m_r * hr_new + (1.0 - m_r) * h_r
        c_r = m_r * cr_new + (1.0 - m_r) * c_r

        # Bidirectional hidden states collected into a flat (T*B, 2H) VMEM
        # buffer (padded positions are exactly zero).
        h_scr[s * B:(s + 1) * B, 0:H] = m_f * h_f
        h_scr[p * B:(p + 1) * B, H:2 * H] = m_r * h_r

    h_all = h_scr[...]                                    # (T*B, 2H)

    # Token classifier: one lane-contiguous matmul + one store.
    tok_logits = (jnp.dot(h_all, w_tok_ref[...],
                          preferred_element_type=f32) + b_tok_ref[...])
    tok_logits_ref[...] = tok_logits

    # Sequence head: out_reduced = [h_fwd(len-1), h_rev(0)] == final states.
    out_reduced = jnp.concatenate([h_f, h_r], axis=1)     # (B, 2H)
    hid = jnp.tanh(jnp.dot(out_reduced, w_dense_ref[...],
                           preferred_element_type=f32) + b_dense_ref[...])
    seq_logits = (jnp.dot(hid, w_proj_ref[...],
                          preferred_element_type=f32) + b_proj_ref[...])
    seq_logits_ref[...] = seq_logits

    # Weighted cross entropy, PyTorch CrossEntropyLoss(weight=w) mean
    # reduction: sum(w[y]*nll) / sum(w[y]) over counted rows.
    def weighted_ce(logits, labels, valid, w):
        N, C = logits.shape
        mx = jnp.max(logits, axis=-1, keepdims=True)
        z = logits - mx
        lse = jnp.log(jnp.sum(jnp.exp(z), axis=-1, keepdims=True))
        logp = z - lse
        ids = jax.lax.broadcasted_iota(jnp.int32, (N, C), 1)
        oh = (ids == labels).astype(f32)
        w_row = jnp.sum(oh * w, axis=-1, keepdims=True)
        nll = -jnp.sum(oh * logp, axis=-1, keepdims=True)
        num = jnp.sum(valid * w_row * nll, axis=0, keepdims=True)   # (1,1)
        den = jnp.sum(valid * w_row, axis=0, keepdims=True)         # (1,1)
        return num / den

    tok_loss = weighted_ce(tok_logits, tok_lab_ref[...],
                           tok_valid_ref[...], tok_w_ref[...])
    # TODO(synk): num_labels == 1 MSE branch of the PyTorch module not
    # exercised here (classification path only).
    seq_loss = weighted_ce(seq_logits, seq_lab_ref[...],
                           jnp.ones((B, 1), f32), seq_w_ref[...])
    loss_ref[...] = coef_tok * tok_loss + coef_seq * seq_loss


# ----------------------------------------------------------------------------
# Model forward (wrapper / XLA glue)
# ----------------------------------------------------------------------------

def forward(params, input_ids, attention_mask, seq_labels=None,
            token_labels=None, token_class_weight=None,
            seq_class_weight=None, token_lambda=1.0):
    """input_ids: (B, T, 300) float embeddings (nn.LSTM input_size=300),
    attention_mask: (B, T) {0,1} prefix mask."""
    H = params["H"]
    B, T, _ = input_ids.shape
    n_tok = params["w_tok_t"].shape[1]
    n_lab = params["w_proj_t"].shape[1]
    f32 = jnp.float32

    x = input_ids.astype(f32)
    mask = attention_mask.astype(f32)                       # (B, T)

    # Hoisted input projections: one big (B*T, 300)x(300, 4H) matmul per
    # direction, done outside the sequential recurrence.
    gin_f = (jnp.einsum("btd,dg->tbg", x, params["wih_f_t"])
             + params["b_f"]).astype(f32)                   # (T, B, 4H)
    gin_r = (jnp.einsum("btd,dg->tbg", x, params["wih_r_t"])
             + params["b_r"]).astype(f32)                   # (T, B, 4H)

    have_tok = token_labels is not None
    have_seq = seq_labels is not None

    tl = (token_labels if have_tok
          else jnp.zeros((B, T), jnp.int32)).astype(jnp.int32)
    tl_tm = jnp.transpose(tl).reshape(T * B, 1)             # time-major flat
    mask_tm = jnp.transpose(mask).reshape(T * B, 1)
    # PyTorch ignore_index=-100: count iff mask==1 AND label != -100.
    tok_valid = mask_tm * (tl_tm != -100).astype(f32)
    tl_clip = jnp.clip(tl_tm, 0, n_tok - 1)

    tok_w = (jnp.asarray(token_class_weight, f32)
             if token_class_weight is not None
             else jnp.ones((n_tok,), f32)).reshape(1, n_tok)
    sl = (seq_labels if have_seq else jnp.zeros((B,), jnp.int32))
    sl = jnp.asarray(sl, jnp.int32).reshape(B, 1)
    seq_w = (jnp.asarray(seq_class_weight, f32)
             if seq_class_weight is not None
             else jnp.ones((n_lab,), f32)).reshape(1, n_lab)

    if have_tok and have_seq:
        coef_tok, coef_seq = float(token_lambda), 1.0
    elif have_tok:
        coef_tok, coef_seq = 1.0, 0.0
    elif have_seq:
        coef_tok, coef_seq = 0.0, 1.0
    else:
        coef_tok, coef_seq = 0.0, 0.0

    kernel = functools.partial(_fused_bilstm_kernel, T=T, B=B, H=H,
                               coef_tok=coef_tok, coef_seq=coef_seq)

    full2 = lambda i: (0, 0)
    full3 = lambda i: (0, 0, 0)

    tok_logits_flat, seq_logits, loss = pl.pallas_call(
        kernel,
        out_shape=(
            jax.ShapeDtypeStruct((T * B, n_tok), f32),
            jax.ShapeDtypeStruct((B, n_lab), f32),
            jax.ShapeDtypeStruct((1, 1), f32),
        ),
        grid=(1,),
        in_specs=[
            pl.BlockSpec((T, B, 4 * H), full3),       # gin_f
            pl.BlockSpec((T, B, 4 * H), full3),       # gin_r
            pl.BlockSpec((B, T), full2),              # mask
            pl.BlockSpec((H, 4 * H), full2),          # whh_f_t
            pl.BlockSpec((H, 4 * H), full2),          # whh_r_t
            pl.BlockSpec((2 * H, n_tok), full2),      # w_tok_t
            pl.BlockSpec((1, n_tok), full2),          # b_tok
            pl.BlockSpec((2 * H, 2 * H), full2),      # w_dense_t
            pl.BlockSpec((1, 2 * H), full2),          # b_dense
            pl.BlockSpec((2 * H, n_lab), full2),      # w_proj_t
            pl.BlockSpec((1, n_lab), full2),          # b_proj
            pl.BlockSpec((T * B, 1), full2),          # token labels (clipped)
            pl.BlockSpec((T * B, 1), full2),          # token validity
            pl.BlockSpec((1, n_tok), full2),          # token class weight
            pl.BlockSpec((B, 1), full2),              # seq labels
            pl.BlockSpec((1, n_lab), full2),          # seq class weight
        ],
        out_specs=(
            pl.BlockSpec((T * B, n_tok), full2),
            pl.BlockSpec((B, n_lab), full2),
            pl.BlockSpec((1, 1), full2),
        ),
        scratch_shapes=[pltpu.VMEM((T * B, 2 * H), f32)],
        compiler_params=pltpu.CompilerParams(
            dimension_semantics=("arbitrary",)),
    )(gin_f, gin_r, mask,
      params["whh_f_t"], params["whh_r_t"],
      params["w_tok_t"], params["b_tok"],
      params["w_dense_t"], params["b_dense"],
      params["w_proj_t"], params["b_proj"],
      tl_clip, tok_valid, tok_w, sl, seq_w)

    token_logits = tok_logits_flat.reshape(T, B, n_tok).transpose(1, 0, 2)

    if have_tok or have_seq:
        return loss[0, 0], token_logits, seq_logits
    return token_logits, seq_logits


# ----------------------------------------------------------------------------
# Deterministic parameter construction
# ----------------------------------------------------------------------------

def init_params(key, D_in, H, num_labels, num_token_labels):
    k = 1.0 / jnp.sqrt(jnp.float32(H))

    def u(key, shape):
        return jax.random.uniform(key, shape, jnp.float32, -k, k)

    keys = jax.random.split(key, 14)
    wih_f = u(keys[0], (4 * H, D_in))
    whh_f = u(keys[1], (4 * H, H))
    b_f = u(keys[2], (4 * H,)) + u(keys[3], (4 * H,))      # b_ih + b_hh
    wih_r = u(keys[4], (4 * H, D_in))
    whh_r = u(keys[5], (4 * H, H))
    b_r = u(keys[6], (4 * H,)) + u(keys[7], (4 * H,))
    w_tok = u(keys[8], (num_token_labels, 2 * H))
    b_tok = u(keys[9], (num_token_labels,))
    w_dense = u(keys[10], (2 * H, 2 * H))
    b_dense = u(keys[11], (2 * H,))
    w_proj = u(keys[12], (num_labels, 2 * H))
    b_proj = u(keys[13], (num_labels,))

    return {
        "H": H,
        "wih_f_t": wih_f.T, "whh_f_t": whh_f.T, "b_f": b_f.reshape(1, -1),
        "wih_r_t": wih_r.T, "whh_r_t": whh_r.T, "b_r": b_r.reshape(1, -1),
        "w_tok_t": w_tok.T, "b_tok": b_tok.reshape(1, -1),
        "w_dense_t": w_dense.T, "b_dense": b_dense.reshape(1, -1),
        "w_proj_t": w_proj.T, "b_proj": b_proj.reshape(1, -1),
    }


if __name__ == "__main__":
    B, T, D_IN = 2, 8, 300           # D_IN fixed by nn.LSTM(input_size=300)
    H = 32                           # rnn_hidden_dimension
    NUM_LABELS = 3
    NUM_TOKEN_LABELS = 5

    root = jax.random.PRNGKey(0)
    kp, kx, ktl, ksl = jax.random.split(root, 4)

    params = init_params(kp, D_IN, H, NUM_LABELS, NUM_TOKEN_LABELS)

    input_ids = jax.random.normal(kx, (B, T, D_IN), jnp.float32)
    lengths = jnp.array([8, 5], jnp.int32)
    attention_mask = (jnp.arange(T)[None, :] < lengths[:, None]).astype(
        jnp.int32)
    token_labels = jax.random.randint(ktl, (B, T), 0, NUM_TOKEN_LABELS)
    seq_labels = jax.random.randint(ksl, (B,), 0, NUM_LABELS)
    token_class_weight = jnp.linspace(0.5, 1.5, NUM_TOKEN_LABELS,
                                      dtype=jnp.float32)
    seq_class_weight = jnp.linspace(0.8, 1.2, NUM_LABELS, dtype=jnp.float32)

    loss, token_logits, seq_logits = forward(
        params, input_ids, attention_mask,
        seq_labels=seq_labels, token_labels=token_labels,
        token_class_weight=token_class_weight,
        seq_class_weight=seq_class_weight, token_lambda=1.0)

    jax.block_until_ready((loss, token_logits, seq_logits))

    assert token_logits.shape == (B, T, NUM_TOKEN_LABELS)
    assert seq_logits.shape == (B, NUM_LABELS)
    assert bool(jnp.isfinite(loss))
    assert bool(jnp.all(jnp.isfinite(token_logits)))
    assert bool(jnp.all(jnp.isfinite(seq_logits)))
    print("KERNEL_OK")
</pallas_src>

<mosaic_0001>
module attributes {stable_mosaic.version = 11 : i64} {
  func.func @_fused_bilstm_kernel(%arg0: i32, %arg1: memref<8x2x128xf32, #tpu.memory_space<vmem>>, %arg2: memref<8x2x128xf32, #tpu.memory_space<vmem>>, %arg3: memref<2x8xf32, #tpu.memory_space<vmem>>, %arg4: memref<32x128xf32, #tpu.memory_space<vmem>>, %arg5: memref<32x128xf32, #tpu.memory_space<vmem>>, %arg6: memref<64x5xf32, #tpu.memory_space<vmem>>, %arg7: memref<1x5xf32, #tpu.memory_space<vmem>>, %arg8: memref<64x64xf32, #tpu.memory_space<vmem>>, %arg9: memref<1x64xf32, #tpu.memory_space<vmem>>, %arg10: memref<64x3xf32, #tpu.memory_space<vmem>>, %arg11: memref<1x3xf32, #tpu.memory_space<vmem>>, %arg12: memref<16x1xi32, #tpu.memory_space<vmem>>, %arg13: memref<16x1xf32, #tpu.memory_space<vmem>>, %arg14: memref<1x5xf32, #tpu.memory_space<vmem>>, %arg15: memref<2x1xi32, #tpu.memory_space<vmem>>, %arg16: memref<1x3xf32, #tpu.memory_space<vmem>>, %arg17: memref<16x5xf32, #tpu.memory_space<vmem>>, %arg18: memref<2x3xf32, #tpu.memory_space<vmem>>, %arg19: memref<1x1xf32, #tpu.memory_space<vmem>>, %arg20: memref<16x64xf32, #tpu.memory_space<vmem>>) attributes {dimension_semantics = [#tpu.dimension_semantics<arbitrary>], iteration_bounds = array<i64: 1>, scalar_prefetch = 0 : i64, scratch_operands = 1 : i64, tpu.core_type = #tpu.core_type<tc>, window_params = [{pipeline_mode = #tpu.pipeline_mode<synchronous>, transform_indices = @transform_0, window_bounds = array<i64: 8, 2, 128>}, {pipeline_mode = #tpu.pipeline_mode<synchronous>, transform_indices = @transform_1, window_bounds = array<i64: 8, 2, 128>}, {pipeline_mode = #tpu.pipeline_mode<synchronous>, transform_indices = @transform_2, window_bounds = array<i64: 2, 8>}, {pipeline_mode = #tpu.pipeline_mode<synchronous>, transform_indices = @transform_3, window_bounds = array<i64: 32, 128>}, {pipeline_mode = #tpu.pipeline_mode<synchronous>, transform_indices = @transform_4, window_bounds = array<i64: 32, 128>}, {pipeline_mode = #tpu.pipeline_mode<synchronous>, transform_indices = @transform_5, window_bounds = array<i64: 64, 5>}, {pipeline_mode = #tpu.pipeline_mode<synchronous>, transform_indices = @transform_6, window_bounds = array<i64: 1, 5>}, {pipeline_mode = #tpu.pipeline_mode<synchronous>, transform_indices = @transform_7, window_bounds = array<i64: 64, 64>}, {pipeline_mode = #tpu.pipeline_mode<synchronous>, transform_indices = @transform_8, window_bounds = array<i64: 1, 64>}, {pipeline_mode = #tpu.pipeline_mode<synchronous>, transform_indices = @transform_9, window_bounds = array<i64: 64, 3>}, {pipeline_mode = #tpu.pipeline_mode<synchronous>, transform_indices = @transform_10, window_bounds = array<i64: 1, 3>}, {pipeline_mode = #tpu.pipeline_mode<synchronous>, transform_indices = @transform_11, window_bounds = array<i64: 16, 1>}, {pipeline_mode = #tpu.pipeline_mode<synchronous>, transform_indices = @transform_12, window_bounds = array<i64: 16, 1>}, {pipeline_mode = #tpu.pipeline_mode<synchronous>, transform_indices = @transform_13, window_bounds = array<i64: 1, 5>}, {pipeline_mode = #tpu.pipeline_mode<synchronous>, transform_indices = @transform_14, window_bounds = array<i64: 2, 1>}, {pipeline_mode = #tpu.pipeline_mode<synchronous>, transform_indices = @transform_15, window_bounds = array<i64: 1, 3>}, {pipeline_mode = #tpu.pipeline_mode<synchronous>, transform_indices = @transform_16, window_bounds = array<i64: 16, 5>}, {pipeline_mode = #tpu.pipeline_mode<synchronous>, transform_indices = @transform_17, window_bounds = array<i64: 2, 3>}, {pipeline_mode = #tpu.pipeline_mode<synchronous>, transform_indices = @transform_18, window_bounds = array<i64: 1, 1>}]} {
    %c0 = arith.constant 0 : index
    %c0_0 = arith.constant 0 : index
    %0 = vector.load %arg4[%c0, %c0_0] : memref<32x128xf32, #tpu.memory_space<vmem>>, vector<32x128xf32>
    %c0_1 = arith.constant 0 : index
    %c0_2 = arith.constant 0 : index
    %1 = vector.load %arg5[%c0_1, %c0_2] : memref<32x128xf32, #tpu.memory_space<vmem>>, vector<32x128xf32>
    %cst = arith.constant 0.000000e+00 : f32
    %2 = vector.broadcast %cst : f32 to vector<2x32xf32>
    %cst_3 = arith.constant 0.000000e+00 : f32
    %3 = vector.broadcast %cst_3 : f32 to vector<2x32xf32>
    %cst_4 = arith.constant 0.000000e+00 : f32
    %4 = vector.broadcast %cst_4 : f32 to vector<2x32xf32>
    %cst_5 = arith.constant 0.000000e+00 : f32
    %5 = vector.broadcast %cst_5 : f32 to vector<2x32xf32>
    %c0_6 = arith.constant 0 : index
    %c0_7 = arith.constant 0 : index
    %6 = vector.load %arg3[%c0_6, %c0_7] : memref<2x8xf32, #tpu.memory_space<vmem>>, vector<2x1xf32>
    %c0_8 = arith.constant 0 : index
    %c7 = arith.constant 7 : index
    %7 = vector.load %arg3[%c0_8, %c7] : memref<2x8xf32, #tpu.memory_space<vmem>>, vector<2x1xf32>
    %c0_9 = arith.constant 0 : index
    %c0_10 = arith.constant 0 : index
    %c0_11 = arith.constant 0 : index
    %8 = vector.load %arg1[%c0_9, %c0_10, %c0_11] : memref<8x2x128xf32, #tpu.memory_space<vmem>>, vector<1x2x128xf32>
    %9 = vector.shape_cast %8 : vector<1x2x128xf32> to vector<2x128xf32>
    %cst_12 = arith.constant dense<0.000000e+00> : vector<2x128xf32>
    %10 = tpu.matmul %2, %0, %cst_12 {dimension_numbers = #tpu.dot_dimension_numbers<[1], [0], [0], [1], [0, 0, 1, 1], [], []>} : vector<2x32xf32>, vector<32x128xf32>, vector<2x128xf32> -> vector<2x128xf32>
    %11 = arith.addf %9, %10 : vector<2x128xf32>
    %c7_13 = arith.constant 7 : index
    %c0_14 = arith.constant 0 : index
    %c0_15 = arith.constant 0 : index
    %12 = vector.load %arg2[%c7_13, %c0_14, %c0_15] : memref<8x2x128xf32, #tpu.memory_space<vmem>>, vector<1x2x128xf32>
    %13 = vector.shape_cast %12 : vector<1x2x128xf32> to vector<2x128xf32>
    %cst_16 = arith.constant dense<0.000000e+00> : vector<2x128xf32>
    %14 = tpu.matmul %4, %1, %cst_16 {dimension_numbers = #tpu.dot_dimension_numbers<[1], [0], [0], [1], [0, 0, 1, 1], [], []>} : vector<2x32xf32>, vector<32x128xf32>, vector<2x128xf32> -> vector<2x128xf32>
    %15 = arith.addf %13, %14 : vector<2x128xf32>
    %16 = vector.extract_strided_slice %11 {offsets = [0, 0], sizes = [2, 32], strides = [1, 1]} : vector<2x128xf32> to vector<2x32xf32>
    %17 = arith.negf %16 : vector<2x32xf32>
    %18 = math.exp %17 : vector<2x32xf32>
    %cst_17 = arith.constant 1.000000e+00 : f32
    %19 = vector.broadcast %cst_17 : f32 to vector<2x32xf32>
    %20 = arith.addf %19, %18 : vector<2x32xf32>
    %21 = arith.divf %19, %20 : vector<2x32xf32>
    %22 = vector.extract_strided_slice %11 {offsets = [0, 32], sizes = [2, 32], strides = [1, 1]} : vector<2x128xf32> to vector<2x32xf32>
    %23 = arith.negf %22 : vector<2x32xf32>
    %24 = math.exp %23 : vector<2x32xf32>
    %cst_18 = arith.constant 1.000000e+00 : f32
    %25 = vector.broadcast %cst_18 : f32 to vector<2x32xf32>
    %26 = arith.addf %25, %24 : vector<2x32xf32>
    %27 = arith.divf %25, %26 : vector<2x32xf32>
    %28 = vector.extract_strided_slice %11 {offsets = [0, 64], sizes = [2, 32], strides = [1, 1]} : vector<2x128xf32> to vector<2x32xf32>
    %29 = math.tanh %28 : vector<2x32xf32>
    %30 = vector.extract_strided_slice %11 {offsets = [0, 96], sizes = [2, 32], strides = [1, 1]} : vector<2x128xf32> to vector<2x32xf32>
    %31 = arith.negf %30 : vector<2x32xf32>
    %32 = math.exp %31 : vector<2x32xf32>
    %cst_19 = arith.constant 1.000000e+00 : f32
    %33 = vector.broadcast %cst_19 : f32 to vector<2x32xf32>
    %34 = arith.addf %33, %32 : vector<2x32xf32>
    %35 = arith.divf %33, %34 : vector<2x32xf32>
    %36 = arith.mulf %27, %3 : vector<2x32xf32>
    %37 = arith.mulf %21, %29 : vector<2x32xf32>
    %38 = arith.addf %36, %37 : vector<2x32xf32>
    %39 = math.tanh %38 : vector<2x32xf32>
    %40 = arith.mulf %35, %39 : vector<2x32xf32>
    %41 = vector.extract_strided_slice %15 {offsets = [0, 0], sizes = [2, 32], strides = [1, 1]} : vector<2x128xf32> to vector<2x32xf32>
    %42 = arith.negf %41 : vector<2x32xf32>
    %43 = math.exp %42 : vector<2x32xf32>
    %cst_20 = arith.constant 1.000000e+00 : f32
    %44 = vector.broadcast %cst_20 : f32 to vector<2x32xf32>
    %45 = arith.addf %44, %43 : vector<2x32xf32>
    %46 = arith.divf %44, %45 : vector<2x32xf32>
    %47 = vector.extract_strided_slice %15 {offsets = [0, 32], sizes = [2, 32], strides = [1, 1]} : vector<2x128xf32> to vector<2x32xf32>
    %48 = arith.negf %47 : vector<2x32xf32>
    %49 = math.exp %48 : vector<2x32xf32>
    %cst_21 = arith.constant 1.000000e+00 : f32
    %50 = vector.broadcast %cst_21 : f32 to vector<2x32xf32>
    %51 = arith.addf %50, %49 : vector<2x32xf32>
    %52 = arith.divf %50, %51 : vector<2x32xf32>
    %53 = vector.extract_strided_slice %15 {offsets = [0, 64], sizes = [2, 32], strides = [1, 1]} : vector<2x128xf32> to vector<2x32xf32>
    %54 = math.tanh %53 : vector<2x32xf32>
    %55 = vector.extract_strided_slice %15 {offsets = [0, 96], sizes = [2, 32], strides = [1, 1]} : vector<2x128xf32> to vector<2x32xf32>
    %56 = arith.negf %55 : vector<2x32xf32>
    %57 = math.exp %56 : vector<2x32xf32>
    %cst_22 = arith.constant 1.000000e+00 : f32
    %58 = vector.broadcast %cst_22 : f32 to vector<2x32xf32>
    %59 = arith.addf %58, %57 : vector<2x32xf32>
    %60 = arith.divf %58, %59 : vector<2x32xf32>
    %61 = arith.mulf %52, %5 : vector<2x32xf32>
    %62 = arith.mulf %46, %54 : vector<2x32xf32>
    %63 = arith.addf %61, %62 : vector<2x32xf32>
    %64 = math.tanh %63 : vector<2x32xf32>
    %65 = arith.mulf %60, %64 : vector<2x32xf32>
    %66 = vector.broadcast %6 : vector<2x1xf32> to vector<2x32xf32>
    %67 = arith.mulf %66, %40 : vector<2x32xf32>
    %cst_23 = arith.constant 1.000000e+00 : f32
    %68 = vector.broadcast %cst_23 : f32 to vector<2x1xf32>
    %69 = arith.subf %68, %6 : vector<2x1xf32>
    %70 = vector.broadcast %69 : vector<2x1xf32> to vector<2x32xf32>
    %71 = arith.mulf %70, %2 : vector<2x32xf32>
    %72 = arith.addf %67, %71 : vector<2x32xf32>
    %73 = vector.broadcast %6 : vector<2x1xf32> to vector<2x32xf32>
    %74 = arith.mulf %73, %38 : vector<2x32xf32>
    %cst_24 = arith.constant 1.000000e+00 : f32
    %75 = vector.broadcast %cst_24 : f32 to vector<2x1xf32>
    %76 = arith.subf %75, %6 : vector<2x1xf32>
    %77 = vector.broadcast %76 : vector<2x1xf32> to vector<2x32xf32>
    %78 = arith.mulf %77, %3 : vector<2x32xf32>
    %79 = arith.addf %74, %78 : vector<2x32xf32>
    %80 = vector.broadcast %7 : vector<2x1xf32> to vector<2x32xf32>
    %81 = arith.mulf %80, %65 : vector<2x32xf32>
    %cst_25 = arith.constant 1.000000e+00 : f32
    %82 = vector.broadcast %cst_25 : f32 to vector<2x1xf32>
    %83 = arith.subf %82, %7 : vector<2x1xf32>
    %84 = vector.broadcast %83 : vector<2x1xf32> to vector<2x32xf32>
    %85 = arith.mulf %84, %4 : vector<2x32xf32>
    %86 = arith.addf %81, %85 : vector<2x32xf32>
    %87 = vector.broadcast %7 : vector<2x1xf32> to vector<2x32xf32>
    %88 = arith.mulf %87, %63 : vector<2x32xf32>
    %cst_26 = arith.constant 1.000000e+00 : f32
    %89 = vector.broadcast %cst_26 : f32 to vector<2x1xf32>
    %90 = arith.subf %89, %7 : vector<2x1xf32>
    %91 = vector.broadcast %90 : vector<2x1xf32> to vector<2x32xf32>
    %92 = arith.mulf %91, %5 : vector<2x32xf32>
    %93 = arith.addf %88, %92 : vector<2x32xf32>
    %94 = vector.broadcast %6 : vector<2x1xf32> to vector<2x32xf32>
    %95 = arith.mulf %94, %72 : vector<2x32xf32>
    %c0_27 = arith.constant 0 : index
    %c0_28 = arith.constant 0 : index
    %96 = vector.load %arg20[%c0_27, %c0_28] : memref<16x64xf32, #tpu.memory_space<vmem>>, vector<2x32xf32>
    tpu.vector_store %arg20[%c0_27, %c0_28], %95 {strides = array<i32>} : memref<16x64xf32, #tpu.memory_space<vmem>>, vector<2x32xf32>,
    %97 = vector.broadcast %7 : vector<2x1xf32> to vector<2x32xf32>
    %98 = arith.mulf %97, %86 : vector<2x32xf32>
    %c14 = arith.constant 14 : index
    %c32 = arith.constant 32 : index
    %99 = vector.load %arg20[%c14, %c32] : memref<16x64xf32, #tpu.memory_space<vmem>>, vector<2x32xf32>
    tpu.vector_store %arg20[%c14, %c32], %98 {strides = array<i32>} : memref<16x64xf32, #tpu.memory_space<vmem>>, vector<2x32xf32>,
    %c0_29 = arith.constant 0 : index
    %c1 = arith.constant 1 : index
    %100 = vector.load %arg3[%c0_29, %c1] : memref<2x8xf32, #tpu.memory_space<vmem>>, vector<2x1xf32>
    %c0_30 = arith.constant 0 : index
    %c6 = arith.constant 6 : index
    %101 = vector.load %arg3[%c0_30, %c6] : memref<2x8xf32, #tpu.memory_space<vmem>>, vector<2x1xf32>
    %c1_31 = arith.constant 1 : index
    %c0_32 = arith.constant 0 : index
    %c0_33 = arith.constant 0 : index
    %102 = vector.load %arg1[%c1_31, %c0_32, %c0_33] : memref<8x2x128xf32, #tpu.memory_space<vmem>>, vector<1x2x128xf32>
    %103 = vector.shape_cast %102 : vector<1x2x128xf32> to vector<2x128xf32>
    %cst_34 = arith.constant dense<0.000000e+00> : vector<2x128xf32>
    %104 = tpu.matmul %72, %0, %cst_34 {dimension_numbers = #tpu.dot_dimension_numbers<[1], [0], [0], [1], [0, 0, 1, 1], [], []>} : vector<2x32xf32>, vector<32x128xf32>, vector<2x128xf32> -> vector<2x128xf32>
    %105 = arith.addf %103, %104 : vector<2x128xf32>
    %c6_35 = arith.constant 6 : index
    %c0_36 = arith.constant 0 : index
    %c0_37 = arith.constant 0 : index
    %106 = vector.load %arg2[%c6_35, %c0_36, %c0_37] : memref<8x2x128xf32, #tpu.memory_space<vmem>>, vector<1x2x128xf32>
    %107 = vector.shape_cast %106 : vector<1x2x128xf32> to vector<2x128xf32>
    %cst_38 = arith.constant dense<0.000000e+00> : vector<2x128xf32>
    %108 = tpu.matmul %86, %1, %cst_38 {dimension_numbers = #tpu.dot_dimension_numbers<[1], [0], [0], [1], [0, 0, 1, 1], [], []>} : vector<2x32xf32>, vector<32x128xf32>, vector<2x128xf32> -> vector<2x128xf32>
    %109 = arith.addf %107, %108 : vector<2x128xf32>
    %110 = vector.extract_strided_slice %105 {offsets = [0, 0], sizes = [2, 32], strides = [1, 1]} : vector<2x128xf32> to vector<2x32xf32>
    %111 = arith.negf %110 : vector<2x32xf32>
    %112 = math.exp %111 : vector<2x32xf32>
    %cst_39 = arith.constant 1.000000e+00 : f32
    %113 = vector.broadcast %cst_39 : f32 to vector<2x32xf32>
    %114 = arith.addf %113, %112 : vector<2x32xf32>
    %115 = arith.divf %113, %114 : vector<2x32xf32>
    %116 = vector.extract_strided_slice %105 {offsets = [0, 32], sizes = [2, 32], strides = [1, 1]} : vector<2x128xf32> to vector<2x32xf32>
    %117 = arith.negf %116 : vector<2x32xf32>
    %118 = math.exp %117 : vector<2x32xf32>
    %cst_40 = arith.constant 1.000000e+00 : f32
    %119 = vector.broadcast %cst_40 : f32 to vector<2x32xf32>
    %120 = arith.addf %119, %118 : vector<2x32xf32>
    %121 = arith.divf %119, %120 : vector<2x32xf32>
    %122 = vector.extract_strided_slice %105 {offsets = [0, 64], sizes = [2, 32], strides = [1, 1]} : vector<2x128xf32> to vector<2x32xf32>
    %123 = math.tanh %122 : vector<2x32xf32>
    %124 = vector.extract_strided_slice %105 {offsets = [0, 96], sizes = [2, 32], strides = [1, 1]} : vector<2x128xf32> to vector<2x32xf32>
    %125 = arith.negf %124 : vector<2x32xf32>
    %126 = math.exp %125 : vector<2x32xf32>
    %cst_41 = arith.constant 1.000000e+00 : f32
    %127 = vector.broadcast %cst_41 : f32 to vector<2x32xf32>
    %128 = arith.addf %127, %126 : vector<2x32xf32>
    %129 = arith.divf %127, %128 : vector<2x32xf32>
    %130 = arith.mulf %121, %79 : vector<2x32xf32>
    %131 = arith.mulf %115, %123 : vector<2x32xf32>
    %132 = arith.addf %130, %131 : vector<2x32xf32>
    %133 = math.tanh %132 : vector<2x32xf32>
    %134 = arith.mulf %129, %133 : vector<2x32xf32>
    %135 = vector.extract_strided_slice %109 {offsets = [0, 0], sizes = [2, 32], strides = [1, 1]} : vector<2x128xf32> to vector<2x32xf32>
    %136 = arith.negf %135 : vector<2x32xf32>
    %137 = math.exp %136 : vector<2x32xf32>
    %cst_42 = arith.constant 1.000000e+00 : f32
    %138 = vector.broadcast %cst_42 : f32 to vector<2x32xf32>
    %139 = arith.addf %138, %137 : vector<2x32xf32>
    %140 = arith.divf %138, %139 : vector<2x32xf32>
    %141 = vector.extract_strided_slice %109 {offsets = [0, 32], sizes = [2, 32], strides = [1, 1]} : vector<2x128xf32> to vector<2x32xf32>
    %142 = arith.negf %141 : vector<2x32xf32>
    %143 = math.exp %142 : vector<2x32xf32>
    %cst_43 = arith.constant 1.000000e+00 : f32
    %144 = vector.broadcast %cst_43 : f32 to vector<2x32xf32>
    %145 = arith.addf %144, %143 : vector<2x32xf32>
    %146 = arith.divf %144, %145 : vector<2x32xf32>
    %147 = vector.extract_strided_slice %109 {offsets = [0, 64], sizes = [2, 32], strides = [1, 1]} : vector<2x128xf32> to vector<2x32xf32>
    %148 = math.tanh %147 : vector<2x32xf32>
    %149 = vector.extract_strided_slice %109 {offsets = [0, 96], sizes = [2, 32], strides = [1, 1]} : vector<2x128xf32> to vector<2x32xf32>
    %150 = arith.negf %149 : vector<2x32xf32>
    %151 = math.exp %150 : vector<2x32xf32>
    %cst_44 = arith.constant 1.000000e+00 : f32
    %152 = vector.broadcast %cst_44 : f32 to vector<2x32xf32>
    %153 = arith.addf %152, %151 : vector<2x32xf32>
    %154 = arith.divf %152, %153 : vector<2x32xf32>
    %155 = arith.mulf %146, %93 : vector<2x32xf32>
    %156 = arith.mulf %140, %148 : vector<2x32xf32>
    %157 = arith.addf %155, %156 : vector<2x32xf32>
    %158 = math.tanh %157 : vector<2x32xf32>
    %159 = arith.mulf %154, %158 : vector<2x32xf32>
    %160 = vector.broadcast %100 : vector<2x1xf32> to vector<2x32xf32>
    %161 = arith.mulf %160, %134 : vector<2x32xf32>
    %cst_45 = arith.constant 1.000000e+00 : f32
    %162 = vector.broadcast %cst_45 : f32 to vector<2x1xf32>
    %163 = arith.subf %162, %100 : vector<2x1xf32>
    %164 = vector.broadcast %163 : vector<2x1xf32> to vector<2x32xf32>
    %165 = arith.mulf %164, %72 : vector<2x32xf32>
    %166 = arith.addf %161, %165 : vector<2x32xf32>
    %167 = vector.broadcast %100 : vector<2x1xf32> to vector<2x32xf32>
    %168 = arith.mulf %167, %132 : vector<2x32xf32>
    %cst_46 = arith.constant 1.000000e+00 : f32
    %169 = vector.broadcast %cst_46 : f32 to vector<2x1xf32>
    %170 = arith.subf %169, %100 : vector<2x1xf32>
    %171 = vector.broadcast %170 : vector<2x1xf32> to vector<2x32xf32>
    %172 = arith.mulf %171, %79 : vector<2x32xf32>
    %173 = arith.addf %168, %172 : vector<2x32xf32>
    %174 = vector.broadcast %101 : vector<2x1xf32> to vector<2x32xf32>
    %175 = arith.mulf %174, %159 : vector<2x32xf32>
    %cst_47 = arith.constant 1.000000e+00 : f32
    %176 = vector.broadcast %cst_47 : f32 to vector<2x1xf32>
    %177 = arith.subf %176, %101 : vector<2x1xf32>
    %178 = vector.broadcast %177 : vector<2x1xf32> to vector<2x32xf32>
    %179 = arith.mulf %178, %86 : vector<2x32xf32>
    %180 = arith.addf %175, %179 : vector<2x32xf32>
    %181 = vector.broadcast %101 : vector<2x1xf32> to vector<2x32xf32>
    %182 = arith.mulf %181, %157 : vector<2x32xf32>
    %cst_48 = arith.constant 1.000000e+00 : f32
    %183 = vector.broadcast %cst_48 : f32 to vector<2x1xf32>
    %184 = arith.subf %183, %101 : vector<2x1xf32>
    %185 = vector.broadcast %184 : vector<2x1xf32> to vector<2x32xf32>
    %186 = arith.mulf %185, %93 : vector<2x32xf32>
    %187 = arith.addf %182, %186 : vector<2x32xf32>
    %188 = vector.broadcast %100 : vector<2x1xf32> to vector<2x32xf32>
    %189 = arith.mulf %188, %166 : vector<2x32xf32>
    %c2 = arith.constant 2 : index
    %c0_49 = arith.constant 0 : index
    %190 = vector.load %arg20[%c2, %c0_49] : memref<16x64xf32, #tpu.memory_space<vmem>>, vector<2x32xf32>
    tpu.vector_store %arg20[%c2, %c0_49], %189 {strides = array<i32>} : memref<16x64xf32, #tpu.memory_space<vmem>>, vector<2x32xf32>,
    %191 = vector.broadcast %101 : vector<2x1xf32> to vector<2x32xf32>
    %192 = arith.mulf %191, %180 : vector<2x32xf32>
    %c12 = arith.constant 12 : index
    %c32_50 = arith.constant 32 : index
    %193 = vector.load %arg20[%c12, %c32_50] : memref<16x64xf32, #tpu.memory_space<vmem>>, vector<2x32xf32>
    tpu.vector_store %arg20[%c12, %c32_50], %192 {strides = array<i32>} : memref<16x64xf32, #tpu.memory_space<vmem>>, vector<2x32xf32>,
    %c0_51 = arith.constant 0 : index
    %c2_52 = arith.constant 2 : index
    %194 = vector.load %arg3[%c0_51, %c2_52] : memref<2x8xf32, #tpu.memory_space<vmem>>, vector<2x1xf32>
    %c0_53 = arith.constant 0 : index
    %c5 = arith.constant 5 : index
    %195 = vector.load %arg3[%c0_53, %c5] : memref<2x8xf32, #tpu.memory_space<vmem>>, vector<2x1xf32>
    %c2_54 = arith.constant 2 : index
    %c0_55 = arith.constant 0 : index
    %c0_56 = arith.constant 0 : index
    %196 = vector.load %arg1[%c2_54, %c0_55, %c0_56] : memref<8x2x128xf32, #tpu.memory_space<vmem>>, vector<1x2x128xf32>
    %197 = vector.shape_cast %196 : vector<1x2x128xf32> to vector<2x128xf32>
    %cst_57 = arith.constant dense<0.000000e+00> : vector<2x128xf32>
    %198 = tpu.matmul %166, %0, %cst_57 {dimension_numbers = #tpu.dot_dimension_numbers<[1], [0], [0], [1], [0, 0, 1, 1], [], []>} : vector<2x32xf32>, vector<32x128xf32>, vector<2x128xf32> -> vector<2x128xf32>
    %199 = arith.addf %197, %198 : vector<2x128xf32>
    %c5_58 = arith.constant 5 : index
    %c0_59 = arith.constant 0 : index
    %c0_60 = arith.constant 0 : index
    %200 = vector.load %arg2[%c5_58, %c0_59, %c0_60] : memref<8x2x128xf32, #tpu.memory_space<vmem>>, vector<1x2x128xf32>
    %201 = vector.shape_cast %200 : vector<1x2x128xf32> to vector<2x128xf32>
    %cst_61 = arith.constant dense<0.000000e+00> : vector<2x128xf32>
    %202 = tpu.matmul %180, %1, %cst_61 {dimension_numbers = #tpu.dot_dimension_numbers<[1], [0], [0], [1], [0, 0, 1, 1], [], []>} : vector<2x32xf32>, vector<32x128xf32>, vector<2x128xf32> -> vector<2x128xf32>
    %203 = arith.addf %201, %202 : vector<2x128xf32>
    %204 = vector.extract_strided_slice %199 {offsets = [0, 0], sizes = [2, 32], strides = [1, 1]} : vector<2x128xf32> to vector<2x32xf32>
    %205 = arith.negf %204 : vector<2x32xf32>
    %206 = math.exp %205 : vector<2x32xf32>
    %cst_62 = arith.constant 1.000000e+00 : f32
    %207 = vector.broadcast %cst_62 : f32 to vector<2x32xf32>
    %208 = arith.addf %207, %206 : vector<2x32xf32>
    %209 = arith.divf %207, %208 : vector<2x32xf32>
    %210 = vector.extract_strided_slice %199 {offsets = [0, 32], sizes = [2, 32], strides = [1, 1]} : vector<2x128xf32> to vector<2x32xf32>
    %211 = arith.negf %210 : vector<2x32xf32>
    %212 = math.exp %211 : vector<2x32xf32>
    %cst_63 = arith.constant 1.000000e+00 : f32
    %213 = vector.broadcast %cst_63 : f32 to vector<2x32xf32>
    %214 = arith.addf %213, %212 : vector<2x32xf32>
    %215 = arith.divf %213, %214 : vector<2x32xf32>
    %216 = vector.extract_strided_slice %199 {offsets = [0, 64], sizes = [2, 32], strides = [1, 1]} : vector<2x128xf32> to vector<2x32xf32>
    %217 = math.tanh %216 : vector<2x32xf32>
    %218 = vector.extract_strided_slice %199 {offsets = [0, 96], sizes = [2, 32], strides = [1, 1]} : vector<2x128xf32> to vector<2x32xf32>
    %219 = arith.negf %218 : vector<2x32xf32>
    %220 = math.exp %219 : vector<2x32xf32>
    %cst_64 = arith.constant 1.000000e+00 : f32
    %221 = vector.broadcast %cst_64 : f32 to vector<2x32xf32>
    %222 = arith.addf %221, %220 : vector<2x32xf32>
    %223 = arith.divf %221, %222 : vector<2x32xf32>
    %224 = arith.mulf %215, %173 : vector<2x32xf32>
    %225 = arith.mulf %209, %217 : vector<2x32xf32>
    %226 = arith.addf %224, %225 : vector<2x32xf32>
    %227 = math.tanh %226 : vector<2x32xf32>
    %228 = arith.mulf %223, %227 : vector<2x32xf32>
    %229 = vector.extract_strided_slice %203 {offsets = [0, 0], sizes = [2, 32], strides = [1, 1]} : vector<2x128xf32> to vector<2x32xf32>
    %230 = arith.negf %229 : vector<2x32xf32>
    %231 = math.exp %230 : vector<2x32xf32>
    %cst_65 = arith.constant 1.000000e+00 : f32
    %232 = vector.broadcast %cst_65 : f32 to vector<2x32xf32>
    %233 = arith.addf %232, %231 : vector<2x32xf32>
    %234 = arith.divf %232, %233 : vector<2x32xf32>
    %235 = vector.extract_strided_slice %203 {offsets = [0, 32], sizes = [2, 32], strides = [1, 1]} : vector<2x128xf32> to vector<2x32xf32>
    %236 = arith.negf %235 : vector<2x32xf32>
    %237 = math.exp %236 : vector<2x32xf32>
    %cst_66 = arith.constant 1.000000e+00 : f32
    %238 = vector.broadcast %cst_66 : f32 to vector<2x32xf32>
    %239 = arith.addf %238, %237 : vector<2x32xf32>
    %240 = arith.divf %238, %239 : vector<2x32xf32>
    %241 = vector.extract_strided_slice %203 {offsets = [0, 64], sizes = [2, 32], strides = [1, 1]} : vector<2x128xf32> to vector<2x32xf32>
    %242 = math.tanh %241 : vector<2x32xf32>
    %243 = vector.extract_strided_slice %203 {offsets = [0, 96], sizes = [2, 32], strides = [1, 1]} : vector<2x128xf32> to vector<2x32xf32>
    %244 = arith.negf %243 : vector<2x32xf32>
    %245 = math.exp %244 : vector<2x32xf32>
    %cst_67 = arith.constant 1.000000e+00 : f32
    %246 = vector.broadcast %cst_67 : f32 to vector<2x32xf32>
    %247 = arith.addf %246, %245 : vector<2x32xf32>
    %248 = arith.divf %246, %247 : vector<2x32xf32>
    %249 = arith.mulf %240, %187 : vector<2x32xf32>
    %250 = arith.mulf %234, %242 : vector<2x32xf32>
    %251 = arith.addf %249, %250 : vector<2x32xf32>
    %252 = math.tanh %251 : vector<2x32xf32>
    %253 = arith.mulf %248, %252 : vector<2x32xf32>
    %254 = vector.broadcast %194 : vector<2x1xf32> to vector<2x32xf32>
    %255 = arith.mulf %254, %228 : vector<2x32xf32>
    %cst_68 = arith.constant 1.000000e+00 : f32
    %256 = vector.broadcast %cst_68 : f32 to vector<2x1xf32>
    %257 = arith.subf %256, %194 : vector<2x1xf32>
    %258 = vector.broadcast %257 : vector<2x1xf32> to vector<2x32xf32>
    %259 = arith.mulf %258, %166 : vector<2x32xf32>
    %260 = arith.addf %255, %259 : vector<2x32xf32>
    %261 = vector.broadcast %194 : vector<2x1xf32> to vector<2x32xf32>
    %262 = arith.mulf %261, %226 : vector<2x32xf32>
    %cst_69 = arith.constant 1.000000e+00 : f32
    %263 = vector.broadcast %cst_69 : f32 to vector<2x1xf32>
    %264 = arith.subf %263, %194 : vector<2x1xf32>
    %265 = vector.broadcast %264 : vector<2x1xf32> to vector<2x32xf32>
    %266 = arith.mulf %265, %173 : vector<2x32xf32>
    %267 = arith.addf %262, %266 : vector<2x32xf32>
    %268 = vector.broadcast %195 : vector<2x1xf32> to vector<2x32xf32>
    %269 = arith.mulf %268, %253 : vector<2x32xf32>
    %cst_70 = arith.constant 1.000000e+00 : f32
    %270 = vector.broadcast %cst_70 : f32 to vector<2x1xf32>
    %271 = arith.subf %270, %195 : vector<2x1xf32>
    %272 = vector.broadcast %271 : vector<2x1xf32> to vector<2x32xf32>
    %273 = arith.mulf %272, %180 : vector<2x32xf32>
    %274 = arith.addf %269, %273 : vector<2x32xf32>
    %275 = vector.broadcast %195 : vector<2x1xf32> to vector<2x32xf32>
    %276 = arith.mulf %275, %251 : vector<2x32xf32>
    %cst_71 = arith.constant 1.000000e+00 : f32
    %277 = vector.broadcast %cst_71 : f32 to vector<2x1xf32>
    %278 = arith.subf %277, %195 : vector<2x1xf32>
    %279 = vector.broadcast %278 : vector<2x1xf32> to vector<2x32xf32>
    %280 = arith.mulf %279, %187 : vector<2x32xf32>
    %281 = arith.addf %276, %280 : vector<2x32xf32>
    %282 = vector.broadcast %194 : vector<2x1xf32> to vector<2x32xf32>
    %283 = arith.mulf %282, %260 : vector<2x32xf32>
    %c4 = arith.constant 4 : index
    %c0_72 = arith.constant 0 : index
    %284 = vector.load %arg20[%c4, %c0_72] : memref<16x64xf32, #tpu.memory_space<vmem>>, vector<2x32xf32>
    tpu.vector_store %arg20[%c4, %c0_72], %283 {strides = array<i32>} : memref<16x64xf32, #tpu.memory_space<vmem>>, vector<2x32xf32>,
    %285 = vector.broadcast %195 : vector<2x1xf32> to vector<2x32xf32>
    %286 = arith.mulf %285, %274 : vector<2x32xf32>
    %c10 = arith.constant 10 : index
    %c32_73 = arith.constant 32 : index
    %287 = vector.load %arg20[%c10, %c32_73] : memref<16x64xf32, #tpu.memory_space<vmem>>, vector<2x32xf32>
    tpu.vector_store %arg20[%c10, %c32_73], %286 {strides = array<i32>} : memref<16x64xf32, #tpu.memory_space<vmem>>, vector<2x32xf32>,
    %c0_74 = arith.constant 0 : index
    %c3 = arith.constant 3 : index
    %288 = vector.load %arg3[%c0_74, %c3] : memref<2x8xf32, #tpu.memory_space<vmem>>, vector<2x1xf32>
    %c0_75 = arith.constant 0 : index
    %c4_76 = arith.constant 4 : index
    %289 = vector.load %arg3[%c0_75, %c4_76] : memref<2x8xf32, #tpu.memory_space<vmem>>, vector<2x1xf32>
    %c3_77 = arith.constant 3 : index
    %c0_78 = arith.constant 0 : index
    %c0_79 = arith.constant 0 : index
    %290 = vector.load %arg1[%c3_77, %c0_78, %c0_79] : memref<8x2x128xf32, #tpu.memory_space<vmem>>, vector<1x2x128xf32>
    %291 = vector.shape_cast %290 : vector<1x2x128xf32> to vector<2x128xf32>
    %cst_80 = arith.constant dense<0.000000e+00> : vector<2x128xf32>
    %292 = tpu.matmul %260, %0, %cst_80 {dimension_numbers = #tpu.dot_dimension_numbers<[1], [0], [0], [1], [0, 0, 1, 1], [], []>} : vector<2x32xf32>, vector<32x128xf32>, vector<2x128xf32> -> vector<2x128xf32>
    %293 = arith.addf %291, %292 : vector<2x128xf32>
    %c4_81 = arith.constant 4 : index
    %c0_82 = arith.constant 0 : index
    %c0_83 = arith.constant 0 : index
    %294 = vector.load %arg2[%c4_81, %c0_82, %c0_83] : memref<8x2x128xf32, #tpu.memory_space<vmem>>, vector<1x2x128xf32>
    %295 = vector.shape_cast %294 : vector<1x2x128xf32> to vector<2x128xf32>
    %cst_84 = arith.constant dense<0.000000e+00> : vector<2x128xf32>
    %296 = tpu.matmul %274, %1, %cst_84 {dimension_numbers = #tpu.dot_dimension_numbers<[1], [0], [0], [1], [0, 0, 1, 1], [], []>} : vector<2x32xf32>, vector<32x128xf32>, vector<2x128xf32> -> vector<2x128xf32>
    %297 = arith.addf %295, %296 : vector<2x128xf32>
    %298 = vector.extract_strided_slice %293 {offsets = [0, 0], sizes = [2, 32], strides = [1, 1]} : vector<2x128xf32> to vector<2x32xf32>
    %299 = arith.negf %298 : vector<2x32xf32>
    %300 = math.exp %299 : vector<2x32xf32>
    %cst_85 = arith.constant 1.000000e+00 : f32
    %301 = vector.broadcast %cst_85 : f32 to vector<2x32xf32>
    %302 = arith.addf %301, %300 : vector<2x32xf32>
    %303 = arith.divf %301, %302 : vector<2x32xf32>
    %304 = vector.extract_strided_slice %293 {offsets = [0, 32], sizes = [2, 32], strides = [1, 1]} : vector<2x128xf32> to vector<2x32xf32>
    %305 = arith.negf %304 : vector<2x32xf32>
    %306 = math.exp %305 : vector<2x32xf32>
    %cst_86 = arith.constant 1.000000e+00 : f32
    %307 = vector.broadcast %cst_86 : f32 to vector<2x32xf32>
    %308 = arith.addf %307, %306 : vector<2x32xf32>
    %309 = arith.divf %307, %308 : vector<2x32xf32>
    %310 = vector.extract_strided_slice %293 {offsets = [0, 64], sizes = [2, 32], strides = [1, 1]} : vector<2x128xf32> to vector<2x32xf32>
    %311 = math.tanh %310 : vector<2x32xf32>
    %312 = vector.extract_strided_slice %293 {offsets = [0, 96], sizes = [2, 32], strides = [1, 1]} : vector<2x128xf32> to vector<2x32xf32>
    %313 = arith.negf %312 : vector<2x32xf32>
    %314 = math.exp %313 : vector<2x32xf32>
    %cst_87 = arith.constant 1.000000e+00 : f32
    %315 = vector.broadcast %cst_87 : f32 to vector<2x32xf32>
    %316 = arith.addf %315, %314 : vector<2x32xf32>
    %317 = arith.divf %315, %316 : vector<2x32xf32>
    %318 = arith.mulf %309, %267 : vector<2x32xf32>
    %319 = arith.mulf %303, %311 : vector<2x32xf32>
    %320 = arith.addf %318, %319 : vector<2x32xf32>
    %321 = math.tanh %320 : vector<2x32xf32>
    %322 = arith.mulf %317, %321 : vector<2x32xf32>
    %323 = vector.extract_strided_slice %297 {offsets = [0, 0], sizes = [2, 32], strides = [1, 1]} : vector<2x128xf32> to vector<2x32xf32>
    %324 = arith.negf %323 : vector<2x32xf32>
    %325 = math.exp %324 : vector<2x32xf32>
    %cst_88 = arith.constant 1.000000e+00 : f32
    %326 = vector.broadcast %cst_88 : f32 to vector<2x32xf32>
    %327 = arith.addf %326, %325 : vector<2x32xf32>
    %328 = arith.divf %326, %327 : vector<2x32xf32>
    %329 = vector.extract_strided_slice %297 {offsets = [0, 32], sizes = [2, 32], strides = [1, 1]} : vector<2x128xf32> to vector<2x32xf32>
    %330 = arith.negf %329 : vector<2x32xf32>
    %331 = math.exp %330 : vector<2x32xf32>
    %cst_89 = arith.constant 1.000000e+00 : f32
    %332 = vector.broadcast %cst_89 : f32 to vector<2x32xf32>
    %333 = arith.addf %332, %331 : vector<2x32xf32>
    %334 = arith.divf %332, %333 : vector<2x32xf32>
    %335 = vector.extract_strided_slice %297 {offsets = [0, 64], sizes = [2, 32], strides = [1, 1]} : vector<2x128xf32> to vector<2x32xf32>
    %336 = math.tanh %335 : vector<2x32xf32>
    %337 = vector.extract_strided_slice %297 {offsets = [0, 96], sizes = [2, 32], strides = [1, 1]} : vector<2x128xf32> to vector<2x32xf32>
    %338 = arith.negf %337 : vector<2x32xf32>
    %339 = math.exp %338 : vector<2x32xf32>
    %cst_90 = arith.constant 1.000000e+00 : f32
    %340 = vector.broadcast %cst_90 : f32 to vector<2x32xf32>
    %341 = arith.addf %340, %339 : vector<2x32xf32>
    %342 = arith.divf %340, %341 : vector<2x32xf32>
    %343 = arith.mulf %334, %281 : vector<2x32xf32>
    %344 = arith.mulf %328, %336 : vector<2x32xf32>
    %345 = arith.addf %343, %344 : vector<2x32xf32>
    %346 = math.tanh %345 : vector<2x32xf32>
    %347 = arith.mulf %342, %346 : vector<2x32xf32>
    %348 = vector.broadcast %288 : vector<2x1xf32> to vector<2x32xf32>
    %349 = arith.mulf %348, %322 : vector<2x32xf32>
    %cst_91 = arith.constant 1.000000e+00 : f32
    %350 = vector.broadcast %cst_91 : f32 to vector<2x1xf32>
    %351 = arith.subf %350, %288 : vector<2x1xf32>
    %352 = vector.broadcast %351 : vector<2x1xf32> to vector<2x32xf32>
    %353 = arith.mulf %352, %260 : vector<2x32xf32>
    %354 = arith.addf %349, %353 : vector<2x32xf32>
    %355 = vector.broadcast %288 : vector<2x1xf32> to vector<2x32xf32>
    %356 = arith.mulf %355, %320 : vector<2x32xf32>
    %cst_92 = arith.constant 1.000000e+00 : f32
    %357 = vector.broadcast %cst_92 : f32 to vector<2x1xf32>
    %358 = arith.subf %357, %288 : vector<2x1xf32>
    %359 = vector.broadcast %358 : vector<2x1xf32> to vector<2x32xf32>
    %360 = arith.mulf %359, %267 : vector<2x32xf32>
    %361 = arith.addf %356, %360 : vector<2x32xf32>
    %362 = vector.broadcast %289 : vector<2x1xf32> to vector<2x32xf32>
    %363 = arith.mulf %362, %347 : vector<2x32xf32>
    %cst_93 = arith.constant 1.000000e+00 : f32
    %364 = vector.broadcast %cst_93 : f32 to vector<2x1xf32>
    %365 = arith.subf %364, %289 : vector<2x1xf32>
    %366 = vector.broadcast %365 : vector<2x1xf32> to vector<2x32xf32>
    %367 = arith.mulf %366, %274 : vector<2x32xf32>
    %368 = arith.addf %363, %367 : vector<2x32xf32>
    %369 = vector.broadcast %289 : vector<2x1xf32> to vector<2x32xf32>
    %370 = arith.mulf %369, %345 : vector<2x32xf32>
    %cst_94 = arith.constant 1.000000e+00 : f32
    %371 = vector.broadcast %cst_94 : f32 to vector<2x1xf32>
    %372 = arith.subf %371, %289 : vector<2x1xf32>
    %373 = vector.broadcast %372 : vector<2x1xf32> to vector<2x32xf32>
    %374 = arith.mulf %373, %281 : vector<2x32xf32>
    %375 = arith.addf %370, %374 : vector<2x32xf32>
    %376 = vector.broadcast %288 : vector<2x1xf32> to vector<2x32xf32>
    %377 = arith.mulf %376, %354 : vector<2x32xf32>
    %c6_95 = arith.constant 6 : index
    %c0_96 = arith.constant 0 : index
    %378 = vector.load %arg20[%c6_95, %c0_96] : memref<16x64xf32, #tpu.memory_space<vmem>>, vector<2x32xf32>
    tpu.vector_store %arg20[%c6_95, %c0_96], %377 {strides = array<i32>} : memref<16x64xf32, #tpu.memory_space<vmem>>, vector<2x32xf32>,
    %379 = vector.broadcast %289 : vector<2x1xf32> to vector<2x32xf32>
    %380 = arith.mulf %379, %368 : vector<2x32xf32>
    %c8 = arith.constant 8 : index
    %c32_97 = arith.constant 32 : index
    %381 = vector.load %arg20[%c8, %c32_97] : memref<16x64xf32, #tpu.memory_space<vmem>>, vector<2x32xf32>
    tpu.vector_store %arg20[%c8, %c32_97], %380 {strides = array<i32>} : memref<16x64xf32, #tpu.memory_space<vmem>>, vector<2x32xf32>,
    %c0_98 = arith.constant 0 : index
    %c4_99 = arith.constant 4 : index
    %382 = vector.load %arg3[%c0_98, %c4_99] : memref<2x8xf32, #tpu.memory_space<vmem>>, vector<2x1xf32>
    %c0_100 = arith.constant 0 : index
    %c3_101 = arith.constant 3 : index
    %383 = vector.load %arg3[%c0_100, %c3_101] : memref<2x8xf32, #tpu.memory_space<vmem>>, vector<2x1xf32>
    %c4_102 = arith.constant 4 : index
    %c0_103 = arith.constant 0 : index
    %c0_104 = arith.constant 0 : index
    %384 = vector.load %arg1[%c4_102, %c0_103, %c0_104] : memref<8x2x128xf32, #tpu.memory_space<vmem>>, vector<1x2x128xf32>
    %385 = vector.shape_cast %384 : vector<1x2x128xf32> to vector<2x128xf32>
    %cst_105 = arith.constant dense<0.000000e+00> : vector<2x128xf32>
    %386 = tpu.matmul %354, %0, %cst_105 {dimension_numbers = #tpu.dot_dimension_numbers<[1], [0], [0], [1], [0, 0, 1, 1], [], []>} : vector<2x32xf32>, vector<32x128xf32>, vector<2x128xf32> -> vector<2x128xf32>
    %387 = arith.addf %385, %386 : vector<2x128xf32>
    %c3_106 = arith.constant 3 : index
    %c0_107 = arith.constant 0 : index
    %c0_108 = arith.constant 0 : index
    %388 = vector.load %arg2[%c3_106, %c0_107, %c0_108] : memref<8x2x128xf32, #tpu.memory_space<vmem>>, vector<1x2x128xf32>
    %389 = vector.shape_cast %388 : vector<1x2x128xf32> to vector<2x128xf32>
    %cst_109 = arith.constant dense<0.000000e+00> : vector<2x128xf32>
    %390 = tpu.matmul %368, %1, %cst_109 {dimension_numbers = #tpu.dot_dimension_numbers<[1], [0], [0], [1], [0, 0, 1, 1], [], []>} : vector<2x32xf32>, vector<32x128xf32>, vector<2x128xf32> -> vector<2x128xf32>
    %391 = arith.addf %389, %390 : vector<2x128xf32>
    %392 = vector.extract_strided_slice %387 {offsets = [0, 0], sizes = [2, 32], strides = [1, 1]} : vector<2x128xf32> to vector<2x32xf32>
    %393 = arith.negf %392 : vector<2x32xf32>
    %394 = math.exp %393 : vector<2x32xf32>
    %cst_110 = arith.constant 1.000000e+00 : f32
    %395 = vector.broadcast %cst_110 : f32 to vector<2x32xf32>
    %396 = arith.addf %395, %394 : vector<2x32xf32>
    %397 = arith.divf %395, %396 : vector<2x32xf32>
    %398 = vector.extract_strided_slice %387 {offsets = [0, 32], sizes = [2, 32], strides = [1, 1]} : vector<2x128xf32> to vector<2x32xf32>
    %399 = arith.negf %398 : vector<2x32xf32>
    %400 = math.exp %399 : vector<2x32xf32>
    %cst_111 = arith.constant 1.000000e+00 : f32
    %401 = vector.broadcast %cst_111 : f32 to vector<2x32xf32>
    %402 = arith.addf %401, %400 : vector<2x32xf32>
    %403 = arith.divf %401, %402 : vector<2x32xf32>
    %404 = vector.extract_strided_slice %387 {offsets = [0, 64], sizes = [2, 32], strides = [1, 1]} : vector<2x128xf32> to vector<2x32xf32>
    %405 = math.tanh %404 : vector<2x32xf32>
    %406 = vector.extract_strided_slice %387 {offsets = [0, 96], sizes = [2, 32], strides = [1, 1]} : vector<2x128xf32> to vector<2x32xf32>
    %407 = arith.negf %406 : vector<2x32xf32>
    %408 = math.exp %407 : vector<2x32xf32>
    %cst_112 = arith.constant 1.000000e+00 : f32
    %409 = vector.broadcast %cst_112 : f32 to vector<2x32xf32>
    %410 = arith.addf %409, %408 : vector<2x32xf32>
    %411 = arith.divf %409, %410 : vector<2x32xf32>
    %412 = arith.mulf %403, %361 : vector<2x32xf32>
    %413 = arith.mulf %397, %405 : vector<2x32xf32>
    %414 = arith.addf %412, %413 : vector<2x32xf32>
    %415 = math.tanh %414 : vector<2x32xf32>
    %416 = arith.mulf %411, %415 : vector<2x32xf32>
    %417 = vector.extract_strided_slice %391 {offsets = [0, 0], sizes = [2, 32], strides = [1, 1]} : vector<2x128xf32> to vector<2x32xf32>
    %418 = arith.negf %417 : vector<2x32xf32>
    %419 = math.exp %418 : vector<2x32xf32>
    %cst_113 = arith.constant 1.000000e+00 : f32
    %420 = vector.broadcast %cst_113 : f32 to vector<2x32xf32>
    %421 = arith.addf %420, %419 : vector<2x32xf32>
    %422 = arith.divf %420, %421 : vector<2x32xf32>
    %423 = vector.extract_strided_slice %391 {offsets = [0, 32], sizes = [2, 32], strides = [1, 1]} : vector<2x128xf32> to vector<2x32xf32>
    %424 = arith.negf %423 : vector<2x32xf32>
    %425 = math.exp %424 : vector<2x32xf32>
    %cst_114 = arith.constant 1.000000e+00 : f32
    %426 = vector.broadcast %cst_114 : f32 to vector<2x32xf32>
    %427 = arith.addf %426, %425 : vector<2x32xf32>
    %428 = arith.divf %426, %427 : vector<2x32xf32>
    %429 = vector.extract_strided_slice %391 {offsets = [0, 64], sizes = [2, 32], strides = [1, 1]} : vector<2x128xf32> to vector<2x32xf32>
    %430 = math.tanh %429 : vector<2x32xf32>
    %431 = vector.extract_strided_slice %391 {offsets = [0, 96], sizes = [2, 32], strides = [1, 1]} : vector<2x128xf32> to vector<2x32xf32>
    %432 = arith.negf %431 : vector<2x32xf32>
    %433 = math.exp %432 : vector<2x32xf32>
    %cst_115 = arith.constant 1.000000e+00 : f32
    %434 = vector.broadcast %cst_115 : f32 to vector<2x32xf32>
    %435 = arith.addf %434, %433 : vector<2x32xf32>
    %436 = arith.divf %434, %435 : vector<2x32xf32>
    %437 = arith.mulf %428, %375 : vector<2x32xf32>
    %438 = arith.mulf %422, %430 : vector<2x32xf32>
    %439 = arith.addf %437, %438 : vector<2x32xf32>
    %440 = math.tanh %439 : vector<2x32xf32>
    %441 = arith.mulf %436, %440 : vector<2x32xf32>
    %442 = vector.broadcast %382 : vector<2x1xf32> to vector<2x32xf32>
    %443 = arith.mulf %442, %416 : vector<2x32xf32>
    %cst_116 = arith.constant 1.000000e+00 : f32
    %444 = vector.broadcast %cst_116 : f32 to vector<2x1xf32>
    %445 = arith.subf %444, %382 : vector<2x1xf32>
    %446 = vector.broadcast %445 : vector<2x1xf32> to vector<2x32xf32>
    %447 = arith.mulf %446, %354 : vector<2x32xf32>
    %448 = arith.addf %443, %447 : vector<2x32xf32>
    %449 = vector.broadcast %382 : vector<2x1xf32> to vector<2x32xf32>
    %450 = arith.mulf %449, %414 : vector<2x32xf32>
    %cst_117 = arith.constant 1.000000e+00 : f32
    %451 = vector.broadcast %cst_117 : f32 to vector<2x1xf32>
    %452 = arith.subf %451, %382 : vector<2x1xf32>
    %453 = vector.broadcast %452 : vector<2x1xf32> to vector<2x32xf32>
    %454 = arith.mulf %453, %361 : vector<2x32xf32>
    %455 = arith.addf %450, %454 : vector<2x32xf32>
    %456 = vector.broadcast %383 : vector<2x1xf32> to vector<2x32xf32>
    %457 = arith.mulf %456, %441 : vector<2x32xf32>
    %cst_118 = arith.constant 1.000000e+00 : f32
    %458 = vector.broadcast %cst_118 : f32 to vector<2x1xf32>
    %459 = arith.subf %458, %383 : vector<2x1xf32>
    %460 = vector.broadcast %459 : vector<2x1xf32> to vector<2x32xf32>
    %461 = arith.mulf %460, %368 : vector<2x32xf32>
    %462 = arith.addf %457, %461 : vector<2x32xf32>
    %463 = vector.broadcast %383 : vector<2x1xf32> to vector<2x32xf32>
    %464 = arith.mulf %463, %439 : vector<2x32xf32>
    %cst_119 = arith.constant 1.000000e+00 : f32
    %465 = vector.broadcast %cst_119 : f32 to vector<2x1xf32>
    %466 = arith.subf %465, %383 : vector<2x1xf32>
    %467 = vector.broadcast %466 : vector<2x1xf32> to vector<2x32xf32>
    %468 = arith.mulf %467, %375 : vector<2x32xf32>
    %469 = arith.addf %464, %468 : vector<2x32xf32>
    %470 = vector.broadcast %382 : vector<2x1xf32> to vector<2x32xf32>
    %471 = arith.mulf %470, %448 : vector<2x32xf32>
    %c8_120 = arith.constant 8 : index
    %c0_121 = arith.constant 0 : index
    %472 = vector.load %arg20[%c8_120, %c0_121] : memref<16x64xf32, #tpu.memory_space<vmem>>, vector<2x32xf32>
    tpu.vector_store %arg20[%c8_120, %c0_121], %471 {strides = array<i32>} : memref<16x64xf32, #tpu.memory_space<vmem>>, vector<2x32xf32>,
    %473 = vector.broadcast %383 : vector<2x1xf32> to vector<2x32xf32>
    %474 = arith.mulf %473, %462 : vector<2x32xf32>
    %c6_122 = arith.constant 6 : index
    %c32_123 = arith.constant 32 : index
    %475 = vector.load %arg20[%c6_122, %c32_123] : memref<16x64xf32, #tpu.memory_space<vmem>>, vector<2x32xf32>
    tpu.vector_store %arg20[%c6_122, %c32_123], %474 {strides = array<i32>} : memref<16x64xf32, #tpu.memory_space<vmem>>, vector<2x32xf32>,
    %c0_124 = arith.constant 0 : index
    %c5_125 = arith.constant 5 : index
    %476 = vector.load %arg3[%c0_124, %c5_125] : memref<2x8xf32, #tpu.memory_space<vmem>>, vector<2x1xf32>
    %c0_126 = arith.constant 0 : index
    %c2_127 = arith.constant 2 : index
    %477 = vector.load %arg3[%c0_126, %c2_127] : memref<2x8xf32, #tpu.memory_space<vmem>>, vector<2x1xf32>
    %c5_128 = arith.constant 5 : index
    %c0_129 = arith.constant 0 : index
    %c0_130 = arith.constant 0 : index
    %478 = vector.load %arg1[%c5_128, %c0_129, %c0_130] : memref<8x2x128xf32, #tpu.memory_space<vmem>>, vector<1x2x128xf32>
    %479 = vector.shape_cast %478 : vector<1x2x128xf32> to vector<2x128xf32>
    %cst_131 = arith.constant dense<0.000000e+00> : vector<2x128xf32>
    %480 = tpu.matmul %448, %0, %cst_131 {dimension_numbers = #tpu.dot_dimension_numbers<[1], [0], [0], [1], [0, 0, 1, 1], [], []>} : vector<2x32xf32>, vector<32x128xf32>, vector<2x128xf32> -> vector<2x128xf32>
    %481 = arith.addf %479, %480 : vector<2x128xf32>
    %c2_132 = arith.constant 2 : index
    %c0_133 = arith.constant 0 : index
    %c0_134 = arith.constant 0 : index
    %482 = vector.load %arg2[%c2_132, %c0_133, %c0_134] : memref<8x2x128xf32, #tpu.memory_space<vmem>>, vector<1x2x128xf32>
    %483 = vector.shape_cast %482 : vector<1x2x128xf32> to vector<2x128xf32>
    %cst_135 = arith.constant dense<0.000000e+00> : vector<2x128xf32>
    %484 = tpu.matmul %462, %1, %cst_135 {dimension_numbers = #tpu.dot_dimension_numbers<[1], [0], [0], [1], [0, 0, 1, 1], [], []>} : vector<2x32xf32>, vector<32x128xf32>, vector<2x128xf32> -> vector<2x128xf32>
    %485 = arith.addf %483, %484 : vector<2x128xf32>
    %486 = vector.extract_strided_slice %481 {offsets = [0, 0], sizes = [2, 32], strides = [1, 1]} : vector<2x128xf32> to vector<2x32xf32>
    %487 = arith.negf %486 : vector<2x32xf32>
    %488 = math.exp %487 : vector<2x32xf32>
    %cst_136 = arith.constant 1.000000e+00 : f32
    %489 = vector.broadcast %cst_136 : f32 to vector<2x32xf32>
    %490 = arith.addf %489, %488 : vector<2x32xf32>
    %491 = arith.divf %489, %490 : vector<2x32xf32>
    %492 = vector.extract_strided_slice %481 {offsets = [0, 32], sizes = [2, 32], strides = [1, 1]} : vector<2x128xf32> to vector<2x32xf32>
    %493 = arith.negf %492 : vector<2x32xf32>
    %494 = math.exp %493 : vector<2x32xf32>
    %cst_137 = arith.constant 1.000000e+00 : f32
    %495 = vector.broadcast %cst_137 : f32 to vector<2x32xf32>
    %496 = arith.addf %495, %494 : vector<2x32xf32>
    %497 = arith.divf %495, %496 : vector<2x32xf32>
    %498 = vector.extract_strided_slice %481 {offsets = [0, 64], sizes = [2, 32], strides = [1, 1]} : vector<2x128xf32> to vector<2x32xf32>
    %499 = math.tanh %498 : vector<2x32xf32>
    %500 = vector.extract_strided_slice %481 {offsets = [0, 96], sizes = [2, 32], strides = [1, 1]} : vector<2x128xf32> to vector<2x32xf32>
    %501 = arith.negf %500 : vector<2x32xf32>
    %502 = math.exp %501 : vector<2x32xf32>
    %cst_138 = arith.constant 1.000000e+00 : f32
    %503 = vector.broadcast %cst_138 : f32 to vector<2x32xf32>
    %504 = arith.addf %503, %502 : vector<2x32xf32>
    %505 = arith.divf %503, %504 : vector<2x32xf32>
    %506 = arith.mulf %497, %455 : vector<2x32xf32>
    %507 = arith.mulf %491, %499 : vector<2x32xf32>
    %508 = arith.addf %506, %507 : vector<2x32xf32>
    %509 = math.tanh %508 : vector<2x32xf32>
    %510 = arith.mulf %505, %509 : vector<2x32xf32>
    %511 = vector.extract_strided_slice %485 {offsets = [0, 0], sizes = [2, 32], strides = [1, 1]} : vector<2x128xf32> to vector<2x32xf32>
    %512 = arith.negf %511 : vector<2x32xf32>
    %513 = math.exp %512 : vector<2x32xf32>
    %cst_139 = arith.constant 1.000000e+00 : f32
    %514 = vector.broadcast %cst_139 : f32 to vector<2x32xf32>
    %515 = arith.addf %514, %513 : vector<2x32xf32>
    %516 = arith.divf %514, %515 : vector<2x32xf32>
    %517 = vector.extract_strided_slice %485 {offsets = [0, 32], sizes = [2, 32], strides = [1, 1]} : vector<2x128xf32> to vector<2x32xf32>
    %518 = arith.negf %517 : vector<2x32xf32>
    %519 = math.exp %518 : vector<2x32xf32>
    %cst_140 = arith.constant 1.000000e+00 : f32
    %520 = vector.broadcast %cst_140 : f32 to vector<2x32xf32>
    %521 = arith.addf %520, %519 : vector<2x32xf32>
    %522 = arith.divf %520, %521 : vector<2x32xf32>
    %523 = vector.extract_strided_slice %485 {offsets = [0, 64], sizes = [2, 32], strides = [1, 1]} : vector<2x128xf32> to vector<2x32xf32>
    %524 = math.tanh %523 : vector<2x32xf32>
    %525 = vector.extract_strided_slice %485 {offsets = [0, 96], sizes = [2, 32], strides = [1, 1]} : vector<2x128xf32> to vector<2x32xf32>
    %526 = arith.negf %525 : vector<2x32xf32>
    %527 = math.exp %526 : vector<2x32xf32>
    %cst_141 = arith.constant 1.000000e+00 : f32
    %528 = vector.broadcast %cst_141 : f32 to vector<2x32xf32>
    %529 = arith.addf %528, %527 : vector<2x32xf32>
    %530 = arith.divf %528, %529 : vector<2x32xf32>
    %531 = arith.mulf %522, %469 : vector<2x32xf32>
    %532 = arith.mulf %516, %524 : vector<2x32xf32>
    %533 = arith.addf %531, %532 : vector<2x32xf32>
    %534 = math.tanh %533 : vector<2x32xf32>
    %535 = arith.mulf %530, %534 : vector<2x32xf32>
    %536 = vector.broadcast %476 : vector<2x1xf32> to vector<2x32xf32>
    %537 = arith.mulf %536, %510 : vector<2x32xf32>
    %cst_142 = arith.constant 1.000000e+00 : f32
    %538 = vector.broadcast %cst_142 : f32 to vector<2x1xf32>
    %539 = arith.subf %538, %476 : vector<2x1xf32>
    %540 = vector.broadcast %539 : vector<2x1xf32> to vector<2x32xf32>
    %541 = arith.mulf %540, %448 : vector<2x32xf32>
    %542 = arith.addf %537, %541 : vector<2x32xf32>
    %543 = vector.broadcast %476 : vector<2x1xf32> to vector<2x32xf32>
    %544 = arith.mulf %543, %508 : vector<2x32xf32>
    %cst_143 = arith.constant 1.000000e+00 : f32
    %545 = vector.broadcast %cst_143 : f32 to vector<2x1xf32>
    %546 = arith.subf %545, %476 : vector<2x1xf32>
    %547 = vector.broadcast %546 : vector<2x1xf32> to vector<2x32xf32>
    %548 = arith.mulf %547, %455 : vector<2x32xf32>
    %549 = arith.addf %544, %548 : vector<2x32xf32>
    %550 = vector.broadcast %477 : vector<2x1xf32> to vector<2x32xf32>
    %551 = arith.mulf %550, %535 : vector<2x32xf32>
    %cst_144 = arith.constant 1.000000e+00 : f32
    %552 = vector.broadcast %cst_144 : f32 to vector<2x1xf32>
    %553 = arith.subf %552, %477 : vector<2x1xf32>
    %554 = vector.broadcast %553 : vector<2x1xf32> to vector<2x32xf32>
    %555 = arith.mulf %554, %462 : vector<2x32xf32>
    %556 = arith.addf %551, %555 : vector<2x32xf32>
    %557 = vector.broadcast %477 : vector<2x1xf32> to vector<2x32xf32>
    %558 = arith.mulf %557, %533 : vector<2x32xf32>
    %cst_145 = arith.constant 1.000000e+00 : f32
    %559 = vector.broadcast %cst_145 : f32 to vector<2x1xf32>
    %560 = arith.subf %559, %477 : vector<2x1xf32>
    %561 = vector.broadcast %560 : vector<2x1xf32> to vector<2x32xf32>
    %562 = arith.mulf %561, %469 : vector<2x32xf32>
    %563 = arith.addf %558, %562 : vector<2x32xf32>
    %564 = vector.broadcast %476 : vector<2x1xf32> to vector<2x32xf32>
    %565 = arith.mulf %564, %542 : vector<2x32xf32>
    %c10_146 = arith.constant 10 : index
    %c0_147 = arith.constant 0 : index
    %566 = vector.load %arg20[%c10_146, %c0_147] : memref<16x64xf32, #tpu.memory_space<vmem>>, vector<2x32xf32>
    tpu.vector_store %arg20[%c10_146, %c0_147], %565 {strides = array<i32>} : memref<16x64xf32, #tpu.memory_space<vmem>>, vector<2x32xf32>,
    %567 = vector.broadcast %477 : vector<2x1xf32> to vector<2x32xf32>
    %568 = arith.mulf %567, %556 : vector<2x32xf32>
    %c4_148 = arith.constant 4 : index
    %c32_149 = arith.constant 32 : index
    %569 = vector.load %arg20[%c4_148, %c32_149] : memref<16x64xf32, #tpu.memory_space<vmem>>, vector<2x32xf32>
    tpu.vector_store %arg20[%c4_148, %c32_149], %568 {strides = array<i32>} : memref<16x64xf32, #tpu.memory_space<vmem>>, vector<2x32xf32>,
    %c0_150 = arith.constant 0 : index
    %c6_151 = arith.constant 6 : index
    %570 = vector.load %arg3[%c0_150, %c6_151] : memref<2x8xf32, #tpu.memory_space<vmem>>, vector<2x1xf32>
    %c0_152 = arith.constant 0 : index
    %c1_153 = arith.constant 1 : index
    %571 = vector.load %arg3[%c0_152, %c1_153] : memref<2x8xf32, #tpu.memory_space<vmem>>, vector<2x1xf32>
    %c6_154 = arith.constant 6 : index
    %c0_155 = arith.constant 0 : index
    %c0_156 = arith.constant 0 : index
    %572 = vector.load %arg1[%c6_154, %c0_155, %c0_156] : memref<8x2x128xf32, #tpu.memory_space<vmem>>, vector<1x2x128xf32>
    %573 = vector.shape_cast %572 : vector<1x2x128xf32> to vector<2x128xf32>
    %cst_157 = arith.constant dense<0.000000e+00> : vector<2x128xf32>
    %574 = tpu.matmul %542, %0, %cst_157 {dimension_numbers = #tpu.dot_dimension_numbers<[1], [0], [0], [1], [0, 0, 1, 1], [], []>} : vector<2x32xf32>, vector<32x128xf32>, vector<2x128xf32> -> vector<2x128xf32>
    %575 = arith.addf %573, %574 : vector<2x128xf32>
    %c1_158 = arith.constant 1 : index
    %c0_159 = arith.constant 0 : index
    %c0_160 = arith.constant 0 : index
    %576 = vector.load %arg2[%c1_158, %c0_159, %c0_160] : memref<8x2x128xf32, #tpu.memory_space<vmem>>, vector<1x2x128xf32>
    %577 = vector.shape_cast %576 : vector<1x2x128xf32> to vector<2x128xf32>
    %cst_161 = arith.constant dense<0.000000e+00> : vector<2x128xf32>
    %578 = tpu.matmul %556, %1, %cst_161 {dimension_numbers = #tpu.dot_dimension_numbers<[1], [0], [0], [1], [0, 0, 1, 1], [], []>} : vector<2x32xf32>, vector<32x128xf32>, vector<2x128xf32> -> vector<2x128xf32>
    %579 = arith.addf %577, %578 : vector<2x128xf32>
    %580 = vector.extract_strided_slice %575 {offsets = [0, 0], sizes = [2, 32], strides = [1, 1]} : vector<2x128xf32> to vector<2x32xf32>
    %581 = arith.negf %580 : vector<2x32xf32>
    %582 = math.exp %581 : vector<2x32xf32>
    %cst_162 = arith.constant 1.000000e+00 : f32
    %583 = vector.broadcast %cst_162 : f32 to vector<2x32xf32>
    %584 = arith.addf %583, %582 : vector<2x32xf32>
    %585 = arith.divf %583, %584 : vector<2x32xf32>
    %586 = vector.extract_strided_slice %575 {offsets = [0, 32], sizes = [2, 32], strides = [1, 1]} : vector<2x128xf32> to vector<2x32xf32>
    %587 = arith.negf %586 : vector<2x32xf32>
    %588 = math.exp %587 : vector<2x32xf32>
    %cst_163 = arith.constant 1.000000e+00 : f32
    %589 = vector.broadcast %cst_163 : f32 to vector<2x32xf32>
    %590 = arith.addf %589, %588 : vector<2x32xf32>
    %591 = arith.divf %589, %590 : vector<2x32xf32>
    %592 = vector.extract_strided_slice %575 {offsets = [0, 64], sizes = [2, 32], strides = [1, 1]} : vector<2x128xf32> to vector<2x32xf32>
    %593 = math.tanh %592 : vector<2x32xf32>
    %594 = vector.extract_strided_slice %575 {offsets = [0, 96], sizes = [2, 32], strides = [1, 1]} : vector<2x128xf32> to vector<2x32xf32>
    %595 = arith.negf %594 : vector<2x32xf32>
    %596 = math.exp %595 : vector<2x32xf32>
    %cst_164 = arith.constant 1.000000e+00 : f32
    %597 = vector.broadcast %cst_164 : f32 to vector<2x32xf32>
    %598 = arith.addf %597, %596 : vector<2x32xf32>
    %599 = arith.divf %597, %598 : vector<2x32xf32>
    %600 = arith.mulf %591, %549 : vector<2x32xf32>
    %601 = arith.mulf %585, %593 : vector<2x32xf32>
    %602 = arith.addf %600, %601 : vector<2x32xf32>
    %603 = math.tanh %602 : vector<2x32xf32>
    %604 = arith.mulf %599, %603 : vector<2x32xf32>
    %605 = vector.extract_strided_slice %579 {offsets = [0, 0], sizes = [2, 32], strides = [1, 1]} : vector<2x128xf32> to vector<2x32xf32>
    %606 = arith.negf %605 : vector<2x32xf32>
    %607 = math.exp %606 : vector<2x32xf32>
    %cst_165 = arith.constant 1.000000e+00 : f32
    %608 = vector.broadcast %cst_165 : f32 to vector<2x32xf32>
    %609 = arith.addf %608, %607 : vector<2x32xf32>
    %610 = arith.divf %608, %609 : vector<2x32xf32>
    %611 = vector.extract_strided_slice %579 {offsets = [0, 32], sizes = [2, 32], strides = [1, 1]} : vector<2x128xf32> to vector<2x32xf32>
    %612 = arith.negf %611 : vector<2x32xf32>
    %613 = math.exp %612 : vector<2x32xf32>
    %cst_166 = arith.constant 1.000000e+00 : f32
    %614 = vector.broadcast %cst_166 : f32 to vector<2x32xf32>
    %615 = arith.addf %614, %613 : vector<2x32xf32>
    %616 = arith.divf %614, %615 : vector<2x32xf32>
    %617 = vector.extract_strided_slice %579 {offsets = [0, 64], sizes = [2, 32], strides = [1, 1]} : vector<2x128xf32> to vector<2x32xf32>
    %618 = math.tanh %617 : vector<2x32xf32>
    %619 = vector.extract_strided_slice %579 {offsets = [0, 96], sizes = [2, 32], strides = [1, 1]} : vector<2x128xf32> to vector<2x32xf32>
    %620 = arith.negf %619 : vector<2x32xf32>
    %621 = math.exp %620 : vector<2x32xf32>
    %cst_167 = arith.constant 1.000000e+00 : f32
    %622 = vector.broadcast %cst_167 : f32 to vector<2x32xf32>
    %623 = arith.addf %622, %621 : vector<2x32xf32>
    %624 = arith.divf %622, %623 : vector<2x32xf32>
    %625 = arith.mulf %616, %563 : vector<2x32xf32>
    %626 = arith.mulf %610, %618 : vector<2x32xf32>
    %627 = arith.addf %625, %626 : vector<2x32xf32>
    %628 = math.tanh %627 : vector<2x32xf32>
    %629 = arith.mulf %624, %628 : vector<2x32xf32>
    %630 = vector.broadcast %570 : vector<2x1xf32> to vector<2x32xf32>
    %631 = arith.mulf %630, %604 : vector<2x32xf32>
    %cst_168 = arith.constant 1.000000e+00 : f32
    %632 = vector.broadcast %cst_168 : f32 to vector<2x1xf32>
    %633 = arith.subf %632, %570 : vector<2x1xf32>
    %634 = vector.broadcast %633 : vector<2x1xf32> to vector<2x32xf32>
    %635 = arith.mulf %634, %542 : vector<2x32xf32>
    %636 = arith.addf %631, %635 : vector<2x32xf32>
    %637 = vector.broadcast %570 : vector<2x1xf32> to vector<2x32xf32>
    %638 = arith.mulf %637, %602 : vector<2x32xf32>
    %cst_169 = arith.constant 1.000000e+00 : f32
    %639 = vector.broadcast %cst_169 : f32 to vector<2x1xf32>
    %640 = arith.subf %639, %570 : vector<2x1xf32>
    %641 = vector.broadcast %640 : vector<2x1xf32> to vector<2x32xf32>
    %642 = arith.mulf %641, %549 : vector<2x32xf32>
    %643 = arith.addf %638, %642 : vector<2x32xf32>
    %644 = vector.broadcast %571 : vector<2x1xf32> to vector<2x32xf32>
    %645 = arith.mulf %644, %629 : vector<2x32xf32>
    %cst_170 = arith.constant 1.000000e+00 : f32
    %646 = vector.broadcast %cst_170 : f32 to vector<2x1xf32>
    %647 = arith.subf %646, %571 : vector<2x1xf32>
    %648 = vector.broadcast %647 : vector<2x1xf32> to vector<2x32xf32>
    %649 = arith.mulf %648, %556 : vector<2x32xf32>
    %650 = arith.addf %645, %649 : vector<2x32xf32>
    %651 = vector.broadcast %571 : vector<2x1xf32> to vector<2x32xf32>
    %652 = arith.mulf %651, %627 : vector<2x32xf32>
    %cst_171 = arith.constant 1.000000e+00 : f32
    %653 = vector.broadcast %cst_171 : f32 to vector<2x1xf32>
    %654 = arith.subf %653, %571 : vector<2x1xf32>
    %655 = vector.broadcast %654 : vector<2x1xf32> to vector<2x32xf32>
    %656 = arith.mulf %655, %563 : vector<2x32xf32>
    %657 = arith.addf %652, %656 : vector<2x32xf32>
    %658 = vector.broadcast %570 : vector<2x1xf32> to vector<2x32xf32>
    %659 = arith.mulf %658, %636 : vector<2x32xf32>
    %c12_172 = arith.constant 12 : index
    %c0_173 = arith.constant 0 : index
    %660 = vector.load %arg20[%c12_172, %c0_173] : memref<16x64xf32, #tpu.memory_space<vmem>>, vector<2x32xf32>
    tpu.vector_store %arg20[%c12_172, %c0_173], %659 {strides = array<i32>} : memref<16x64xf32, #tpu.memory_space<vmem>>, vector<2x32xf32>,
    %661 = vector.broadcast %571 : vector<2x1xf32> to vector<2x32xf32>
    %662 = arith.mulf %661, %650 : vector<2x32xf32>
    %c2_174 = arith.constant 2 : index
    %c32_175 = arith.constant 32 : index
    %663 = vector.load %arg20[%c2_174, %c32_175] : memref<16x64xf32, #tpu.memory_space<vmem>>, vector<2x32xf32>
    tpu.vector_store %arg20[%c2_174, %c32_175], %662 {strides = array<i32>} : memref<16x64xf32, #tpu.memory_space<vmem>>, vector<2x32xf32>,
    %c0_176 = arith.constant 0 : index
    %c7_177 = arith.constant 7 : index
    %664 = vector.load %arg3[%c0_176, %c7_177] : memref<2x8xf32, #tpu.memory_space<vmem>>, vector<2x1xf32>
    %c0_178 = arith.constant 0 : index
    %c0_179 = arith.constant 0 : index
    %665 = vector.load %arg3[%c0_178, %c0_179] : memref<2x8xf32, #tpu.memory_space<vmem>>, vector<2x1xf32>
    %c7_180 = arith.constant 7 : index
    %c0_181 = arith.constant 0 : index
    %c0_182 = arith.constant 0 : index
    %666 = vector.load %arg1[%c7_180, %c0_181, %c0_182] : memref<8x2x128xf32, #tpu.memory_space<vmem>>, vector<1x2x128xf32>
    %667 = vector.shape_cast %666 : vector<1x2x128xf32> to vector<2x128xf32>
    %cst_183 = arith.constant dense<0.000000e+00> : vector<2x128xf32>
    %668 = tpu.matmul %636, %0, %cst_183 {dimension_numbers = #tpu.dot_dimension_numbers<[1], [0], [0], [1], [0, 0, 1, 1], [], []>} : vector<2x32xf32>, vector<32x128xf32>, vector<2x128xf32> -> vector<2x128xf32>
    %669 = arith.addf %667, %668 : vector<2x128xf32>
    %c0_184 = arith.constant 0 : index
    %c0_185 = arith.constant 0 : index
    %c0_186 = arith.constant 0 : index
    %670 = vector.load %arg2[%c0_184, %c0_185, %c0_186] : memref<8x2x128xf32, #tpu.memory_space<vmem>>, vector<1x2x128xf32>
    %671 = vector.shape_cast %670 : vector<1x2x128xf32> to vector<2x128xf32>
    %cst_187 = arith.constant dense<0.000000e+00> : vector<2x128xf32>
    %672 = tpu.matmul %650, %1, %cst_187 {dimension_numbers = #tpu.dot_dimension_numbers<[1], [0], [0], [1], [0, 0, 1, 1], [], []>} : vector<2x32xf32>, vector<32x128xf32>, vector<2x128xf32> -> vector<2x128xf32>
    %673 = arith.addf %671, %672 : vector<2x128xf32>
    %674 = vector.extract_strided_slice %669 {offsets = [0, 0], sizes = [2, 32], strides = [1, 1]} : vector<2x128xf32> to vector<2x32xf32>
    %675 = arith.negf %674 : vector<2x32xf32>
    %676 = math.exp %675 : vector<2x32xf32>
    %cst_188 = arith.constant 1.000000e+00 : f32
    %677 = vector.broadcast %cst_188 : f32 to vector<2x32xf32>
    %678 = arith.addf %677, %676 : vector<2x32xf32>
    %679 = arith.divf %677, %678 : vector<2x32xf32>
    %680 = vector.extract_strided_slice %669 {offsets = [0, 32], sizes = [2, 32], strides = [1, 1]} : vector<2x128xf32> to vector<2x32xf32>
    %681 = arith.negf %680 : vector<2x32xf32>
    %682 = math.exp %681 : vector<2x32xf32>
    %cst_189 = arith.constant 1.000000e+00 : f32
    %683 = vector.broadcast %cst_189 : f32 to vector<2x32xf32>
    %684 = arith.addf %683, %682 : vector<2x32xf32>
    %685 = arith.divf %683, %684 : vector<2x32xf32>
    %686 = vector.extract_strided_slice %669 {offsets = [0, 64], sizes = [2, 32], strides = [1, 1]} : vector<2x128xf32> to vector<2x32xf32>
    %687 = math.tanh %686 : vector<2x32xf32>
    %688 = vector.extract_strided_slice %669 {offsets = [0, 96], sizes = [2, 32], strides = [1, 1]} : vector<2x128xf32> to vector<2x32xf32>
    %689 = arith.negf %688 : vector<2x32xf32>
    %690 = math.exp %689 : vector<2x32xf32>
    %cst_190 = arith.constant 1.000000e+00 : f32
    %691 = vector.broadcast %cst_190 : f32 to vector<2x32xf32>
    %692 = arith.addf %691, %690 : vector<2x32xf32>
    %693 = arith.divf %691, %692 : vector<2x32xf32>
    %694 = arith.mulf %685, %643 : vector<2x32xf32>
    %695 = arith.mulf %679, %687 : vector<2x32xf32>
    %696 = arith.addf %694, %695 : vector<2x32xf32>
    %697 = math.tanh %696 : vector<2x32xf32>
    %698 = arith.mulf %693, %697 : vector<2x32xf32>
    %699 = vector.extract_strided_slice %673 {offsets = [0, 0], sizes = [2, 32], strides = [1, 1]} : vector<2x128xf32> to vector<2x32xf32>
    %700 = arith.negf %699 : vector<2x32xf32>
    %701 = math.exp %700 : vector<2x32xf32>
    %cst_191 = arith.constant 1.000000e+00 : f32
    %702 = vector.broadcast %cst_191 : f32 to vector<2x32xf32>
    %703 = arith.addf %702, %701 : vector<2x32xf32>
    %704 = arith.divf %702, %703 : vector<2x32xf32>
    %705 = vector.extract_strided_slice %673 {offsets = [0, 32], sizes = [2, 32], strides = [1, 1]} : vector<2x128xf32> to vector<2x32xf32>
    %706 = arith.negf %705 : vector<2x32xf32>
    %707 = math.exp %706 : vector<2x32xf32>
    %cst_192 = arith.constant 1.000000e+00 : f32
    %708 = vector.broadcast %cst_192 : f32 to vector<2x32xf32>
    %709 = arith.addf %708, %707 : vector<2x32xf32>
    %710 = arith.divf %708, %709 : vector<2x32xf32>
    %711 = vector.extract_strided_slice %673 {offsets = [0, 64], sizes = [2, 32], strides = [1, 1]} : vector<2x128xf32> to vector<2x32xf32>
    %712 = math.tanh %711 : vector<2x32xf32>
    %713 = vector.extract_strided_slice %673 {offsets = [0, 96], sizes = [2, 32], strides = [1, 1]} : vector<2x128xf32> to vector<2x32xf32>
    %714 = arith.negf %713 : vector<2x32xf32>
    %715 = math.exp %714 : vector<2x32xf32>
    %cst_193 = arith.constant 1.000000e+00 : f32
    %716 = vector.broadcast %cst_193 : f32 to vector<2x32xf32>
    %717 = arith.addf %716, %715 : vector<2x32xf32>
    %718 = arith.divf %716, %717 : vector<2x32xf32>
    %719 = arith.mulf %710, %657 : vector<2x32xf32>
    %720 = arith.mulf %704, %712 : vector<2x32xf32>
    %721 = arith.addf %719, %720 : vector<2x32xf32>
    %722 = math.tanh %721 : vector<2x32xf32>
    %723 = arith.mulf %718, %722 : vector<2x32xf32>
    %724 = vector.broadcast %664 : vector<2x1xf32> to vector<2x32xf32>
    %725 = arith.mulf %724, %698 : vector<2x32xf32>
    %cst_194 = arith.constant 1.000000e+00 : f32
    %726 = vector.broadcast %cst_194 : f32 to vector<2x1xf32>
    %727 = arith.subf %726, %664 : vector<2x1xf32>
    %728 = vector.broadcast %727 : vector<2x1xf32> to vector<2x32xf32>
    %729 = arith.mulf %728, %636 : vector<2x32xf32>
    %730 = arith.addf %725, %729 : vector<2x32xf32>
    %731 = vector.broadcast %665 : vector<2x1xf32> to vector<2x32xf32>
    %732 = arith.mulf %731, %723 : vector<2x32xf32>
    %cst_195 = arith.constant 1.000000e+00 : f32
    %733 = vector.broadcast %cst_195 : f32 to vector<2x1xf32>
    %734 = arith.subf %733, %665 : vector<2x1xf32>
    %735 = vector.broadcast %734 : vector<2x1xf32> to vector<2x32xf32>
    %736 = arith.mulf %735, %650 : vector<2x32xf32>
    %737 = arith.addf %732, %736 : vector<2x32xf32>
    %738 = vector.broadcast %664 : vector<2x1xf32> to vector<2x32xf32>
    %739 = arith.mulf %738, %730 : vector<2x32xf32>
    %c14_196 = arith.constant 14 : index
    %c0_197 = arith.constant 0 : index
    %740 = vector.load %arg20[%c14_196, %c0_197] : memref<16x64xf32, #tpu.memory_space<vmem>>, vector<2x32xf32>
    tpu.vector_store %arg20[%c14_196, %c0_197], %739 {strides = array<i32>} : memref<16x64xf32, #tpu.memory_space<vmem>>, vector<2x32xf32>,
    %741 = vector.broadcast %665 : vector<2x1xf32> to vector<2x32xf32>
    %742 = arith.mulf %741, %737 : vector<2x32xf32>
    %c0_198 = arith.constant 0 : index
    %c32_199 = arith.constant 32 : index
    %743 = vector.load %arg20[%c0_198, %c32_199] : memref<16x64xf32, #tpu.memory_space<vmem>>, vector<2x32xf32>
    tpu.vector_store %arg20[%c0_198, %c32_199], %742 {strides = array<i32>} : memref<16x64xf32, #tpu.memory_space<vmem>>, vector<2x32xf32>,
    %c0_200 = arith.constant 0 : index
    %c0_201 = arith.constant 0 : index
    %744 = vector.load %arg20[%c0_200, %c0_201] : memref<16x64xf32, #tpu.memory_space<vmem>>, vector<16x64xf32>
    %c0_202 = arith.constant 0 : index
    %c0_203 = arith.constant 0 : index
    %745 = vector.load %arg6[%c0_202, %c0_203] : memref<64x5xf32, #tpu.memory_space<vmem>>, vector<64x5xf32>
    %cst_204 = arith.constant dense<0.000000e+00> : vector<16x5xf32>
    %746 = tpu.matmul %744, %745, %cst_204 {dimension_numbers = #tpu.dot_dimension_numbers<[1], [0], [0], [1], [0, 0, 1, 1], [], []>} : vector<16x64xf32>, vector<64x5xf32>, vector<16x5xf32> -> vector<16x5xf32>
    %c0_205 = arith.constant 0 : index
    %c0_206 = arith.constant 0 : index
    %747 = vector.load %arg7[%c0_205, %c0_206] : memref<1x5xf32, #tpu.memory_space<vmem>>, vector<1x5xf32>
    %748 = vector.broadcast %747 : vector<1x5xf32> to vector<16x5xf32>
    %749 = arith.addf %746, %748 : vector<16x5xf32>
    %c0_207 = arith.constant 0 : index
    %c0_208 = arith.constant 0 : index
    %750 = vector.load %arg17[%c0_207, %c0_208] : memref<16x5xf32, #tpu.memory_space<vmem>>, vector<16x5xf32>
    tpu.vector_store %arg17[%c0_207, %c0_208], %749 {strides = array<i32>} : memref<16x5xf32, #tpu.memory_space<vmem>>, vector<16x5xf32>,
    %751 = tpu.concatenate %730, %737 in 1 : vector<2x32xf32>, vector<2x32xf32> -> vector<2x64xf32>
    %c0_209 = arith.constant 0 : index
    %c0_210 = arith.constant 0 : index
    %752 = vector.load %arg8[%c0_209, %c0_210] : memref<64x64xf32, #tpu.memory_space<vmem>>, vector<64x64xf32>
    %cst_211 = arith.constant dense<0.000000e+00> : vector<2x64xf32>
    %753 = tpu.matmul %751, %752, %cst_211 {dimension_numbers = #tpu.dot_dimension_numbers<[1], [0], [0], [1], [0, 0, 1, 1], [], []>} : vector<2x64xf32>, vector<64x64xf32>, vector<2x64xf32> -> vector<2x64xf32>
    %c0_212 = arith.constant 0 : index
    %c0_213 = arith.constant 0 : index
    %754 = vector.load %arg9[%c0_212, %c0_213] : memref<1x64xf32, #tpu.memory_space<vmem>>, vector<1x64xf32>
    %755 = vector.broadcast %754 : vector<1x64xf32> to vector<2x64xf32>
    %756 = arith.addf %753, %755 : vector<2x64xf32>
    %757 = math.tanh %756 : vector<2x64xf32>
    %c0_214 = arith.constant 0 : index
    %c0_215 = arith.constant 0 : index
    %758 = vector.load %arg10[%c0_214, %c0_215] : memref<64x3xf32, #tpu.memory_space<vmem>>, vector<64x3xf32>
    %cst_216 = arith.constant dense<0.000000e+00> : vector<2x3xf32>
    %759 = tpu.matmul %757, %758, %cst_216 {dimension_numbers = #tpu.dot_dimension_numbers<[1], [0], [0], [1], [0, 0, 1, 1], [], []>} : vector<2x64xf32>, vector<64x3xf32>, vector<2x3xf32> -> vector<2x3xf32>
    %c0_217 = arith.constant 0 : index
    %c0_218 = arith.constant 0 : index
    %760 = vector.load %arg11[%c0_217, %c0_218] : memref<1x3xf32, #tpu.memory_space<vmem>>, vector<1x3xf32>
    %761 = vector.broadcast %760 : vector<1x3xf32> to vector<2x3xf32>
    %762 = arith.addf %759, %761 : vector<2x3xf32>
    %c0_219 = arith.constant 0 : index
    %c0_220 = arith.constant 0 : index
    %763 = vector.load %arg18[%c0_219, %c0_220] : memref<2x3xf32, #tpu.memory_space<vmem>>, vector<2x3xf32>
    tpu.vector_store %arg18[%c0_219, %c0_220], %762 {strides = array<i32>} : memref<2x3xf32, #tpu.memory_space<vmem>>, vector<2x3xf32>,
    %c0_221 = arith.constant 0 : index
    %c0_222 = arith.constant 0 : index
    %764 = vector.load %arg12[%c0_221, %c0_222] : memref<16x1xi32, #tpu.memory_space<vmem>>, vector<16x1xi32>
    %c0_223 = arith.constant 0 : index
    %c0_224 = arith.constant 0 : index
    %765 = vector.load %arg13[%c0_223, %c0_224] : memref<16x1xf32, #tpu.memory_space<vmem>>, vector<16x1xf32>
    %c0_225 = arith.constant 0 : index
    %c0_226 = arith.constant 0 : index
    %766 = vector.load %arg14[%c0_225, %c0_226] : memref<1x5xf32, #tpu.memory_space<vmem>>, vector<1x5xf32>
    %cst_227 = arith.constant dense<0xFF800000> : vector<16xf32>
    %767 = vector.multi_reduction <maximumf>, %749, %cst_227 [1] : vector<16x5xf32> to vector<16xf32>
    %768 = vector.shape_cast %767 : vector<16xf32> to vector<16x1xf32>
    %769 = vector.broadcast %768 : vector<16x1xf32> to vector<16x5xf32>
    %770 = arith.subf %749, %769 : vector<16x5xf32>
    %771 = math.exp %770 : vector<16x5xf32>
    %cst_228 = arith.constant dense<0.000000e+00> : vector<16xf32>
    %772 = vector.multi_reduction <add>, %771, %cst_228 [1] : vector<16x5xf32> to vector<16xf32>
    %773 = vector.shape_cast %772 : vector<16xf32> to vector<16x1xf32>
    %774 = math.log %773 : vector<16x1xf32>
    %775 = vector.broadcast %774 : vector<16x1xf32> to vector<16x5xf32>
    %776 = arith.subf %770, %775 : vector<16x5xf32>
    %777 = tpu.iota {dimensions = array<i32: 1>} : vector<16x5xi32>
    %778 = vector.broadcast %764 : vector<16x1xi32> to vector<16x5xi32>
    %779 = arith.cmpi eq, %777, %778 : vector<16x5xi32>
    %780 = arith.extui %779 : vector<16x5xi1> to vector<16x5xi32>
    %781 = arith.sitofp %780 : vector<16x5xi32> to vector<16x5xf32>
    %782 = vector.broadcast %766 : vector<1x5xf32> to vector<16x5xf32>
    %783 = arith.mulf %781, %782 : vector<16x5xf32>
    %cst_229 = arith.constant dense<0.000000e+00> : vector<16xf32>
    %784 = vector.multi_reduction <add>, %783, %cst_229 [1] : vector<16x5xf32> to vector<16xf32>
    %785 = vector.shape_cast %784 : vector<16xf32> to vector<16x1xf32>
    %786 = arith.mulf %781, %776 : vector<16x5xf32>
    %cst_230 = arith.constant dense<0.000000e+00> : vector<16xf32>
    %787 = vector.multi_reduction <add>, %786, %cst_230 [1] : vector<16x5xf32> to vector<16xf32>
    %788 = vector.shape_cast %787 : vector<16xf32> to vector<16x1xf32>
    %cst_231 = arith.constant 0.000000e+00 : f32
    %789 = vector.broadcast %cst_231 : f32 to vector<16x1xf32>
    %790 = arith.subf %789, %788 : vector<16x1xf32>
    %791 = arith.mulf %765, %785 : vector<16x1xf32>
    %792 = arith.mulf %791, %790 : vector<16x1xf32>
    %cst_232 = arith.constant dense<0.000000e+00> : vector<1xf32>
    %793 = vector.multi_reduction <add>, %792, %cst_232 [0] : vector<16x1xf32> to vector<1xf32>
    %794 = vector.shape_cast %793 : vector<1xf32> to vector<1x1xf32>
    %795 = arith.mulf %765, %785 : vector<16x1xf32>
    %cst_233 = arith.constant dense<0.000000e+00> : vector<1xf32>
    %796 = vector.multi_reduction <add>, %795, %cst_233 [0] : vector<16x1xf32> to vector<1xf32>
    %797 = vector.shape_cast %796 : vector<1xf32> to vector<1x1xf32>
    %798 = arith.divf %794, %797 : vector<1x1xf32>
    %c0_234 = arith.constant 0 : index
    %c0_235 = arith.constant 0 : index
    %799 = vector.load %arg15[%c0_234, %c0_235] : memref<2x1xi32, #tpu.memory_space<vmem>>, vector<2x1xi32>
    %cst_236 = arith.constant 1.000000e+00 : f32
    %800 = vector.broadcast %cst_236 : f32 to vector<2x1xf32>
    %c0_237 = arith.constant 0 : index
    %c0_238 = arith.constant 0 : index
    %801 = vector.load %arg16[%c0_237, %c0_238] : memref<1x3xf32, #tpu.memory_space<vmem>>, vector<1x3xf32>
    %cst_239 = arith.constant dense<0xFF800000> : vector<2xf32>
    %802 = vector.multi_reduction <maximumf>, %762, %cst_239 [1] : vector<2x3xf32> to vector<2xf32>
    %803 = vector.shape_cast %802 : vector<2xf32> to vector<2x1xf32>
    %804 = vector.broadcast %803 : vector<2x1xf32> to vector<2x3xf32>
    %805 = arith.subf %762, %804 : vector<2x3xf32>
    %806 = math.exp %805 : vector<2x3xf32>
    %cst_240 = arith.constant dense<0.000000e+00> : vector<2xf32>
    %807 = vector.multi_reduction <add>, %806, %cst_240 [1] : vector<2x3xf32> to vector<2xf32>
    %808 = vector.shape_cast %807 : vector<2xf32> to vector<2x1xf32>
    %809 = math.log %808 : vector<2x1xf32>
    %810 = vector.broadcast %809 : vector<2x1xf32> to vector<2x3xf32>
    %811 = arith.subf %805, %810 : vector<2x3xf32>
    %812 = tpu.iota {dimensions = array<i32: 1>} : vector<2x3xi32>
    %813 = vector.broadcast %799 : vector<2x1xi32> to vector<2x3xi32>
    %814 = arith.cmpi eq, %812, %813 : vector<2x3xi32>
    %815 = arith.extui %814 : vector<2x3xi1> to vector<2x3xi32>
    %816 = arith.sitofp %815 : vector<2x3xi32> to vector<2x3xf32>
    %817 = vector.broadcast %801 : vector<1x3xf32> to vector<2x3xf32>
    %818 = arith.mulf %816, %817 : vector<2x3xf32>
    %cst_241 = arith.constant dense<0.000000e+00> : vector<2xf32>
    %819 = vector.multi_reduction <add>, %818, %cst_241 [1] : vector<2x3xf32> to vector<2xf32>
    %820 = vector.shape_cast %819 : vector<2xf32> to vector<2x1xf32>
    %821 = arith.mulf %816, %811 : vector<2x3xf32>
    %cst_242 = arith.constant dense<0.000000e+00> : vector<2xf32>
    %822 = vector.multi_reduction <add>, %821, %cst_242 [1] : vector<2x3xf32> to vector<2xf32>
    %823 = vector.shape_cast %822 : vector<2xf32> to vector<2x1xf32>
    %cst_243 = arith.constant 0.000000e+00 : f32
    %824 = vector.broadcast %cst_243 : f32 to vector<2x1xf32>
    %825 = arith.subf %824, %823 : vector<2x1xf32>
    %826 = arith.mulf %800, %820 : vector<2x1xf32>
    %827 = arith.mulf %826, %825 : vector<2x1xf32>
    %cst_244 = arith.constant dense<0.000000e+00> : vector<1xf32>
    %828 = vector.multi_reduction <add>, %827, %cst_244 [0] : vector<2x1xf32> to vector<1xf32>
    %829 = vector.shape_cast %828 : vector<1xf32> to vector<1x1xf32>
    %830 = arith.mulf %800, %820 : vector<2x1xf32>
    %cst_245 = arith.constant dense<0.000000e+00> : vector<1xf32>
    %831 = vector.multi_reduction <add>, %830, %cst_245 [0] : vector<2x1xf32> to vector<1xf32>
    %832 = vector.shape_cast %831 : vector<1xf32> to vector<1x1xf32>
    %833 = arith.divf %829, %832 : vector<1x1xf32>
    %cst_246 = arith.constant 1.000000e+00 : f32
    %834 = vector.broadcast %cst_246 : f32 to vector<1x1xf32>
    %835 = arith.mulf %834, %798 : vector<1x1xf32>
    %cst_247 = arith.constant 1.000000e+00 : f32
    %836 = vector.broadcast %cst_247 : f32 to vector<1x1xf32>
    %837 = arith.mulf %836, %833 : vector<1x1xf32>
    %838 = arith.addf %835, %837 : vector<1x1xf32>
    %c0_248 = arith.constant 0 : index
    %c0_249 = arith.constant 0 : index
    %839 = vector.load %arg19[%c0_248, %c0_249] : memref<1x1xf32, #tpu.memory_space<vmem>>, vector<1x1xf32>
    tpu.vector_store %arg19[%c0_248, %c0_249], %838 {strides = array<i32>} : memref<1x1xf32, #tpu.memory_space<vmem>>, vector<1x1xf32>,
    return
  }
  func.func @transform_0(%arg0: i32) -> (i32, i32, i32) {
    %c0_i32 = arith.constant 0 : i32
    %c0_i32_0 = arith.constant 0 : i32
    %c0_i32_1 = arith.constant 0 : i32
    %c0_i32_2 = arith.constant 0 : i32
    return %c0_i32, %c0_i32_0, %c0_i32_1 : i32, i32, i32
  }
  func.func @transform_1(%arg0: i32) -> (i32, i32, i32) {
    %c0_i32 = arith.constant 0 : i32
    %c0_i32_0 = arith.constant 0 : i32
    %c0_i32_1 = arith.constant 0 : i32
    %c0_i32_2 = arith.constant 0 : i32
    return %c0_i32, %c0_i32_0, %c0_i32_1 : i32, i32, i32
  }
  func.func @transform_2(%arg0: i32) -> (i32, i32) {
    %c0_i32 = arith.constant 0 : i32
    %c0_i32_0 = arith.constant 0 : i32
    %c0_i32_1 = arith.constant 0 : i32
    return %c0_i32, %c0_i32_0 : i32, i32
  }
  func.func @transform_3(%arg0: i32) -> (i32, i32) {
    %c0_i32 = arith.constant 0 : i32
    %c0_i32_0 = arith.constant 0 : i32
    %c0_i32_1 = arith.constant 0 : i32
    return %c0_i32, %c0_i32_0 : i32, i32
  }
  func.func @transform_4(%arg0: i32) -> (i32, i32) {
    %c0_i32 = arith.constant 0 : i32
    %c0_i32_0 = arith.constant 0 : i32
    %c0_i32_1 = arith.constant 0 : i32
    return %c0_i32, %c0_i32_0 : i32, i32
  }
  func.func @transform_5(%arg0: i32) -> (i32, i32) {
    %c0_i32 = arith.constant 0 : i32
    %c0_i32_0 = arith.constant 0 : i32
    %c0_i32_1 = arith.constant 0 : i32
    return %c0_i32, %c0_i32_0 : i32, i32
  }
  func.func @transform_6(%arg0: i32) -> (i32, i32) {
    %c0_i32 = arith.constant 0 : i32
    %c0_i32_0 = arith.constant 0 : i32
    %c0_i32_1 = arith.constant 0 : i32
    return %c0_i32, %c0_i32_0 : i32, i32
  }
  func.func @transform_7(%arg0: i32) -> (i32, i32) {
    %c0_i32 = arith.constant 0 : i32
    %c0_i32_0 = arith.constant 0 : i32
    %c0_i32_1 = arith.constant 0 : i32
    return %c0_i32, %c0_i32_0 : i32, i32
  }
  func.func @transform_8(%arg0: i32) -> (i32, i32) {
    %c0_i32 = arith.constant 0 : i32
    %c0_i32_0 = arith.constant 0 : i32
    %c0_i32_1 = arith.constant 0 : i32
    return %c0_i32, %c0_i32_0 : i32, i32
  }
  func.func @transform_9(%arg0: i32) -> (i32, i32) {
    %c0_i32 = arith.constant 0 : i32
    %c0_i32_0 = arith.constant 0 : i32
    %c0_i32_1 = arith.constant 0 : i32
    return %c0_i32, %c0_i32_0 : i32, i32
  }
  func.func @transform_10(%arg0: i32) -> (i32, i32) {
    %c0_i32 = arith.constant 0 : i32
    %c0_i32_0 = arith.constant 0 : i32
    %c0_i32_1 = arith.constant 0 : i32
    return %c0_i32, %c0_i32_0 : i32, i32
  }
  func.func @transform_11(%arg0: i32) -> (i32, i32) {
    %c0_i32 = arith.constant 0 : i32
    %c0_i32_0 = arith.constant 0 : i32
    %c0_i32_1 = arith.constant 0 : i32
    return %c0_i32, %c0_i32_0 : i32, i32
  }
  func.func @transform_12(%arg0: i32) -> (i32, i32) {
    %c0_i32 = arith.constant 0 : i32
    %c0_i32_0 = arith.constant 0 : i32
    %c0_i32_1 = arith.constant 0 : i32
    return %c0_i32, %c0_i32_0 : i32, i32
  }
  func.func @transform_13(%arg0: i32) -> (i32, i32) {
    %c0_i32 = arith.constant 0 : i32
    %c0_i32_0 = arith.constant 0 : i32
    %c0_i32_1 = arith.constant 0 : i32
    return %c0_i32, %c0_i32_0 : i32, i32
  }
  func.func @transform_14(%arg0: i32) -> (i32, i32) {
    %c0_i32 = arith.constant 0 : i32
    %c0_i32_0 = arith.constant 0 : i32
    %c0_i32_1 = arith.constant 0 : i32
    return %c0_i32, %c0_i32_0 : i32, i32
  }
  func.func @transform_15(%arg0: i32) -> (i32, i32) {
    %c0_i32 = arith.constant 0 : i32
    %c0_i32_0 = arith.constant 0 : i32
    %c0_i32_1 = arith.constant 0 : i32
    return %c0_i32, %c0_i32_0 : i32, i32
  }
  func.func @transform_16(%arg0: i32) -> (i32, i32) {
    %c0_i32 = arith.constant 0 : i32
    %c0_i32_0 = arith.constant 0 : i32
    %c0_i32_1 = arith.constant 0 : i32
    return %c0_i32, %c0_i32_0 : i32, i32
  }
  func.func @transform_17(%arg0: i32) -> (i32, i32) {
    %c0_i32 = arith.constant 0 : i32
    %c0_i32_0 = arith.constant 0 : i32
    %c0_i32_1 = arith.constant 0 : i32
    return %c0_i32, %c0_i32_0 : i32, i32
  }
  func.func @transform_18(%arg0: i32) -> (i32, i32) {
    %c0_i32 = arith.constant 0 : i32
    %c0_i32_0 = arith.constant 0 : i32
    %c0_i32_1 = arith.constant 0 : i32
    return %c0_i32, %c0_i32_0 : i32, i32
  }
}

</mosaic_0001>

<bundles_post_ra>
// kernel: tpu_custom_call.1
= control target key start
LH: loop header
LB: loop body
LE: loop exit
PB: predicated region body
PF: predicated region fallthrough
CT: control target
= control target key end

     0   :  { %s4140_s0 = inlined_call_operand.vmem [shape: f32[8,2,128], index: 0, kind: input, shape index: {}]   ;;  %s4141_s1 = inlined_call_operand.vmem [shape: f32[8,2,128], index: 1, kind: input, shape index: {}]   ;;  %s4142_s2 = inlined_call_operand.vmem [shape: f32[2,8], index: 2, kind: input, shape index: {}]   ;;  %s4143_s3 = inlined_call_operand.vmem [shape: f32[32,128], index: 3, kind: input, shape index: {}]   ;;  %s4144_s4 = inlined_call_operand.vmem [shape: f32[32,128], index: 4, kind: input, shape index: {}]   ;;  %s4145_s5 = inlined_call_operand.vmem [shape: f32[64,5], index: 5, kind: input, shape index: {}]   ;;  %s4146_s6 = inlined_call_operand.vmem [shape: f32[1,5], index: 6, kind: input, shape index: {}]   ;;  %s4147_s7 = inlined_call_operand.vmem [shape: f32[64,64], index: 7, kind: input, shape index: {}]   ;;  %s4148_s8 = inlined_call_operand.vmem [shape: f32[1,64], index: 8, kind: input, shape index: {}]   ;;  %s4149_s9 = inlined_call_operand.vmem [shape: f32[64,3], index: 9, kind: input, shape index: {}]   ;;  %s4150_s10 = inlined_call_operand.vmem [shape: f32[1,3], index: 10, kind: input, shape index: {}]   ;;  %s4151_s11 = inlined_call_operand.vmem [shape: s32[16,1], index: 11, kind: input, shape index: {}]   ;;  %s4152_s12 = inlined_call_operand.vmem [shape: f32[16,1], index: 12, kind: input, shape index: {}]   ;;  %s4153_s13 = inlined_call_operand.vmem [shape: f32[1,5], index: 13, kind: input, shape index: {}]   ;;  %s4154_s14 = inlined_call_operand.vmem [shape: s32[2,1], index: 14, kind: input, shape index: {}]   ;;  %s4155_s15 = inlined_call_operand.vmem [shape: f32[1,3], index: 15, kind: input, shape index: {}]   ;;  %s4156_s16 = inlined_call_operand.vmem [shape: f32[16,5], index: 16, kind: output, shape index: {0}]   ;;  %s4157_s17 = inlined_call_operand.hbm [shape: f32[2,3], index: 17, kind: output, shape index: {1}]   ;;  %s4158_s18 = inlined_call_operand.hbm [shape: f32[1,1], index: 18, kind: output, shape index: {2}]  }
   0x1   :  { %4162 = sst [smem:[#allocation9_spill]] %s4140_s0 }
   0x2   :  { %4163 = sst [smem:[#allocation10_spill]] %s4141_s1 }
   0x3   :  { %4164 = sst [smem:[#allocation11_spill]] %s4142_s2 }
   0x4   :  { %24 = vsyncpa [#allocation4], 0  ;;  %v3256_v0 = vld [vmem:[%s4143_s3 + $0x18] sm:$0xff]  ;;  %v3144_v1 = vmov 0.0   ;;  %v3262_v2 = vld [vmem:[%s4143_s3 + $0x10] sm:$0xff]  ;;  %vm3145_vm0 = vmmov 0  }
   0x5   :  { %2670 = vmatprep.subr.mxu1 %v3144_v1  ;;  %2678 = vmatprep.mubr.msk.f32.mxu1 %vm3145_vm0, %v3144_v1  ;;  %v3272_v3 = vld [vmem:[%s4143_s3 + $0x8] sm:$0xff] }
   0x6   :  { %2671 = vmatpush3.msra.mxu1 %v3256_v0  ;;  %2692 = vmatprep.subr.mxu0 %v3144_v1 }
   0x7   :  { %2672 = vmatprep.subr.mxu1 %v3144_v1  ;;  %2693 = vmatpush3.msra.mxu0 %v3256_v0 }
   0x8   :  { %25 = vsyncpa [#allocation6], 0  ;;  %2673 = vmatpush3.msra.mxu1 %v3262_v2  ;;  %2694 = vmatprep.subr.mxu0 %v3144_v1  ;;  %v3281_v4 = vld [vmem:[%s4143_s3] sm:$0xff]  ;;  %v3290_v5 = vld [vmem:[%s4144_s4 + $0x18] sm:$0xff]  ;;  %v3146_v9 = vmov 0   ;;  %s4165_s30 = sld [smem:[#allocation9_spill]] }
   0x9   :  { %2674 = vmatprep.subr.mxu1 %v3144_v1  ;;  %2695 = vmatpush3.msra.mxu0 %v3262_v2  ;;  %v3300_v6 = vld [vmem:[%s4144_s4 + $0x10] sm:$0xff]  ;;  %v3309_v7 = vld [vmem:[%s4144_s4 + $0x8] sm:$0xff]  ;;  %v3319_v8 = vld [vmem:[%s4144_s4] sm:$0xff]  ;;  %s4166_s1 = sld [smem:[#allocation10_spill]]  ;;  %s3147_s20 = smov 64   ;;  %v3148_v22 = vmov 7  }
   0xa   :  { %2675 = vmatpush3.msra.mxu1 %v3272_v3  ;;  %2696 = vmatprep.subr.mxu0 %v3144_v1  ;;  %s4167_s2 = sld [smem:[#allocation11_spill]]  ;;  %s3149_s23 = smov 32   ;;  %vm68_vm1 = vcmask 261120   ;;  %vm298_vm2 = vcmask 254976   ;;  %vm2053_vm3 = vcmask 523264   ;;  %vm305_vm4 = vcmask 517376  }
   0xb   :  { %2676 = vmatprep.subr.mxu1 %v3144_v1  ;;  %2697 = vmatpush3.msra.mxu0 %v3272_v3  ;;  %vm2135_vm5 = vcmask 39936   ;;  %vm2324_vm6 = vcmask 17408  }
   0xc   :  { %2677 = vmatpush3.msra.mxu1 %v3281_v4  ;;  %2698 = vmatprep.subr.mxu0 %v3144_v1 }
   0xd   :  { %2679 = vmatmul.mubr.f32.vlgmr.msra.gmra.mxu1 %v3144_v1  ;;  %2681 = vmatprep.subr.mxu1 %v3144_v1 }
   0xe   :  { %2682 = vmatpush3.msra.mxu1 %v3290_v5  ;;  %2689 = vmatprep.mubr.msk.f32.mxu1 %vm3145_vm0, %v3144_v1  ;;  %v67_v10 = vld [vmem:[%s4165_s30] sm:$0x3]  ;;  %v2509_v59 = vld [vmem:[%s4165_s30 + $0x2] sm:$0x3] }
   0xf   :  { %2683 = vmatprep.subr.mxu1 %v3144_v1  ;;  %2699 = vmatpush3.msra.mxu0 %v3281_v4  ;;  %v2506_v14 = vld [vmem:[%s4166_s1 + $0xe] sm:$0x3]  ;;  %v2511_v63 = vld [vmem:[%s4166_s1 + $0xc] sm:$0x3] }
  0x10   :  { %2684 = vmatpush3.msra.mxu1 %v3300_v6  ;;  %2700 = vmatprep.mubr.msk.f32.mxu0 %vm3145_vm0, %v3144_v1  ;;  %v66_v20 = vld [vmem:[%s4167_s2] sm:$0x3] }
  0x11   :  { %2685 = vmatprep.subr.mxu1 %v3144_v1  ;;  %2714 = vmatprep.subr.mxu0 %v3144_v1  ;;  %v270_v21 = vsub.f32 1.0, %v66_v20 }
  0x12   :  { %2686 = vmatpush3.msra.mxu1 %v3309_v7  ;;  %2917 = vset.pattern.permute.xlu0 %v3146_v9 }
  0x13   :  { %2687 = vmatprep.subr.mxu1 %v3144_v1  ;;  %2918 = vset.pattern.permute.xlu1 %v3146_v9 }
  0x14   :  { %2688 = vmatpush3.msra.mxu1 %v3319_v8 }
  0x15   :  { %2690 = vmatmul.mubr.f32.vlgmr.msra.gmra.mxu1 %v3144_v1  ;;  %2703 = vmatprep.subr.mxu1 %v3144_v1 }
  0x16   :  { %2704 = vmatpush3.msra.mxu1 %v3290_v5  ;;  %2711 = vmatprep.mubr.msk.f32.mxu1 %vm3145_vm0, %v3144_v1 }
  0x17   :  { %2705 = vmatprep.subr.mxu1 %v3144_v1 }
  0x18   :  { %2706 = vmatpush3.msra.mxu1 %v3300_v6 }
  0x19   :  { %2707 = vmatprep.subr.mxu1 %v3144_v1 }
  0x1a   :  { %2708 = vmatpush3.msra.mxu1 %v3309_v7 }
  0x1b   :  { %2709 = vmatprep.subr.mxu1 %v3144_v1 }
  0x1c   :  { %2710 = vmatpush3.msra.mxu1 %v3319_v8 }
  0x1d   :  { %2725 = vmatprep.subr.mxu1 %v3144_v1 }
  0xcd   :  { %v138_v11 = vpop.f32.mrf.mxu1 }
  0xce   :  { %v142_v12 = vadd.f32 %v138_v11, %v67_v10  ;;  %v3150_v10 = vmov 1  }
  0xcf   :  { %v2680_v13 = vpop.f32.mrf.mxu1 }
  0xd0   :  { %2946 = vtanh.f32 %v142_v12  ;;  %v2507_v23 = vmul.f32 -1.442695, %v142_v12 }
  0xd5   :  { %v211_v15 = vpop.f32.mrf.mxu1 }
  0xd6   :  { %v215_v16 = vadd.f32 %v2506_v14, %v211_v15 }
  0xd7   :  { %v2691_v17 = vpop.f32.mrf.mxu1 }
  0xd8   :  { %2948 = vtanh.f32 %v215_v16  ;;  %v2508_v24 = vmul.f32 -1.442695, %v215_v16 }
  0xd9   :  { %2950 = vpow2.f32 %v2507_v23 }
  0xda   :  { %2952 = vpow2.f32 %v2508_v24 }
  0xdd   :  { %v2947_v18 = vpop.eup %2946 }
  0xde   :  { %225 = vrot.lane.b32.xlu0 %v2947_v18, %s3147_s20 }
  0xe5   :  { %v2949_v19 = vpop.eup %2948 }
  0xe6   :  { %249 = vrot.lane.b32.xlu0 %v2949_v19, %s3147_s20  ;;  %v2951_v25 = vpop.eup %2950 }
  0xe7   :  { %v219_v26 = vadd.f32 1.0, %v2951_v25  ;;  %v2953_v27 = vpop.eup %2952 }
  0xe8   :  { %v243_v28 = vadd.f32 1.0, %v2953_v27 }
  0xe9   :  { %2954 = vrcp.f32 %v219_v26  ;;  %v307_v26 = vld [vmem:[%s4167_s2] sm:$0x3] }
  0xea   :  { %266 = vperm.xlu0 %2917, %v66_v20   ;;  %2956 = vrcp.f32 %v243_v28 }
  0xee   :  { %2920 = vset.pattern.permute.xlu0 %v3148_v22 }
  0xef   :  { %286 = vperm.xlu0 %2920, %v270_v21  }
  0xf3   :  { %2921 = vset.pattern.permute.xlu0 %v3150_v10 }
  0xf6   :  { %v2955_v29 = vpop.eup %2954 }
  0xf7   :  { %v2957_v32 = vpop.eup %2956  ;;  %v223_v35 = vmul.f32 0.0, %v2955_v29 }
  0xf8   :  { %v247_v38 = vmul.f32 0.0, %v2957_v32 }
 0x150   :  { %v226_v30 = vpop.permute.xlu0 %225 }
 0x151   :  { %v228_v31 = vmul.f32 %v2955_v29, %v226_v30 }
 0x153   :  { %230 = vrot.lane.b32.xlu1 %v228_v31, %s3149_s23  ;;  %v3151_v31 = vmov 6  }
 0x158   :  { %v250_v33 = vpop.permute.xlu0 %249 }
 0x159   :  { %v252_v34 = vmul.f32 %v2957_v32, %v250_v33 }
 0x15b   :  { %254 = vrot.lane.b32.xlu1 %v252_v34, %s3149_s23 }
 0x15f   :  { %273 = vperm.xlu1 %2918, %v270_v21  }
 0x163   :  { %2919 = vset.pattern.permute.xlu1 %v3148_v22 }
 0x164   :  { %281 = vperm.xlu1 %2919, %v66_v20  }
 0x165   :  { %v3364_v47 = vpop.permute.xlu0 %266 }
 0x168   :  { %2922 = vset.pattern.permute.xlu1 %v3150_v10 }
 0x16a   :  { %v287_v51 = vpop.permute.xlu0 %286 }
 0x16b   :  { %v3374_v54 = vmul.f32 0.0, %v287_v51 }
 0x1c5   :  { %v231_v36 = vpop.permute.xlu1 %230 }
 0x1c6   :  { %v3354_v37 = vadd.f32 %v231_v36, %v223_v35 }
 0x1c8   :  { %2958 = vtanh.f32 %v3354_v37 }
 0x1cd   :  { %v255_v39 = vpop.permute.xlu1 %254 }
 0x1ce   :  { %v3357_v40 = vadd.f32 %v255_v39, %v247_v38 }
 0x1d0   :  { %2960 = vtanh.f32 %v3357_v40 }
 0x1d5   :  { %v2959_v41 = vpop.eup %2958 }
 0x1d6   :  { %236 = vrot.lane.b32.xlu1 %v2959_v41, %s3147_s20 }
 0x1da   :  { %v274_v43 = vpop.permute.xlu1 %273 }
 0x1db   :  { %v3366_v48 = vmul.f32 0.0, %v274_v43 }
 0x1dd   :  { %v2961_v42 = vpop.eup %2960 }
 0x1de   :  { %260 = vrot.lane.b32.xlu1 %v2961_v42, %s3147_s20 }
 0x1df   :  { %v3362_v44 = vpop.permute.xlu1 %281 }
 0x1e0   :  { %v291_v36 = vmul.f32 %v3362_v44, %v3357_v40 }
 0x1e2   :  { %v3433_v39 = vadd.f32 %v291_v36, %v3374_v54 }
 0x248   :  { %v237_v45 = vpop.permute.xlu1 %236 }
 0x249   :  { %v239_v46 = vmul.f32 %v2955_v29, %v237_v45  ;;  %v518_v29 = vsub.f32 1.0, %v307_v26 }
 0x24b   :  { %v269_v49 = vmul.f32 %v3364_v47, %v239_v46 }
 0x24d   :  { %v3370_v50 = vadd.f32 %v3366_v48, %v269_v49 }
 0x24f   :  { %311 = vrot.lane.b32.xlu0 %v3370_v50, %s3149_s23 }
 0x250   :  { %v261_v52 = vpop.permute.xlu1 %260 }
 0x251   :  { %v263_v53 = vmul.f32 %v2957_v32, %v261_v52  ;;  %v278_v32 = vmul.f32 %v3364_v47, %v3354_v37 }
 0x253   :  { %v284_v55 = vmul.f32 %v3362_v44, %v263_v53  ;;  %v3424_v33 = vadd.f32 %v278_v32, %v3366_v48 }
 0x255   :  { %v3378_v56 = vadd.f32 %v3374_v54, %v284_v55 }
 0x257   :  { %389 = vrot.lane.b32.xlu1 %v3378_v56, %s3149_s23 }
 0x2c1   :  { %v312_v57 = vpop.permute.xlu0 %311 }
 0x2c2   :  { %2701 = vmatmul.mubr.msk.f32.vlgmr.msra.gmra.mxu0 %vm68_vm1, %v312_v57 }
 0x2c3   :  { %2715 = vmatpush3.msra.mxu0 %v3256_v0  ;;  %2722 = vmatprep.mubr.msk.f32.mxu0 %vm3145_vm0, %v3144_v1 }
 0x2c4   :  { %2716 = vmatprep.subr.mxu0 %v3144_v1 }
 0x2c5   :  { %2717 = vmatpush3.msra.mxu0 %v3262_v2 }
 0x2c6   :  { %2718 = vmatprep.subr.mxu0 %v3144_v1 }
 0x2c7   :  { %2719 = vmatpush3.msra.mxu0 %v3272_v3 }
 0x2c8   :  { %2720 = vmatprep.subr.mxu0 %v3144_v1 }
 0x2c9   :  { %v390_v58 = vpop.permute.xlu1 %389  ;;  %2721 = vmatpush3.msra.mxu0 %v3281_v4 }
 0x2ca   :  { %2712 = vmatmul.mubr.msk.f32.vlgmr.msra.gmra.mxu1 %vm68_vm1, %v390_v58  ;;  %2736 = vmatprep.subr.mxu0 %v3144_v1 }
 0x2cb   :  { %2726 = vmatpush3.msra.mxu1 %v3290_v5  ;;  %2733 = vmatprep.mubr.msk.f32.mxu1 %vm3145_vm0, %v3144_v1 }
 0x2cc   :  { %2727 = vmatprep.subr.mxu1 %v3144_v1 }
 0x2cd   :  { %2728 = vmatpush3.msra.mxu1 %v3300_v6 }
 0x2ce   :  { %2729 = vmatprep.subr.mxu1 %v3144_v1 }
 0x2cf   :  { %2730 = vmatpush3.msra.mxu1 %v3309_v7 }
 0x2d0   :  { %2731 = vmatprep.subr.mxu1 %v3144_v1 }
 0x2d1   :  { %2732 = vmatpush3.msra.mxu1 %v3319_v8 }
 0x2d2   :  { %2747 = vmatprep.subr.mxu1 %v3144_v1 }
 0x382   :  { %v381_v60 = vpop.f32.mrf.mxu0 }
 0x383   :  { %v385_v61 = vadd.f32 %v2509_v59, %v381_v60 }
 0x384   :  { %v2702_v62 = vpop.f32.mrf.mxu0 }
 0x385   :  { %2962 = vtanh.f32 %v385_v61  ;;  %v2513_v16 = vmul.f32 -1.442695, %v385_v61 }
 0x38a   :  { %v459_v11 = vpop.f32.mrf.mxu1 }
 0x38b   :  { %v463_v12 = vadd.f32 %v2511_v63, %v459_v11  ;;  %v2515_v11 = vld [vmem:[%s4165_s30 + $0x4] sm:$0x3] }
 0x38c   :  { %v2713_v13 = vpop.f32.mrf.mxu1 }
 0x38d   :  { %2964 = vtanh.f32 %v463_v12  ;;  %v2514_v17 = vmul.f32 -1.442695, %v463_v12 }
 0x38e   :  { %2966 = vpow2.f32 %v2513_v16  ;;  %v3152_v16 = vmov 2  }
 0x38f   :  { %2968 = vpow2.f32 %v2514_v17 }
 0x392   :  { %v2963_v14 = vpop.eup %2962 }
 0x393   :  { %473 = vrot.lane.b32.xlu0 %v2963_v14, %s3147_s20 }
 0x39a   :  { %v2965_v15 = vpop.eup %2964 }
 0x39b   :  { %497 = vrot.lane.b32.xlu1 %v2965_v15, %s3147_s20  ;;  %v2967_v18 = vpop.eup %2966  ;;  %v2517_v15 = vld [vmem:[%s4166_s1 + $0xa] sm:$0x3] }
 0x39c   :  { %v467_v19 = vadd.f32 1.0, %v2967_v18  ;;  %v2969_v20 = vpop.eup %2968 }
 0x39d   :  { %v491_v21 = vadd.f32 1.0, %v2969_v20 }
 0x39e   :  { %2970 = vrcp.f32 %v467_v19 }
 0x39f   :  { %2972 = vrcp.f32 %v491_v21 }
 0x3ab   :  { %v2971_v23 = vpop.eup %2970 }
 0x3ac   :  { %v2973_v27 = vpop.eup %2972  ;;  %v471_v34 = vmul.f32 %v2971_v23, %v3424_v33 }
 0x3ad   :  { %v495_v41 = vmul.f32 %v2973_v27, %v3433_v39 }
 0x405   :  { %v474_v24 = vpop.permute.xlu0 %473 }
 0x406   :  { %v476_v25 = vmul.f32 %v2971_v23, %v474_v24 }
 0x408   :  { %478 = vrot.lane.b32.xlu0 %v476_v25, %s3149_s23 }
 0x40c   :  { %514 = vperm.xlu0 %2921, %v307_v26  }
 0x40d   :  { %v498_v28 = vpop.permute.xlu1 %497 }
 0x40e   :  { %v500_v30 = vmul.f32 %v2973_v27, %v498_v28 }
 0x410   :  { %2924 = vset.pattern.permute.xlu0 %v3151_v31  ;;  %502 = vrot.lane.b32.xlu1 %v500_v30, %s3149_s23 }
 0x411   :  { %535 = vperm.xlu0 %2924, %v518_v29  }
 0x414   :  { %521 = vperm.xlu1 %2922, %v518_v29  }
 0x415   :  { %2925 = vset.pattern.permute.xlu0 %v3152_v16 }
 0x418   :  { %2923 = vset.pattern.permute.xlu1 %v3151_v31 }
 0x419   :  { %530 = vperm.xlu1 %2923, %v307_v26  }
 0x41d   :  { %2926 = vset.pattern.permute.xlu1 %v3152_v16 }
 0x47a   :  { %v479_v35 = vpop.permute.xlu0 %478 }
 0x47b   :  { %v3429_v38 = vadd.f32 %v479_v35, %v471_v34  ;;  %v555_v34 = vld [vmem:[%s4167_s2] sm:$0x3] }
 0x47d   :  { %2974 = vtanh.f32 %v3429_v38 }
 0x482   :  { %v503_v42 = vpop.permute.xlu1 %502 }
 0x483   :  { %v3436_v37 = vadd.f32 %v503_v42, %v495_v41  ;;  %v766_v41 = vsub.f32 1.0, %v555_v34 }
 0x485   :  { %2976 = vtanh.f32 %v3436_v37 }
 0x487   :  { %v3445_v51 = vpop.permute.xlu0 %514 }
 0x48a   :  { %v2975_v43 = vpop.eup %2974 }
 0x48b   :  { %484 = vrot.lane.b32.xlu1 %v2975_v43, %s3147_s20  ;;  %v3153_v43 = vmov 5  }
 0x48c   :  { %v3454_v55 = vpop.permute.xlu0 %535 }
 0x48d   :  { %v538_v59 = vmul.f32 %v3454_v55, %v3378_v56 }
 0x48f   :  { %v3441_v40 = vpop.permute.xlu1 %521 }
 0x490   :  { %v524_v52 = vmul.f32 %v3441_v40, %v3370_v50 }
 0x492   :  { %v2977_v45 = vpop.eup %2976 }
 0x493   :  { %508 = vrot.lane.b32.xlu1 %v2977_v45, %s3147_s20  ;;  %v527_v45 = vmul.f32 %v3441_v40, %v3424_v33 }
 0x494   :  { %v3443_v46 = vpop.permute.xlu1 %530 }
 0x4fd   :  { %v485_v48 = vpop.permute.xlu1 %484 }
 0x4fe   :  { %v487_v49 = vmul.f32 %v2971_v23, %v485_v48  ;;  %v526_v48 = vmul.f32 %v3445_v51, %v3429_v38 }
 0x500   :  { %v517_v53 = vmul.f32 %v3445_v51, %v487_v49  ;;  %v3506_v49 = vadd.f32 %v527_v45, %v526_v48 }
 0x502   :  { %v3450_v54 = vadd.f32 %v524_v52, %v517_v53 }
 0x504   :  { %559 = vrot.lane.b32.xlu0 %v3450_v54, %s3149_s23 }
 0x505   :  { %v509_v57 = vpop.permute.xlu1 %508 }
 0x506   :  { %v511_v58 = vmul.f32 %v2973_v27, %v509_v57  ;;  %v540_v57 = vmul.f32 %v3443_v46, %v3436_v37 }
 0x508   :  { %v533_v60 = vmul.f32 %v3443_v46, %v511_v58 }
 0x50a   :  { %v3459_v61 = vadd.f32 %v538_v59, %v533_v60  ;;  %v541_v59 = vmul.f32 %v3454_v55, %v3433_v39 }
 0x50c   :  { %637 = vrot.lane.b32.xlu1 %v3459_v61, %s3149_s23  ;;  %v3516_v60 = vadd.f32 %v541_v59, %v540_v57 }
 0x576   :  { %v560_v62 = vpop.permute.xlu0 %559 }
 0x577   :  { %2723 = vmatmul.mubr.msk.f32.vlgmr.msra.gmra.mxu0 %vm68_vm1, %v560_v62 }
 0x578   :  { %2737 = vmatpush3.msra.mxu0 %v3256_v0  ;;  %2744 = vmatprep.mubr.msk.f32.mxu0 %vm3145_vm0, %v3144_v1 }
 0x579   :  { %2738 = vmatprep.subr.mxu0 %v3144_v1 }
 0x57a   :  { %2739 = vmatpush3.msra.mxu0 %v3262_v2 }
 0x57b   :  { %2740 = vmatprep.subr.mxu0 %v3144_v1 }
 0x57c   :  { %2741 = vmatpush3.msra.mxu0 %v3272_v3 }
 0x57d   :  { %2742 = vmatprep.subr.mxu0 %v3144_v1 }
 0x57e   :  { %v638_v63 = vpop.permute.xlu1 %637  ;;  %2743 = vmatpush3.msra.mxu0 %v3281_v4 }
 0x57f   :  { %2734 = vmatmul.mubr.msk.f32.vlgmr.msra.gmra.mxu1 %vm68_vm1, %v638_v63  ;;  %2758 = vmatprep.subr.mxu0 %v3144_v1 }
 0x580   :  { %2748 = vmatpush3.msra.mxu1 %v3290_v5  ;;  %2755 = vmatprep.mubr.msk.f32.mxu1 %vm3145_vm0, %v3144_v1 }
 0x581   :  { %2749 = vmatprep.subr.mxu1 %v3144_v1 }
 0x582   :  { %2750 = vmatpush3.msra.mxu1 %v3300_v6 }
 0x583   :  { %2751 = vmatprep.subr.mxu1 %v3144_v1 }
 0x584   :  { %2752 = vmatpush3.msra.mxu1 %v3309_v7 }
 0x585   :  { %2753 = vmatprep.subr.mxu1 %v3144_v1 }
 0x586   :  { %2754 = vmatpush3.msra.mxu1 %v3319_v8 }
 0x587   :  { %2769 = vmatprep.subr.mxu1 %v3144_v1 }
 0x637   :  { %v629_v12 = vpop.f32.mrf.mxu0 }
 0x638   :  { %v633_v13 = vadd.f32 %v2515_v11, %v629_v12 }
 0x639   :  { %v2724_v14 = vpop.f32.mrf.mxu0 }
 0x63a   :  { %2978 = vtanh.f32 %v633_v13  ;;  %v2519_v23 = vmul.f32 -1.442695, %v633_v13 }
 0x63f   :  { %v707_v17 = vpop.f32.mrf.mxu1 }
 0x640   :  { %v711_v18 = vadd.f32 %v2517_v15, %v707_v17 }
 0x641   :  { %v2735_v19 = vpop.f32.mrf.mxu1 }
 0x642   :  { %2980 = vtanh.f32 %v711_v18  ;;  %v2520_v24 = vmul.f32 -1.442695, %v711_v18 }
 0x643   :  { %2982 = vpow2.f32 %v2519_v23 }
 0x644   :  { %2984 = vpow2.f32 %v2520_v24 }
 0x647   :  { %v2979_v20 = vpop.eup %2978 }
 0x648   :  { %721 = vrot.lane.b32.xlu0 %v2979_v20, %s3147_s20 }
 0x64f   :  { %v2981_v21 = vpop.eup %2980 }
 0x650   :  { %745 = vrot.lane.b32.xlu1 %v2981_v21, %s3147_s20  ;;  %v2983_v25 = vpop.eup %2982 }
 0x651   :  { %v715_v26 = vadd.f32 1.0, %v2983_v25  ;;  %v2985_v27 = vpop.eup %2984 }
 0x652   :  { %v739_v28 = vadd.f32 1.0, %v2985_v27 }
 0x653   :  { %2986 = vrcp.f32 %v715_v26  ;;  %v2521_v26 = vld [vmem:[%s4165_s30 + $0x6] sm:$0x3] }
 0x654   :  { %2988 = vrcp.f32 %v739_v28 }
 0x660   :  { %v2987_v29 = vpop.eup %2986 }
 0x661   :  { %v2989_v35 = vpop.eup %2988  ;;  %v719_v52 = vmul.f32 %v2987_v29, %v3506_v49 }
 0x662   :  { %v743_v33 = vmul.f32 %v2989_v35, %v3516_v60 }
 0x6ba   :  { %v722_v30 = vpop.permute.xlu0 %721 }
 0x6bb   :  { %v724_v32 = vmul.f32 %v2987_v29, %v722_v30  ;;  %v2523_v30 = vld [vmem:[%s4166_s1 + $0x8] sm:$0x3] }
 0x6bd   :  { %726 = vrot.lane.b32.xlu0 %v724_v32, %s3149_s23  ;;  %v3154_v32 = vmov 3  }
 0x6c1   :  { %762 = vperm.xlu0 %2925, %v555_v34  }
 0x6c2   :  { %v746_v36 = vpop.permute.xlu1 %745 }
 0x6c3   :  { %v748_v42 = vmul.f32 %v2989_v35, %v746_v36 }
 0x6c5   :  { %2928 = vset.pattern.permute.xlu0 %v3153_v43  ;;  %750 = vrot.lane.b32.xlu1 %v748_v42, %s3149_s23 }
 0x6c6   :  { %783 = vperm.xlu0 %2928, %v766_v41  }
 0x6c9   :  { %769 = vperm.xlu1 %2926, %v766_v41  }
 0x6ca   :  { %2929 = vset.pattern.permute.xlu0 %v3154_v32 }
 0x6cd   :  { %2927 = vset.pattern.permute.xlu1 %v3153_v43 }
 0x6ce   :  { %778 = vperm.xlu1 %2927, %v555_v34  }
 0x6d2   :  { %2930 = vset.pattern.permute.xlu1 %v3154_v32 }
 0x72f   :  { %v727_v53 = vpop.permute.xlu0 %726 }
 0x730   :  { %v3511_v58 = vadd.f32 %v727_v53, %v719_v52 }
 0x732   :  { %2990 = vtanh.f32 %v3511_v58 }
 0x737   :  { %v751_v38 = vpop.permute.xlu1 %750 }
 0x738   :  { %v3519_v40 = vadd.f32 %v751_v38, %v743_v33 }
 0x73a   :  { %2992 = vtanh.f32 %v3519_v40 }
 0x73c   :  { %v3528_v12 = vpop.permute.xlu0 %762 }
 0x73f   :  { %v2991_v62 = vpop.eup %2990 }
 0x740   :  { %732 = vrot.lane.b32.xlu1 %v2991_v62, %s3147_s20 }
 0x741   :  { %v3537_v17 = vpop.permute.xlu0 %783 }
 0x742   :  { %v786_v20 = vmul.f32 %v3537_v17, %v3459_v61 }
 0x744   :  { %v3524_v63 = vpop.permute.xlu1 %769 }
 0x745   :  { %v772_v13 = vmul.f32 %v3524_v63, %v3450_v54 }
 0x747   :  { %v2993_v37 = vpop.eup %2992 }
 0x748   :  { %756 = vrot.lane.b32.xlu1 %v2993_v37, %s3147_s20  ;;  %v803_v37 = vld [vmem:[%s4167_s2] sm:$0x3] }
 0x749   :  { %v3526_v39 = vpop.permute.xlu1 %778 }
 0x7b2   :  { %v733_v55 = vpop.permute.xlu1 %732 }
 0x7b3   :  { %v735_v11 = vmul.f32 %v2987_v29, %v733_v55 }
 0x7b5   :  { %v765_v14 = vmul.f32 %v3528_v12, %v735_v11 }
 0x7b7   :  { %v3533_v15 = vadd.f32 %v772_v13, %v765_v14  ;;  %v1014_v13 = vsub.f32 1.0, %v803_v37 }
 0x7b9   :  { %807 = vrot.lane.b32.xlu0 %v3533_v15, %s3149_s23 }
 0x7ba   :  { %v757_v18 = vpop.permute.xlu1 %756 }
 0x7bb   :  { %v759_v19 = vmul.f32 %v2989_v35, %v757_v18  ;;  %v3155_v18 = vmov 4  }
 0x7bd   :  { %v781_v21 = vmul.f32 %v3526_v39, %v759_v19  ;;  %v775_v19 = vmul.f32 %v3524_v63, %v3506_v49 }
 0x7bf   :  { %v3542_v23 = vadd.f32 %v786_v20, %v781_v21  ;;  %v774_v20 = vmul.f32 %v3528_v12, %v3511_v58 }
 0x7c1   :  { %885 = vrot.lane.b32.xlu1 %v3542_v23, %s3149_s23  ;;  %v776_v21 = vadd.f32 %v775_v19, %v774_v20 }
 0x82b   :  { %v808_v24 = vpop.permute.xlu0 %807 }
 0x82c   :  { %2745 = vmatmul.mubr.msk.f32.vlgmr.msra.gmra.mxu0 %vm68_vm1, %v808_v24 }
 0x82d   :  { %2759 = vmatpush3.msra.mxu0 %v3256_v0  ;;  %2766 = vmatprep.mubr.msk.f32.mxu0 %vm3145_vm0, %v3144_v1 }
 0x82e   :  { %2760 = vmatprep.subr.mxu0 %v3144_v1 }
 0x82f   :  { %2761 = vmatpush3.msra.mxu0 %v3262_v2 }
 0x830   :  { %2762 = vmatprep.subr.mxu0 %v3144_v1 }
 0x831   :  { %2763 = vmatpush3.msra.mxu0 %v3272_v3 }
 0x832   :  { %2764 = vmatprep.subr.mxu0 %v3144_v1 }
 0x833   :  { %v886_v25 = vpop.permute.xlu1 %885  ;;  %2765 = vmatpush3.msra.mxu0 %v3281_v4 }
 0x834   :  { %2756 = vmatmul.mubr.msk.f32.vlgmr.msra.gmra.mxu1 %vm68_vm1, %v886_v25  ;;  %2780 = vmatprep.subr.mxu0 %v3144_v1 }
 0x835   :  { %2770 = vmatpush3.msra.mxu1 %v3290_v5  ;;  %2777 = vmatprep.mubr.msk.f32.mxu1 %vm3145_vm0, %v3144_v1 }
 0x836   :  { %2771 = vmatprep.subr.mxu1 %v3144_v1 }
 0x837   :  { %2772 = vmatpush3.msra.mxu1 %v3300_v6 }
 0x838   :  { %2773 = vmatprep.subr.mxu1 %v3144_v1 }
 0x839   :  { %2774 = vmatpush3.msra.mxu1 %v3309_v7 }
 0x83a   :  { %2775 = vmatprep.subr.mxu1 %v3144_v1 }
 0x83b   :  { %2776 = vmatpush3.msra.mxu1 %v3319_v8 }
 0x83c   :  { %2791 = vmatprep.subr.mxu1 %v3144_v1 }
 0x8ec   :  { %v877_v27 = vpop.f32.mrf.mxu0 }
 0x8ed   :  { %v881_v28 = vadd.f32 %v2521_v26, %v877_v27  ;;  %v788_v26 = vmul.f32 %v3526_v39, %v3519_v40 }
 0x8ee   :  { %v2746_v29 = vpop.f32.mrf.mxu0 }
 0x8ef   :  { %2994 = vtanh.f32 %v881_v28  ;;  %v2525_v45 = vmul.f32 -1.442695, %v881_v28  ;;  %v789_v28 = vmul.f32 %v3537_v17, %v3516_v60 }
 0x8f1   :  { %v3591_v29 = vadd.f32 %v789_v28, %v788_v26 }
 0x8f4   :  { %v955_v34 = vpop.f32.mrf.mxu1 }
 0x8f5   :  { %v959_v35 = vadd.f32 %v2523_v30, %v955_v34 }
 0x8f6   :  { %v2757_v36 = vpop.f32.mrf.mxu1 }
 0x8f7   :  { %2996 = vtanh.f32 %v959_v35  ;;  %v2526_v48 = vmul.f32 -1.442695, %v959_v35 }
 0x8f8   :  { %2998 = vpow2.f32 %v2525_v45 }
 0x8f9   :  { %3000 = vpow2.f32 %v2526_v48 }
 0x8fc   :  { %v2995_v41 = vpop.eup %2994 }
 0x8fd   :  { %969 = vrot.lane.b32.xlu0 %v2995_v41, %s3147_s20 }
 0x904   :  { %v2997_v42 = vpop.eup %2996 }
 0x905   :  { %993 = vrot.lane.b32.xlu1 %v2997_v42, %s3147_s20  ;;  %v2999_v52 = vpop.eup %2998 }
 0x906   :  { %v963_v53 = vadd.f32 1.0, %v2999_v52  ;;  %v3001_v57 = vpop.eup %3000 }
 0x907   :  { %v987_v59 = vadd.f32 1.0, %v3001_v57 }
 0x908   :  { %3002 = vrcp.f32 %v963_v53 }
 0x909   :  { %3004 = vrcp.f32 %v987_v59 }
 0x915   :  { %v3003_v33 = vpop.eup %3002 }
 0x916   :  { %v3005_v55 = vpop.eup %3004  ;;  %v967_v24 = vmul.f32 %v3003_v33, %v776_v21 }
 0x917   :  { %v991_v30 = vmul.f32 %v3005_v55, %v3591_v29 }
 0x96f   :  { %v970_v38 = vpop.permute.xlu0 %969 }
 0x970   :  { %v972_v62 = vmul.f32 %v3003_v33, %v970_v38 }
 0x972   :  { %974 = vrot.lane.b32.xlu0 %v972_v62, %s3149_s23 }
 0x976   :  { %1010 = vperm.xlu0 %2929, %v803_v37  }
 0x977   :  { %v994_v11 = vpop.permute.xlu1 %993 }
 0x978   :  { %v996_v14 = vmul.f32 %v3005_v55, %v994_v11 }
 0x97a   :  { %2932 = vset.pattern.permute.xlu0 %v3155_v18  ;;  %998 = vrot.lane.b32.xlu1 %v996_v14, %s3149_s23 }
 0x97b   :  { %1031 = vperm.xlu0 %2932, %v1014_v13  }
 0x97e   :  { %1017 = vperm.xlu1 %2930, %v1014_v13  }
 0x982   :  { %2931 = vset.pattern.permute.xlu1 %v3155_v18 }
 0x983   :  { %1026 = vperm.xlu1 %2931, %v803_v37  }
 0x9e4   :  { %v975_v25 = vpop.permute.xlu0 %974 }
 0x9e5   :  { %v977_v27 = vadd.f32 %v975_v25, %v967_v24 }
 0x9e7   :  { %3006 = vtanh.f32 %v977_v27 }
 0x9ec   :  { %v999_v34 = vpop.permute.xlu1 %998 }
 0x9ed   :  { %v3594_v49 = vadd.f32 %v999_v34, %v991_v30  ;;  %v1051_v34 = vld [vmem:[%s4167_s2] sm:$0x3] }
 0x9ef   :  { %3008 = vtanh.f32 %v3594_v49 }
 0x9f1   :  { %v3598_v63 = vpop.permute.xlu0 %1010 }
 0x9f2   :  { %v1022_v35 = vmul.f32 %v3598_v63, %v977_v27 }
 0x9f4   :  { %v3007_v58 = vpop.eup %3006 }
 0x9f5   :  { %980 = vrot.lane.b32.xlu1 %v3007_v58, %s3147_s20 }
 0x9f6   :  { %v3612_v57 = vpop.permute.xlu0 %1031 }
 0x9f7   :  { %v1034_v62 = vmul.f32 %v3612_v57, %v3542_v23 }
 0x9f9   :  { %v1018_v40 = vpop.permute.xlu1 %1017 }
 0x9fa   :  { %v1023_v36 = vmul.f32 %v1018_v40, %v776_v21  ;;  %v1020_v48 = vmul.f32 %v1018_v40, %v3533_v15 }
 0x9fc   :  { %v3009_v60 = vpop.eup %3008  ;;  %v3601_v17 = vadd.f32 %v1023_v36, %v1022_v35  ;;  %v1262_v36 = vsub.f32 1.0, %v1051_v34 }
 0x9fd   :  { %1004 = vrot.lane.b32.xlu1 %v3009_v60, %s3147_s20 }
 0x9fe   :  { %v3604_v41 = vpop.permute.xlu1 %1026 }
 0xa67   :  { %v981_v42 = vpop.permute.xlu1 %980 }
 0xa68   :  { %v983_v45 = vmul.f32 %v3003_v33, %v981_v42 }
 0xa6a   :  { %v1013_v52 = vmul.f32 %v3598_v63, %v983_v45  ;;  %v1036_v45 = vmul.f32 %v3604_v41, %v3594_v49 }
 0xa6c   :  { %v3608_v53 = vadd.f32 %v1020_v48, %v1013_v52  ;;  %v1037_v52 = vmul.f32 %v3612_v57, %v3591_v29 }
 0xa6e   :  { %1055 = vrot.lane.b32.xlu0 %v3608_v53, %s3149_s23 }
 0xa6f   :  { %v1005_v59 = vpop.permute.xlu1 %1004 }
 0xa70   :  { %v1007_v38 = vmul.f32 %v3005_v55, %v1005_v59  ;;  %v3665_v59 = vadd.f32 %v1037_v52, %v1036_v45 }
 0xa72   :  { %v1029_v37 = vmul.f32 %v3604_v41, %v1007_v38 }
 0xa74   :  { %v3617_v11 = vadd.f32 %v1034_v62, %v1029_v37 }
 0xa76   :  { %1133 = vrot.lane.b32.xlu1 %v3617_v11, %s3149_s23 }
 0xae0   :  { %v1056_v33 = vpop.permute.xlu0 %1055 }
 0xae1   :  { %2767 = vmatmul.mubr.msk.f32.vlgmr.msra.gmra.mxu0 %vm68_vm1, %v1056_v33 }
 0xae2   :  { %2781 = vmatpush3.msra.mxu0 %v3256_v0  ;;  %2788 = vmatprep.mubr.msk.f32.mxu0 %vm3145_vm0, %v3144_v1  ;;  %v2527_v0 = vld [vmem:[%s4165_s30 + $0x8] sm:$0x3] }
 0xae3   :  { %2782 = vmatprep.subr.mxu0 %v3144_v1 }
 0xae4   :  { %2783 = vmatpush3.msra.mxu0 %v3262_v2 }
 0xae5   :  { %2784 = vmatprep.subr.mxu0 %v3144_v1 }
 0xae6   :  { %2785 = vmatpush3.msra.mxu0 %v3272_v3 }
 0xae7   :  { %2786 = vmatprep.subr.mxu0 %v3144_v1 }
 0xae8   :  { %v1134_v55 = vpop.permute.xlu1 %1133  ;;  %2787 = vmatpush3.msra.mxu0 %v3281_v4 }
 0xae9   :  { %2778 = vmatmul.mubr.msk.f32.vlgmr.msra.gmra.mxu1 %vm68_vm1, %v1134_v55  ;;  %2802 = vmatprep.subr.mxu0 %v3144_v1 }
 0xaea   :  { %2792 = vmatpush3.msra.mxu1 %v3290_v5  ;;  %2799 = vmatprep.mubr.msk.f32.mxu1 %vm3145_vm0, %v3144_v1  ;;  %v2529_v5 = vld [vmem:[%s4166_s1 + $0x6] sm:$0x3] }
 0xaeb   :  { %2793 = vmatprep.subr.mxu1 %v3144_v1 }
 0xaec   :  { %2794 = vmatpush3.msra.mxu1 %v3300_v6 }
 0xaed   :  { %2795 = vmatprep.subr.mxu1 %v3144_v1 }
 0xaee   :  { %2796 = vmatpush3.msra.mxu1 %v3309_v7 }
 0xaef   :  { %2797 = vmatprep.subr.mxu1 %v3144_v1 }
 0xaf0   :  { %2798 = vmatpush3.msra.mxu1 %v3319_v8 }
 0xaf1   :  { %2813 = vmatprep.subr.mxu1 %v3144_v1 }
 0xba1   :  { %v1125_v2 = vpop.f32.mrf.mxu0 }
 0xba2   :  { %v1129_v3 = vadd.f32 %v2527_v0, %v1125_v2 }
 0xba3   :  { %v2768_v4 = vpop.f32.mrf.mxu0 }
 0xba4   :  { %3010 = vtanh.f32 %v1129_v3  ;;  %v2531_v19 = vmul.f32 -1.442695, %v1129_v3 }
 0xba9   :  { %v1203_v6 = vpop.f32.mrf.mxu1 }
 0xbaa   :  { %v1207_v7 = vadd.f32 %v2529_v5, %v1203_v6 }
 0xbab   :  { %v2779_v13 = vpop.f32.mrf.mxu1 }
 0xbac   :  { %3012 = vtanh.f32 %v1207_v7  ;;  %v2532_v20 = vmul.f32 -1.442695, %v1207_v7 }
 0xbad   :  { %3014 = vpow2.f32 %v2531_v19 }
 0xbae   :  { %3016 = vpow2.f32 %v2532_v20 }
 0xbb1   :  { %v3011_v14 = vpop.eup %3010 }
 0xbb2   :  { %1217 = vrot.lane.b32.xlu0 %v3011_v14, %s3147_s20 }
 0xbb9   :  { %v3013_v18 = vpop.eup %3012 }
 0xbba   :  { %1241 = vrot.lane.b32.xlu1 %v3013_v18, %s3147_s20  ;;  %v3015_v21 = vpop.eup %3014 }
 0xbbb   :  { %v1211_v24 = vadd.f32 1.0, %v3015_v21  ;;  %v3017_v25 = vpop.eup %3016  ;;  %v3700_v21 = vld [vmem:[%s4143_s3 + $0x18] sm:$0xff] }
 0xbbc   :  { %v1235_v26 = vadd.f32 1.0, %v3017_v25  ;;  %v3716_v25 = vld [vmem:[%s4143_s3 + $0x8] sm:$0xff] }
 0xbbd   :  { %3018 = vrcp.f32 %v1211_v24  ;;  %v3709_v24 = vld [vmem:[%s4143_s3 + $0x10] sm:$0xff] }
 0xbbe   :  { %3020 = vrcp.f32 %v1235_v26 }
 0xbca   :  { %v3019_v27 = vpop.eup %3018 }
 0xbcb   :  { %v3021_v58 = vpop.eup %3020  ;;  %v1215_v60 = vmul.f32 %v3019_v27, %v3601_v17 }
 0xbcc   :  { %v1239_v38 = vmul.f32 %v3021_v58, %v3665_v59 }
 0xc24   :  { %v1218_v28 = vpop.permute.xlu0 %1217 }
 0xc25   :  { %v1220_v30 = vmul.f32 %v3019_v27, %v1218_v28  ;;  %v3731_v28 = vld [vmem:[%s4144_s4 + $0x18] sm:$0xff] }
 0xc27   :  { %1222 = vrot.lane.b32.xlu0 %v1220_v30, %s3149_s23  ;;  %v3740_v30 = vld [vmem:[%s4144_s4 + $0x10] sm:$0xff] }
 0xc2b   :  { %1258 = vperm.xlu0 %2932, %v1051_v34  }
 0xc2c   :  { %v1242_v40 = vpop.permute.xlu1 %1241 }
 0xc2d   :  { %v1244_v35 = vmul.f32 %v3021_v58, %v1242_v40 }
 0xc2f   :  { %2933 = vset.pattern.permute.xlu0 %v3154_v32  ;;  %1246 = vrot.lane.b32.xlu1 %v1244_v35, %s3149_s23 }
 0xc30   :  { %1274 = vperm.xlu0 %2933, %v1051_v34   ;;  %v3747_v34 = vld [vmem:[%s4144_s4 + $0x8] sm:$0xff] }
 0xc33   :  { %1265 = vperm.xlu1 %2931, %v1262_v36  }
 0xc34   :  { %2936 = vset.pattern.permute.xlu0 %v3153_v43 }
 0xc37   :  { %2934 = vset.pattern.permute.xlu1 %v3154_v32 }
 0xc38   :  { %1279 = vperm.xlu1 %2934, %v1262_v36  }
 0xc3c   :  { %2935 = vset.pattern.permute.xlu1 %v3153_v43 }
 0xc99   :  { %v1223_v42 = vpop.permute.xlu0 %1222 }
 0xc9a   :  { %v1225_v48 = vadd.f32 %v1223_v42, %v1215_v60  ;;  %v2535_v60 = vld [vmem:[%s4166_s1 + $0x4] sm:$0x3] }
 0xc9c   :  { %3022 = vtanh.f32 %v1225_v48 }
 0xca1   :  { %v1247_v62 = vpop.permute.xlu1 %1246 }
 0xca2   :  { %v3668_v32 = vadd.f32 %v1247_v62, %v1239_v38 }
 0xca4   :  { %3024 = vtanh.f32 %v3668_v32 }
 0xca6   :  { %v3672_v37 = vpop.permute.xlu0 %1258 }
 0xca7   :  { %v1270_v33 = vmul.f32 %v3672_v37, %v1225_v48 }
 0xca9   :  { %v3023_v43 = vpop.eup %3022 }
 0xcaa   :  { %1228 = vrot.lane.b32.xlu1 %v3023_v43, %s3147_s20 }
 0xcab   :  { %v3683_v6 = vpop.permute.xlu0 %1274 }
 0xcae   :  { %v1266_v49 = vpop.permute.xlu1 %1265 }
 0xcaf   :  { %v1271_v29 = vmul.f32 %v1266_v49, %v3601_v17  ;;  %v1268_v4 = vmul.f32 %v1266_v49, %v3608_v53 }
 0xcb1   :  { %v3025_v57 = vpop.eup %3024  ;;  %v3676_v55 = vadd.f32 %v1271_v29, %v1270_v33 }
 0xcb2   :  { %1252 = vrot.lane.b32.xlu0 %v3025_v57, %s3147_s20 }
 0xcb3   :  { %v3679_v0 = vpop.permute.xlu1 %1279 }
 0xcb4   :  { %v1282_v14 = vmul.f32 %v3679_v0, %v3617_v11 }
 0xd1c   :  { %v1229_v2 = vpop.permute.xlu1 %1228 }
 0xd1d   :  { %v1231_v3 = vmul.f32 %v3019_v27, %v1229_v2  ;;  %v3723_v27 = vld [vmem:[%s4143_s3] sm:$0xff] }
 0xd1f   :  { %v1261_v5 = vmul.f32 %v3672_v37, %v1231_v3 }
 0xd21   :  { %v3685_v7 = vadd.f32 %v1268_v4, %v1261_v5  ;;  %v1299_v4 = vld [vmem:[%s4167_s2] sm:$0x3] }
 0xd23   :  { %1303 = vrot.lane.b32.xlu1 %v3685_v7, %s3149_s23 }
 0xd24   :  { %v1253_v17 = vpop.permute.xlu0 %1252 }
 0xd25   :  { %v1255_v13 = vmul.f32 %v3021_v58, %v1253_v17  ;;  %v2533_v58 = vld [vmem:[%s4165_s30 + $0xa] sm:$0x3] }
 0xd27   :  { %v1277_v18 = vmul.f32 %v3683_v6, %v1255_v13 }
 0xd29   :  { %v3692_v19 = vadd.f32 %v1282_v14, %v1277_v18  ;;  %v1510_v14 = vsub.f32 1.0, %v1299_v4 }
 0xd2b   :  { %1381 = vrot.lane.b32.xlu0 %v3692_v19, %s3149_s23 }
 0xd95   :  { %v1304_v20 = vpop.permute.xlu1 %1303 }
 0xd96   :  { %2789 = vmatmul.mubr.msk.f32.vlgmr.msra.gmra.mxu0 %vm68_vm1, %v1304_v20 }
 0xd97   :  { %2803 = vmatpush3.msra.mxu0 %v3700_v21  ;;  %2810 = vmatprep.mubr.msk.f32.mxu0 %vm3145_vm0, %v3144_v1 }
 0xd98   :  { %2804 = vmatprep.subr.mxu0 %v3144_v1 }
 0xd99   :  { %2805 = vmatpush3.msra.mxu0 %v3709_v24 }
 0xd9a   :  { %2806 = vmatprep.subr.mxu0 %v3144_v1 }
 0xd9b   :  { %2807 = vmatpush3.msra.mxu0 %v3716_v25 }
 0xd9c   :  { %2808 = vmatprep.subr.mxu0 %v3144_v1 }
 0xd9d   :  { %v1382_v26 = vpop.permute.xlu0 %1381  ;;  %2809 = vmatpush3.msra.mxu0 %v3723_v27 }
 0xd9e   :  { %2800 = vmatmul.mubr.msk.f32.vlgmr.msra.gmra.mxu1 %vm68_vm1, %v1382_v26  ;;  %2824 = vmatprep.subr.mxu0 %v3144_v1  ;;  %v1285_v26 = vmul.f32 %v3679_v0, %v3665_v59 }
 0xd9f   :  { %2814 = vmatpush3.msra.mxu1 %v3731_v28  ;;  %2821 = vmatprep.mubr.msk.f32.mxu1 %vm3145_vm0, %v3144_v1 }
 0xda0   :  { %2815 = vmatprep.subr.mxu1 %v3144_v1 }
 0xda1   :  { %2816 = vmatpush3.msra.mxu1 %v3740_v30 }
 0xda2   :  { %2817 = vmatprep.subr.mxu1 %v3144_v1 }
 0xda3   :  { %2818 = vmatpush3.msra.mxu1 %v3747_v34 }
 0xda4   :  { %2819 = vmatprep.subr.mxu1 %v3144_v1 }
 0xda5   :  { %2820 = vmatpush3.msra.mxu1 %v3319_v8 }
 0xda6   :  { %2835 = vmatprep.subr.mxu1 %v3144_v1 }
 0xe56   :  { %v1373_v40 = vpop.f32.mrf.mxu0 }
 0xe57   :  { %v1377_v35 = vadd.f32 %v2533_v58, %v1373_v40 }
 0xe58   :  { %v2790_v36 = vpop.f32.mrf.mxu0 }
 0xe59   :  { %3026 = vtanh.f32 %v1377_v35  ;;  %v2537_v38 = vmul.f32 -1.442695, %v1377_v35 }
 0xe5e   :  { %v1451_v42 = vpop.f32.mrf.mxu1 }
 0xe5f   :  { %v1455_v45 = vadd.f32 %v2535_v60, %v1451_v42 }
 0xe60   :  { %v2801_v48 = vpop.f32.mrf.mxu1 }
 0xe61   :  { %3028 = vtanh.f32 %v1455_v45  ;;  %v2538_v62 = vmul.f32 -1.442695, %v1455_v45 }
 0xe62   :  { %3030 = vpow2.f32 %v2537_v38 }
 0xe63   :  { %3032 = vpow2.f32 %v2538_v62 }
 0xe66   :  { %v3027_v52 = vpop.eup %3026 }
 0xe67   :  { %1465 = vrot.lane.b32.xlu1 %v3027_v52, %s3147_s20 }
 0xe6e   :  { %v3029_v8 = vpop.eup %3028 }
 0xe6f   :  { %1489 = vrot.lane.b32.xlu0 %v3029_v8, %s3147_s20  ;;  %v3031_v43 = vpop.eup %3030 }
 0xe70   :  { %v1459_v49 = vadd.f32 1.0, %v3031_v43  ;;  %v3033_v33 = vpop.eup %3032 }
 0xe71   :  { %v1483_v29 = vadd.f32 1.0, %v3033_v33 }
 0xe72   :  { %3034 = vrcp.f32 %v1459_v49 }
 0xe73   :  { %3036 = vrcp.f32 %v1483_v29 }
 0xe7f   :  { %v3035_v57 = vpop.eup %3034 }
 0xe80   :  { %v3037_v5 = vpop.eup %3036  ;;  %v1463_v18 = vmul.f32 %v3035_v57, %v3676_v55 }
 0xed9   :  { %v1466_v2 = vpop.permute.xlu1 %1465 }
 0xeda   :  { %v1468_v3 = vmul.f32 %v3035_v57, %v1466_v2 }
 0xedc   :  { %1470 = vrot.lane.b32.xlu1 %v1468_v3, %s3149_s23 }
 0xee0   :  { %1506 = vperm.xlu1 %2935, %v1299_v4  }
 0xee1   :  { %v1490_v17 = vpop.permute.xlu0 %1489 }
 0xee2   :  { %v1492_v13 = vmul.f32 %v3037_v5, %v1490_v17 }
 0xee4   :  { %2937 = vset.pattern.permute.xlu1 %v3152_v16  ;;  %1494 = vrot.lane.b32.xlu0 %v1492_v13, %s3149_s23  ;;  %v1284_v16 = vmul.f32 %v3683_v6, %v3668_v32 }
 0xee5   :  { %1522 = vperm.xlu1 %2937, %v1299_v4  }
 0xee6   :  { %v3777_v40 = vadd.f32 %v1285_v26, %v1284_v16 }
 0xee8   :  { %1513 = vperm.xlu0 %2936, %v1510_v14   ;;  %v1487_v35 = vmul.f32 %v3037_v5, %v3777_v40 }
 0xee9   :  { %1527 = vperm.xlu1 %2937, %v1510_v14  }
 0xeec   :  { %2938 = vset.pattern.permute.xlu0 %v3151_v31 }
 0xeed   :  { %2939 = vset.pattern.permute.xlu1 %v3151_v31 }
 0xf4e   :  { %v1471_v20 = vpop.permute.xlu1 %1470 }
 0xf4f   :  { %v3772_v58 = vadd.f32 %v1471_v20, %v1463_v18 }
 0xf51   :  { %3038 = vtanh.f32 %v3772_v58 }
 0xf56   :  { %v1495_v36 = vpop.permute.xlu0 %1494 }
 0xf57   :  { %v3780_v60 = vadd.f32 %v1495_v36, %v1487_v35 }
 0xf59   :  { %3040 = vtanh.f32 %v3780_v60 }
 0xf5b   :  { %v3785_v0 = vpop.permute.xlu1 %1506 }
 0xf5e   :  { %v3039_v31 = vpop.eup %3038 }
 0xf5f   :  { %1476 = vrot.lane.b32.xlu0 %v3039_v31, %s3147_s20 }
 0xf60   :  { %v3789_v42 = vpop.permute.xlu1 %1522 }
 0xf63   :  { %v3787_v32 = vpop.permute.xlu0 %1513 }
 0xf64   :  { %v1516_v52 = vmul.f32 %v3787_v32, %v3685_v7  ;;  %v3794_v38 = vpop.permute.xlu1 %1527 }
 0xf65   :  { %v1530_v33 = vmul.f32 %v3794_v38, %v3692_v19 }
 0xf66   :  { %v3041_v59 = vpop.eup %3040 }
 0xf67   :  { %1500 = vrot.lane.b32.xlu1 %v3041_v59, %s3147_s20 }
 0xfd1   :  { %v1477_v45 = vpop.permute.xlu0 %1476 }
 0xfd2   :  { %v1479_v48 = vmul.f32 %v3035_v57, %v1477_v45  ;;  %v1547_v45 = vld [vmem:[%s4167_s2] sm:$0x3] }
 0xfd4   :  { %v1509_v8 = vmul.f32 %v3785_v0, %v1479_v48 }
 0xfd6   :  { %v3796_v62 = vadd.f32 %v1516_v52, %v1509_v8  ;;  %v1758_v8 = vsub.f32 1.0, %v1547_v45 }
 0xfd8   :  { %1551 = vrot.lane.b32.xlu0 %v3796_v62, %s3149_s23 }
 0xfd9   :  { %v1501_v43 = vpop.permute.xlu1 %1500 }
 0xfda   :  { %v1503_v49 = vmul.f32 %v3037_v5, %v1501_v43 }
 0xfdc   :  { %v1525_v29 = vmul.f32 %v3789_v42, %v1503_v49  ;;  %v1519_v49 = vmul.f32 %v3787_v32, %v3676_v55 }
 0xfde   :  { %v3803_v57 = vadd.f32 %v1530_v33, %v1525_v29  ;;  %v1518_v33 = vmul.f32 %v3785_v0, %v3772_v58 }
 0xfe0   :  { %1629 = vrot.lane.b32.xlu1 %v3803_v57, %s3149_s23  ;;  %v1520_v29 = vadd.f32 %v1519_v49, %v1518_v33 }
0x104a   :  { %v1552_v2 = vpop.permute.xlu0 %1551 }
0x104b   :  { %2811 = vmatmul.mubr.msk.f32.vlgmr.msra.gmra.mxu0 %vm68_vm1, %v1552_v2 }
0x104c   :  { %2825 = vmatpush3.msra.mxu0 %v3700_v21  ;;  %2832 = vmatprep.mubr.msk.f32.mxu0 %vm3145_vm0, %v3144_v1  ;;  %v3099_v21 = vld [vmem:[%s4144_s4] sm:$0xff] }
0x104d   :  { %2826 = vmatprep.subr.mxu0 %v3144_v1 }
0x104e   :  { %2827 = vmatpush3.msra.mxu0 %v3709_v24  ;;  %v2539_v24 = vld [vmem:[%s4165_s30 + $0xc] sm:$0x3] }
0x104f   :  { %2828 = vmatprep.subr.mxu0 %v3144_v1 }
0x1050   :  { %2829 = vmatpush3.msra.mxu0 %v3716_v25 }
0x1051   :  { %2830 = vmatprep.subr.mxu0 %v3144_v1 }
0x1052   :  { %v1630_v3 = vpop.permute.xlu1 %1629  ;;  %2831 = vmatpush3.msra.mxu0 %v3723_v27 }
0x1053   :  { %2822 = vmatmul.mubr.msk.f32.vlgmr.msra.gmra.mxu1 %vm68_vm1, %v1630_v3 }
0x1054   :  { %2836 = vmatpush3.msra.mxu1 %v3731_v28  ;;  %2843 = vmatprep.mubr.msk.f32.mxu1 %vm3145_vm0, %v3144_v1 }
0x1055   :  { %2837 = vmatprep.subr.mxu1 %v3144_v1 }
0x1056   :  { %2838 = vmatpush3.msra.mxu1 %v3740_v30  ;;  %v2541_v30 = vld [vmem:[%s4166_s1 + $0x2] sm:$0x3] }
0x1057   :  { %2839 = vmatprep.subr.mxu1 %v3144_v1 }
0x1058   :  { %2840 = vmatpush3.msra.mxu1 %v3747_v34 }
0x1059   :  { %2841 = vmatprep.subr.mxu1 %v3144_v1 }
0x105a   :  { %2842 = vmatpush3.msra.mxu1 %v3099_v21  ;;  %v1533_v21 = vmul.f32 %v3794_v38, %v3777_v40 }
0x105b   :  { %2865 = vmatprep.subr.mxu1 %v3144_v1 }
0x110b   :  { %v1621_v25 = vpop.f32.mrf.mxu0 }
0x110c   :  { %v1625_v27 = vadd.f32 %v2539_v24, %v1621_v25  ;;  %v1532_v25 = vmul.f32 %v3789_v42, %v3780_v60 }
0x110d   :  { %v2812_v28 = vpop.f32.mrf.mxu0 }
0x110e   :  { %3042 = vtanh.f32 %v1625_v27  ;;  %v2543_v14 = vmul.f32 -1.442695, %v1625_v27 }
0x1113   :  { %v1699_v34 = vpop.f32.mrf.mxu1 }
0x1114   :  { %v1703_v4 = vadd.f32 %v2541_v30, %v1699_v34 }
0x1115   :  { %v2823_v5 = vpop.f32.mrf.mxu1 }
0x1116   :  { %3044 = vtanh.f32 %v1703_v4  ;;  %v2544_v18 = vmul.f32 -1.442695, %v1703_v4 }
0x1117   :  { %3046 = vpow2.f32 %v2543_v14 }
0x1118   :  { %3048 = vpow2.f32 %v2544_v18 }
0x111b   :  { %v3043_v17 = vpop.eup %3042 }
0x111c   :  { %1713 = vrot.lane.b32.xlu0 %v3043_v17, %s3147_s20 }
0x1123   :  { %v3045_v13 = vpop.eup %3044 }
0x1124   :  { %1737 = vrot.lane.b32.xlu1 %v3045_v13, %s3147_s20  ;;  %v3047_v20 = vpop.eup %3046 }
0x1125   :  { %v1707_v26 = vadd.f32 1.0, %v3047_v20  ;;  %v3049_v16 = vpop.eup %3048 }
0x1126   :  { %v1731_v35 = vadd.f32 1.0, %v3049_v16 }
0x1127   :  { %3050 = vrcp.f32 %v1707_v26 }
0x1128   :  { %3052 = vrcp.f32 %v1731_v35 }
0x1134   :  { %v3051_v36 = vpop.eup %3050 }
0x1135   :  { %v3053_v48 = vpop.eup %3052  ;;  %v1711_v2 = vmul.f32 %v3051_v36, %v1520_v29 }
0x118e   :  { %v1714_v31 = vpop.permute.xlu0 %1713 }
0x118f   :  { %v1716_v59 = vmul.f32 %v3051_v36, %v1714_v31 }
0x1191   :  { %1718 = vrot.lane.b32.xlu0 %v1716_v59, %s3149_s23 }
0x1195   :  { %1754 = vperm.xlu0 %2938, %v1547_v45  }
0x1196   :  { %v1738_v52 = vpop.permute.xlu1 %1737 }
0x1197   :  { %v1740_v43 = vmul.f32 %v3053_v48, %v1738_v52 }
0x1199   :  { %2941 = vset.pattern.permute.xlu0 %v3150_v10  ;;  %1742 = vrot.lane.b32.xlu1 %v1740_v43, %s3149_s23  ;;  %v1874_v43 = vld [vmem:[%s4166_s1] sm:$0x3] }
0x119a   :  { %1775 = vperm.xlu0 %2941, %v1758_v8  }
0x119d   :  { %1761 = vperm.xlu1 %2939, %v1758_v8  }
0x119e   :  { %2942 = vset.pattern.permute.xlu0 %v3148_v22 }
0x11a1   :  { %2940 = vset.pattern.permute.xlu1 %v3150_v10  ;;  %v3855_v10 = vadd.f32 %v1533_v21, %v1532_v25 }
0x11a2   :  { %1770 = vperm.xlu1 %2940, %v1547_v45   ;;  %v2545_v45 = vld [vmem:[%s4165_s30 + $0xe] sm:$0x3] }
0x11a6   :  { %2943 = vset.pattern.permute.xlu1 %v3148_v22  ;;  %v1735_v22 = vmul.f32 %v3053_v48, %v3855_v10 }
0x1203   :  { %v1719_v3 = vpop.permute.xlu0 %1718 }
0x1204   :  { %v1721_v24 = vadd.f32 %v1719_v3, %v1711_v2 }
0x1206   :  { %3054 = vtanh.f32 %v1721_v24 }
0x120b   :  { %v1743_v27 = vpop.permute.xlu1 %1742 }
0x120c   :  { %v3858_v55 = vadd.f32 %v1743_v27, %v1735_v22 }
0x120e   :  { %3056 = vtanh.f32 %v3858_v55 }
0x1210   :  { %v3862_v32 = vpop.permute.xlu0 %1754 }
0x1211   :  { %v1766_v38 = vmul.f32 %v3862_v32, %v1721_v24 }
0x1213   :  { %v3055_v58 = vpop.eup %3054 }
0x1214   :  { %1724 = vrot.lane.b32.xlu1 %v3055_v58, %s3147_s20 }
0x1215   :  { %v1776_v18 = vpop.permute.xlu0 %1775 }
0x1216   :  { %v1778_v16 = vmul.f32 %v1776_v18, %v3803_v57 }
0x1218   :  { %v1762_v40 = vpop.permute.xlu1 %1761 }
0x1219   :  { %v1767_v28 = vmul.f32 %v1762_v40, %v1520_v29  ;;  %v1764_v17 = vmul.f32 %v1762_v40, %v3796_v62 }
0x121b   :  { %v3057_v60 = vpop.eup %3056  ;;  %v1768_v30 = vadd.f32 %v1767_v28, %v1766_v38 }
0x121c   :  { %1748 = vrot.lane.b32.xlu1 %v3057_v60, %s3147_s20  ;;  %v1795_v60 = vld [vmem:[%s4167_s2] sm:$0x3] }
0x121d   :  { %v3866_v34 = vpop.permute.xlu1 %1770 }
0x1286   :  { %v1725_v4 = vpop.permute.xlu1 %1724 }
0x1287   :  { %v1727_v5 = vmul.f32 %v3051_v36, %v1725_v4 }
0x1289   :  { %v1757_v13 = vmul.f32 %v3862_v32, %v1727_v5 }
0x128b   :  { %v3870_v14 = vadd.f32 %v1764_v17, %v1757_v13  ;;  %v2005_v17 = vsub.f32 1.0, %v1795_v60 }
0x128d   :  { %1799 = vrot.lane.b32.xlu0 %v3870_v14, %s3149_s23 }
0x128e   :  { %v1749_v20 = vpop.permute.xlu1 %1748 }
0x128f   :  { %v1751_v26 = vmul.f32 %v3053_v48, %v1749_v20 }
0x1291   :  { %v1773_v35 = vmul.f32 %v3866_v34, %v1751_v26 }
0x1293   :  { %v3876_v31 = vadd.f32 %v1778_v16, %v1773_v35  ;;  %v1780_v16 = vmul.f32 %v3866_v34, %v3858_v55  ;;  %v2152_v55 = vld [vmem:[%s4147_s7 + $0x28] sm:$0xff] }
0x1295   :  { %1876 = vrot.lane.b32.xlu1 %v3876_v31, %s3149_s23 }
0x12ff   :  { %v1800_v36 = vpop.permute.xlu0 %1799 }
0x1300   :  { %2833 = vmatmul.mubr.msk.f32.vlgmr.msra.gmra.mxu0 %vm68_vm1, %v1800_v36  ;;  %v1781_v36 = vmul.f32 %v1776_v18, %v3855_v10  ;;  %v2153_v10 = vld [vmem:[%s4147_s7 + $0x30] sm:$0xff]  ;;  %v2151_v18 = vld [vmem:[%s4147_s7 + $0x20] sm:$0xff] }
0x1307   :  { %v1877_v59 = vpop.permute.xlu1 %1876 }
0x1308   :  { %2844 = vmatmul.mubr.msk.f32.vlgmr.msra.gmra.mxu1 %vm68_vm1, %v1877_v59  ;;  %v1782_v59 = vadd.f32 %v1781_v36, %v1780_v16 }
0x1309   :  { %2881 = vmatprep.mubr.msk.f32.mxu1 %vm3145_vm0, %v3144_v1 }
0x13c0   :  { %v1869_v48 = vpop.f32.mrf.mxu0 }
0x13c1   :  { %v1873_v52 = vadd.f32 %v2545_v45, %v1869_v48 }
0x13c2   :  { %v2834_v8 = vpop.f32.mrf.mxu0 }
0x13c3   :  { %3058 = vtanh.f32 %v1873_v52  ;;  %v2548_v21 = vmul.f32 -1.442695, %v1873_v52 }
0x13c8   :  { %v1946_v49 = vpop.f32.mrf.mxu1 }
0x13c9   :  { %v1950_v33 = vadd.f32 %v1946_v49, %v1874_v43  ;;  %v2150_v49 = vld [vmem:[%s4147_s7 + $0x18] sm:$0xff] }
0x13ca   :  { %v2845_v29 = vpop.f32.mrf.mxu1 }
0x13cb   :  { %3060 = vtanh.f32 %v1950_v33  ;;  %v2549_v24 = vmul.f32 -1.442695, %v1950_v33  ;;  %v2149_v29 = vld [vmem:[%s4147_s7 + $0x10] sm:$0xff] }
0x13cc   :  { %3062 = vpow2.f32 %v2548_v21 }
0x13cd   :  { %3064 = vpow2.f32 %v2549_v24  ;;  %v2147_v24 = vld [vmem:[%s4147_s7] sm:$0xff] }
0x13d0   :  { %v3059_v2 = vpop.eup %3058 }
0x13d1   :  { %1960 = vrot.lane.b32.xlu0 %v3059_v2, %s3147_s20  ;;  %v2148_v2 = vld [vmem:[%s4147_s7 + $0x8] sm:$0xff] }
0x13d8   :  { %v3061_v3 = vpop.eup %3060 }
0x13d9   :  { %1984 = vrot.lane.b32.xlu1 %v3061_v3, %s3147_s20  ;;  %v3063_v25 = vpop.eup %3062 }
0x13da   :  { %v1954_v22 = vadd.f32 1.0, %v3063_v25  ;;  %v3065_v27 = vpop.eup %3064 }
0x13db   :  { %v1978_v58 = vadd.f32 1.0, %v3065_v27 }
0x13dc   :  { %3066 = vrcp.f32 %v1954_v22 }
0x13dd   :  { %3068 = vrcp.f32 %v1978_v58 }
0x13e9   :  { %v3067_v40 = vpop.eup %3066 }
0x13ea   :  { %v3069_v4 = vpop.eup %3068  ;;  %v1958_v20 = vmul.f32 %v3067_v40, %v1768_v30 }
0x13eb   :  { %v1982_v45 = vmul.f32 %v3069_v4, %v1782_v59 }
0x1443   :  { %v1961_v38 = vpop.permute.xlu0 %1960 }
0x1444   :  { %v1963_v28 = vmul.f32 %v3067_v40, %v1961_v38 }
0x1446   :  { %1965 = vrot.lane.b32.xlu0 %v1963_v28, %s3149_s23 }
0x144a   :  { %2001 = vperm.xlu0 %2942, %v1795_v60  }
0x144b   :  { %v1985_v5 = vpop.permute.xlu1 %1984 }
0x144c   :  { %v1987_v13 = vmul.f32 %v3069_v4, %v1985_v5 }
0x144e   :  { %2945 = vset.pattern.permute.xlu0 %v3146_v9  ;;  %1989 = vrot.lane.b32.xlu1 %v1987_v13, %s3149_s23 }
0x144f   :  { %2019 = vperm.xlu0 %2945, %v2005_v17  }
0x1452   :  { %2008 = vperm.xlu1 %2943, %v2005_v17  }
0x1456   :  { %2944 = vset.pattern.permute.xlu1 %v3146_v9  ;;  %v2154_v9 = vld [vmem:[%s4147_s7 + $0x38] sm:$0xff] }
0x1457   :  { %2014 = vperm.xlu1 %2944, %v1795_v60   ;;  %2866 = vmatpush3.msra.mxu1 %v2154_v9 }
0x1458   :  { %2867 = vmatprep.subr.mxu1 %v3144_v1 }
0x1459   :  { %2868 = vmatpush3.msra.mxu1 %v2153_v10 }
0x145a   :  { %2869 = vmatprep.subr.mxu1 %v3144_v1 }
0x145b   :  { %2870 = vmatpush3.msra.mxu1 %v2152_v55 }
0x145c   :  { %2871 = vmatprep.subr.mxu1 %v3144_v1 }
0x145d   :  { %2872 = vmatpush3.msra.mxu1 %v2151_v18  ;;  %v2243_v18 = vld [vmem:[%s4149_s9 + $0x38] sm:$0xff] }
0x145e   :  { %2873 = vmatprep.subr.mxu1 %v3144_v1 }
0x145f   :  { %2874 = vmatpush3.msra.mxu1 %v2150_v49  ;;  %v2242_v49 = vld [vmem:[%s4149_s9 + $0x30] sm:$0xff] }
0x1460   :  { %2875 = vmatprep.subr.mxu1 %v3144_v1 }
0x1461   :  { %2876 = vmatpush3.msra.mxu1 %v2149_v29  ;;  %v2240_v29 = vld [vmem:[%s4149_s9 + $0x20] sm:$0xff] }
0x1462   :  { %2877 = vmatprep.subr.mxu1 %v3144_v1 }
0x1463   :  { %2878 = vmatpush3.msra.mxu1 %v2148_v2  ;;  %v2239_v2 = vld [vmem:[%s4149_s9 + $0x18] sm:$0xff] }
0x1464   :  { %2879 = vmatprep.subr.mxu1 %v3144_v1 }
0x1465   :  { %2880 = vmatpush3.msra.mxu1 %v2147_v24  ;;  %v2236_v24 = vld [vmem:[%s4149_s9] sm:$0xff] }
0x14b8   :  { %v1966_v26 = vpop.permute.xlu0 %1965 }
0x14b9   :  { %v1968_v35 = vadd.f32 %v1966_v26, %v1958_v20  ;;  %v791_v20 = vmul.f32 %v3533_v15, %v3528_v12  ;;  %v1039_v12 = vmul.f32 %v3608_v53, %v3598_v63  ;;  %v2042_v15 = vld [vmem:[%s4145_s5 + $0x20] sm:$0xff]  ;;  %v1541_v63 = vmul.f32 %v3803_v57, %v3789_v42 }
0x14ba   :  { %v1783_v53 = vmul.f32 %v3870_v14, %v3862_v32 }
0x14bb   :  { %3070 = vtanh.f32 %v1968_v35 }
0x14c0   :  { %v1990_v48 = vpop.permute.xlu1 %1989 }
0x14c1   :  { %v1992_v52 = vadd.f32 %v1990_v48, %v1982_v45 }
0x14c3   :  { %3072 = vtanh.f32 %v1992_v52 }
0x14c5   :  { %v3937_v25 = vpop.permute.xlu0 %2001 }
0x14c8   :  { %v3071_v8 = vpop.eup %3070 }
0x14c9   :  { %1971 = vrot.lane.b32.xlu1 %v3071_v8, %s3147_s20 }
0x14ca   :  { %v2020_v38 = vpop.permute.xlu0 %2019 }
0x14cb   :  { %v2022_v5 = vmul.f32 %v2020_v38, %v3876_v31 }
0x14cd   :  { %v2009_v30 = vpop.permute.xlu1 %2008 }
0x14ce   :  { %v2011_v22 = vmul.f32 %v2009_v30, %v3870_v14 }
0x14d0   :  { %v3073_v43 = vpop.eup %3072 }
0x14d1   :  { %1995 = vrot.lane.b32.xlu1 %v3073_v43, %s3147_s20 }
0x14d2   :  { %v3922_v33 = vpop.permute.xlu1 %2014 }
0x153b   :  { %v1972_v3 = vpop.permute.xlu1 %1971 }
0x153c   :  { %v1974_v21 = vmul.f32 %v3067_v40, %v1972_v3  ;;  %v293_v40 = vmul.f32 %v3370_v50, %v3364_v47  ;;  %v543_v47 = vmul.f32 %v3450_v54, %v3445_v51  ;;  %v797_v50 = vmul.f32 %v3542_v23, %v3526_v39  ;;  %v2045_v51 = vld [vmem:[%s4145_s5 + $0x38] sm:$0xff]  ;;  %v2044_v54 = vld [vmem:[%s4145_s5 + $0x30] sm:$0xff] }
0x153d   :  { %2846 = vmatprep.subr.mxu0 %v2045_v51  ;;  %v1789_v39 = vmul.f32 %v3876_v31, %v3866_v34  ;;  %v1287_v23 = vmul.f32 %v3685_v7, %v3672_v37  ;;  %v2040_v37 = vld [vmem:[%s4145_s5 + $0x10] sm:$0xff] }
0x153e   :  { %v2004_v27 = vmul.f32 %v3937_v25, %v1974_v21  ;;  %2847 = vmatpush3.msra.mxu0 %v2045_v51  ;;  %v2238_v3 = vld [vmem:[%s4149_s9 + $0x10] sm:$0xff]  ;;  %v2237_v21 = vld [vmem:[%s4149_s9 + $0x8] sm:$0xff] }
0x153f   :  { %2848 = vmatprep.subr.mxu0 %v2044_v54 }
0x1540   :  { %v2012_v58 = vadd.f32 %v2011_v22, %v2004_v27  ;;  %2849 = vmatpush3.msra.mxu0 %v2044_v54 }
0x1542   :  { %2139 = vrot.lane.b32.xlu0 %v2012_v58, %s3149_s23 }
0x1543   :  { %v1996_v28 = vpop.permute.xlu1 %1995 }
0x1544   :  { %v1998_v60 = vmul.f32 %v3069_v4, %v1996_v28  ;;  %v300_v4 = vmul.f32 %v3378_v56, %v3362_v44  ;;  %v1293_v44 = vmul.f32 %v3692_v19, %v3683_v6  ;;  %v549_v56 = vmul.f32 %v3459_v61, %v3443_v46  ;;  %v2043_v61 = vld [vmem:[%s4145_s5 + $0x28] sm:$0xff]  ;;  %v2038_v19 = vld [vmem:[%s4145_s5] sm:$0xff] }
0x1545   :  { %v1045_v46 = vmul.f32 %v3617_v11, %v3604_v41  ;;  %2850 = vmatprep.subr.mxu0 %v2043_v61  ;;  %v2041_v41 = vld [vmem:[%s4145_s5 + $0x18] sm:$0xff]  ;;  %v1535_v11 = vmul.f32 %v3796_v62, %v3785_v0  ;;  %v2039_v6 = vld [vmem:[%s4145_s5 + $0x8] sm:$0xff]  ;;  %v2024_v0 = vmul.f32 %v2012_v58, %v3937_v25  ;;  %v2553_v25 = vld [vmem:[%s4148_s8] ss:$0 sm:$0xff] }
0x1546   :  { %v2017_v17 = vmul.f32 %v3922_v33, %v1998_v60  ;;  %295 = vrot.lane.b32.xlu0 %v293_v40, %s3149_s23  ;;  %2851 = vmatpush3.msra.mxu0 %v2043_v61  ;;  %v2550_v28 = vld [vmem:[%s4146_s6] ss:$0 sm:$0xff] }
0x1547   :  { %2852 = vmatprep.subr.mxu0 %v2042_v15 }
0x1548   :  { %v2023_v13 = vadd.f32 %v2022_v5, %v2017_v17  ;;  %2853 = vmatpush3.msra.mxu0 %v2042_v15 }
0x1549   :  { %2854 = vmatprep.subr.mxu0 %v2041_v41 }
0x154a   :  { %793 = vrot.lane.b32.xlu0 %v791_v20, %s3149_s23  ;;  %2143 = vrot.lane.b32.xlu1 %v2023_v13, %s3147_s20  ;;  %v2030_v7 = vmul.f32 %v2023_v13, %v3922_v33  ;;  %v2241_v33 = vld [vmem:[%s4149_s9 + $0x28] sm:$0xff] }
0x154b   :  { %2855 = vmatpush3.msra.mxu0 %v2041_v41  ;;  %v2326_v41 = vld [vmem:[%s4151_s11] sm:$0xff] }
0x154c   :  { %2856 = vmatprep.subr.mxu0 %v2040_v37 }
0x154d   :  { %2857 = vmatpush3.msra.mxu0 %v2040_v37  ;;  %v2355_v37 = vlaneseq }
0x154e   :  { %302 = vrot.lane.b32.xlu0 %v300_v4, %s3147_s20  ;;  %545 = vrot.lane.b32.xlu1 %v543_v47, %s3149_s23 }
0x154f   :  { %2858 = vmatprep.subr.mxu0 %v2039_v6 }
0x1550   :  { %2859 = vmatpush3.msra.mxu0 %v2039_v6 }
0x1551   :  { %2860 = vmatprep.subr.mxu0 %v2038_v19 }
0x1552   :  { %799 = vrot.lane.b32.xlu0 %v797_v50, %s3147_s20  ;;  %1041 = vrot.lane.b32.xlu1 %v1039_v12, %s3149_s23 }
0x1553   :  { %2861 = vmatpush3.msra.mxu0 %v2038_v19  ;;  %v2559_v19 = vld [vmem:[%s4153_s13] ss:$0 sm:$0xff] }
0x1554   :  { %2884 = vmatprep.subr.mxu0 %v3144_v1 }
0x1556   :  { %1295 = vrot.lane.b32.xlu0 %v1293_v44, %s3147_s20  ;;  %551 = vrot.lane.b32.xlu1 %v549_v56, %s3147_s20 }
0x155a   :  { %1791 = vrot.lane.b32.xlu0 %v1789_v39, %s3147_s20  ;;  %1047 = vrot.lane.b32.xlu1 %v1045_v46, %s3147_s20  ;;  %v2555_v39 = vld [vmem:[%s4150_s10] ss:$0 sm:$0xff] }
0x155e   :  { %1289 = vrot.lane.b32.xlu0 %v1287_v23, %s3149_s23  ;;  %1543 = vrot.lane.b32.xlu1 %v1541_v63, %s3147_s20 }
0x1562   :  { %1785 = vrot.lane.b32.xlu0 %v1783_v53, %s3149_s23  ;;  %1537 = vrot.lane.b32.xlu1 %v1535_v11, %s3149_s23  ;;  %v2418_v11 = vld [vmem:[%s4154_s14] sm:$0x3] }
0x1566   :  { %2032 = vrot.lane.b32.xlu1 %v2030_v7, %s3147_s20  ;;  %v2356_v7 = vand.u32 127, %v2355_v37 }
0x156a   :  { %2026 = vrot.lane.b32.xlu1 %v2024_v0, %s3149_s23 }
0x15b4   :  { %v2140_v42 = vpop.permute.xlu0 %2139 }
0x15b8   :  { %v296_v62 = vpop.permute.xlu0 %295 }
0x15b9   :  { %299 = vst.msk [vmem:[#allocation2] sm:$0x3] %vm298_vm2, %v296_v62 }
0x15bc   :  { %v794_v57 = vpop.permute.xlu0 %793  ;;  %v2144_v32 = vpop.permute.xlu1 %2143 }
0x15bd   :  { %796 = vst.msk [vmem:[#allocation2 + $0x4] sm:$0x3] %vm298_vm2, %v794_v57  ;;  %v2146_v34 = vsel %vm68_vm1, %v2140_v42, %v2144_v32 }
0x15be   :  { %2882 = vmatmul.mubr.msk.f32.vlgmr.msra.gmra.mxu1 %vm2053_vm3, %v2146_v34 }
0x15c0   :  { %v303_v14 = vpop.permute.xlu0 %302  ;;  %v546_v31 = vpop.permute.xlu1 %545 }
0x15c1   :  { %306 = vst.msk [vmem:[#allocation2 + $0xe] sm:$0x3] %vm305_vm4, %v303_v14 }
0x15c2   :  { %548 = vst.msk [vmem:[#allocation2 + $0x2] sm:$0x3] %vm298_vm2, %v546_v31 }
0x15c4   :  { %v800_v26 = vpop.permute.xlu0 %799  ;;  %v1042_v16 = vpop.permute.xlu1 %1041 }
0x15c5   :  { %802 = vst.msk [vmem:[#allocation2 + $0xa] sm:$0x3] %vm305_vm4, %v800_v26 }
0x15c6   :  { %1044 = vst.msk [vmem:[#allocation2 + $0x6] sm:$0x3] %vm298_vm2, %v1042_v16 }
0x15c8   :  { %v1296_v35 = vpop.permute.xlu0 %1295  ;;  %v552_v36 = vpop.permute.xlu1 %551 }
0x15c9   :  { %1298 = vst.msk [vmem:[#allocation2 + $0x6] sm:$0x3] %vm305_vm4, %v1296_v35  ;;  %554 = vst.msk [vmem:[#allocation2 + $0xc] sm:$0x3] %vm305_vm4, %v552_v36 }
0x15cc   :  { %v1792_v59 = vpop.permute.xlu0 %1791  ;;  %v1048_v45 = vpop.permute.xlu1 %1047 }
0x15cd   :  { %1794 = vst.msk [vmem:[#allocation2 + $0x2] sm:$0x3] %vm305_vm4, %v1792_v59  ;;  %1050 = vst.msk [vmem:[#allocation2 + $0x8] sm:$0x3] %vm305_vm4, %v1048_v45 }
0x15d0   :  { %v1290_v48 = vpop.permute.xlu0 %1289  ;;  %v1544_v52 = vpop.permute.xlu1 %1543 }
0x15d1   :  { %1292 = vst.msk [vmem:[#allocation2 + $0x8] sm:$0x3] %vm298_vm2, %v1290_v48 }
0x15d2   :  { %1546 = vst.msk [vmem:[#allocation2 + $0x4] sm:$0x3] %vm305_vm4, %v1544_v52  ;;  %v2327_v52 = vld [vmem:[%s4151_s11 + $0x8] sm:$0xff]  ;;  %s3156_s11 = smov [#allocation3]  }
0x15d4   :  { %v1786_v8 = vpop.permute.xlu0 %1785  ;;  %v1538_v43 = vpop.permute.xlu1 %1537 }
0x15d5   :  { %1788 = vst.msk [vmem:[#allocation2 + $0xc] sm:$0x3] %vm298_vm2, %v1786_v8  ;;  %1540 = vst.msk [vmem:[#allocation2 + $0xa] sm:$0x3] %vm298_vm2, %v1538_v43 }
0x15d8   :  { %v2033_v9 = vpop.permute.xlu1 %2032 }
0x15d9   :  { %2035 = vst.msk [vmem:[#allocation2] sm:$0x3] %vm305_vm4, %v2033_v9 }
0x15dc   :  { %v2027_v10 = vpop.permute.xlu1 %2026 }
0x15dd   :  { %2029 = vst.msk [vmem:[#allocation2 + $0xe] sm:$0x3] %vm298_vm2, %v2027_v10 }
0x15e0   :  { %v2036_v55 = vld [vmem:[#allocation2] sm:$0xff] }
0x15e1   :  { %2862 = vmatprep.mubr.msk.f32.mxu0 %vm2053_vm3, %v2036_v55  ;;  %v2561_v55 = vld [vmem:[%s4155_s15] ss:$0 sm:$0xff]  ;;  %s2482_s15 = sshll.u32 %s3156_s11, 4  ;;  %s2483_s15 = int_to_ptr.vmem [resolvable:$true] %s2482_s15 }
0x15e2   :  { %s3100_s4 = scalar_lea.vmem %s2483_s15, 32  ;;  %p3105_p1 = scmp.lt.s32.totalorder %s2483_s15, %s2483_s15 }
0x15e3   :  { %p3101_p0 = scmp.ne.s32.totalorder %s2483_s15, %s3100_s4  ;;  %p3106_p2 = scmp.lt.s32.totalorder %s3100_s4, %s3100_s4 }
0x15e4   :  { %v2037_v30 = vld [vmem:[#allocation2 + $0x8] sm:$0xff] }
0x15e5   :  { %2863 = vmatmul.mubr.msk.f32.vlgmr.msra.gmra.mxu0 %vm2053_vm3, %v2037_v30  ;;  %p3107_p3 = por %p3106_p2, %p3105_p1 }
0x15e6   :  { %2900 = vmatprep.mubr.msk.f32.mxu0 %vm3145_vm0, %v3144_v1  ;;  %2885 = vmatpush3.msra.mxu0 %v2243_v18 }
0x15e7   :  { %2886 = vmatprep.subr.mxu0 %v3144_v1  ;;  %p3108_p4 = pnand %p3107_p3, %p3101_p0 }
0x15e8   :  { %2887 = vmatpush3.msra.mxu0 %v2242_v49 }
0x15e9   :  { %2888 = vmatprep.subr.mxu0 %v3144_v1 }
0x15ea   :  { %2889 = vmatpush3.msra.mxu0 %v2241_v33 }
0x15eb   :  { %2890 = vmatprep.subr.mxu0 %v3144_v1 }
0x15ec   :  { %2891 = vmatpush3.msra.mxu0 %v2240_v29 }
0x15ed   :  { %2892 = vmatprep.subr.mxu0 %v3144_v1 }
0x15ee   :  { %2893 = vmatpush3.msra.mxu0 %v2239_v2 }
0x15ef   :  { %2894 = vmatprep.subr.mxu0 %v3144_v1 }
0x15f0   :  { %2895 = vmatpush3.msra.mxu0 %v2238_v3 }
0x15f1   :  { %2896 = vmatprep.subr.mxu0 %v3144_v1 }
0x15f2   :  { %2897 = vmatpush3.msra.mxu0 %v2237_v21 }
0x15f3   :  { %2898 = vmatprep.subr.mxu0 %v3144_v1 }
0x15f4   :  { %2899 = vmatpush3.msra.mxu0 %v2236_v24 }
0x167e   :  { %v2231_v22 = vpop.f32.mrf.mxu1 }
0x167f   :  { %v2232_v27 = vadd.f32 %v2553_v25, %v2231_v22 }
0x1680   :  { %v2883_v58 = vpop.f32.mrf.mxu1 }
0x1681   :  { %3074 = vtanh.f32 %v2232_v27 }
0x168e   :  { %v3075_v38 = vpop.eup %3074 }
0x168f   :  { %2901 = vmatmul.mubr.msk.f32.vlgmr.msra.gmra.mxu0 %vm2053_vm3, %v3075_v38 }
0x16a5   :  { %v2864_v60 = vpop.f32.mrf.mxu0 }
0x16a6   :  { %v2132_v40 = vadd.f32 %v2864_v60, %v2550_v28 }
0x16a7   :  { %v2126_v5 = vpop.f32.mrf.mxu0 }
0x16a8   :  { %2137 = vst.msk [vmem:[%s4156_s16 + $0x8] sm:$0xff] %vm2135_vm5, %v2132_v40  ;;  %v2127_v17 = vadd.f32 %v2550_v28, %v2126_v5  ;;  %v2334_v13 = vsel %vm2135_vm5, %v2132_v40, -inf }
0x16a9   :  { %2335 = vmax.xlane.f32.xlu1 %v2334_v13 }
0x16aa   :  { %2136 = vst.msk [vmem:[%s4156_s16] sm:$0xff] %vm2135_vm5, %v2127_v17  ;;  %v2331_v20 = vsel %vm2135_vm5, %v2127_v17, -inf }
0x16ab   :  { %2332 = vmax.xlane.f32.xlu0 %v2331_v20 }
0x1732   :  { %v2336_v4 = vpop.xlane.xlu1 %2335 }
0x1733   :  { %v4086_v47 = vsub.f32 %v2132_v40, %v2336_v4 }
0x1734   :  { %v2333_v12 = vpop.xlane.xlu0 %2332 }
0x1735   :  { %v2341_v50 = vmul.f32 1.442695, %v4086_v47  ;;  %v2337_v44 = vsub.f32 %v2127_v17, %v2333_v12 }
0x1737   :  { %3076 = vpow2.f32 %v2341_v50  ;;  %v2339_v56 = vmul.f32 1.442695, %v2337_v44 }
0x1739   :  { %3078 = vpow2.f32 %v2339_v56 }
0x1744   :  { %v3077_v51 = vpop.eup %3076 }
0x1745   :  { %v2346_v54 = vsel %vm2135_vm5, %v3077_v51, 0.0 }
0x1746   :  { %2347 = vadd.xlane.f32.xlu1 %v2346_v54  ;;  %v3079_v63 = vpop.eup %3078 }
0x1747   :  { %v2343_v53 = vsel %vm2135_vm5, %v3079_v63, 0.0 }
0x174f   :  { %v2320_v46 = vpop.f32.mrf.mxu0 }
0x1750   :  { %v2321_v61 = vadd.f32 %v2555_v39, %v2320_v46 }
0x1751   :  { %v2902_v15 = vpop.f32.mrf.mxu0 }
0x1752   :  { %v2420_v23 = vsel %vm2324_vm6, %v2321_v61, -inf  ;;  %2325 = vst.msk [vmem:[#allocation3] sm:$0x3] %vm2324_vm6, %v2321_v61 }
0x1753   :  { %2421 = vmax.xlane.f32.xlu0 %v2420_v23 }
0x1757   :  { %2358 = vperm.xlu1 %2944, %v2326_v41   ;;  %2344 = vadd.xlane.f32.xlu0 %v2343_v53 }
0x175b   :  { %2433 = vperm.xlu1 %2944, %v2418_v11  }
0x17cf   :  { %v2348_v6 = vpop.xlane.xlu1 %2347 }
0x17d3   :  { %v2359_v0 = vpop.permute.xlu1 %2358 }
0x17d4   :  { %vm2363_vm7 = vcmp.eq.s32.totalorder %v2356_v7, %v2359_v0 }
0x17d5   :  { %v2557_v42 = vsel %vm2363_vm7, 1.0, %v3144_v1 }
0x17d6   :  { %v2375_v62 = vmul.f32 %v2559_v19, %v2557_v42 }
0x17d7   :  { %v2434_v43 = vpop.permute.xlu1 %2433 }
0x17d8   :  { %v2377_v57 = vsel %vm2135_vm5, %v2375_v62, 0.0  ;;  %vm2435_vm8 = vcmp.eq.s32.totalorder %v2356_v7, %v2434_v43 }
0x17d9   :  { %2378 = vadd.xlane.f32.xlu1 %v2377_v57  ;;  %v2560_v30 = vsel %vm2435_vm8, 1.0, %v3144_v1 }
0x17da   :  { %v2444_v29 = vmul.f32 %v2561_v55, %v2560_v30 }
0x17dc   :  { %v2422_v32 = vpop.xlane.xlu0 %2421  ;;  %v2445_v22 = vsel %vm2324_vm6, %v2444_v29, 0.0 }
0x17dd   :  { %v2423_v34 = vsub.f32 %v2321_v61, %v2422_v32 }
0x17df   :  { %v2424_v14 = vmul.f32 1.442695, %v2423_v34 }
0x17e0   :  { %v2345_v31 = vpop.xlane.xlu0 %2344 }
0x17e1   :  { %3080 = vpow2.f32 %v2424_v14 }
0x17e2   :  { %3082 = vlog2.f32 %v2345_v31 }
0x17e3   :  { %3084 = vlog2.f32 %v2348_v6 }
0x17ee   :  { %v3081_v26 = vpop.eup %3080 }
0x17ef   :  { %v3083_v16 = vpop.eup %3082  ;;  %v2426_v35 = vsel %vm2324_vm6, %v3081_v26, 0.0 }
0x17f0   :  { %v2350_v36 = vmul.f32 0.6931472, %v3083_v16  ;;  %2427 = vadd.xlane.f32.xlu0 %v2426_v35  ;;  %v3085_v9 = vpop.eup %3084 }
0x17f1   :  { %v2352_v49 = vmul.f32 0.6931472, %v3085_v9 }
0x17f2   :  { %v2353_v59 = vsub.f32 %v2337_v44, %v2350_v36 }
0x17f3   :  { %v2354_v24 = vsub.f32 %v4086_v47, %v2352_v49 }
0x17f4   :  { %v2383_v45 = vmul.f32 %v2557_v42, %v2353_v59 }
0x17f6   :  { %v2385_v48 = vsel %vm2135_vm5, %v2383_v45, 0.0 }
0x17f7   :  { %2386 = vadd.xlane.f32.xlu1 %v2385_v48 }
0x1806   :  { %2361 = vperm.xlu0 %2945, %v2327_v52  }
0x1879   :  { %v2428_v8 = vpop.xlane.xlu0 %2427 }
0x187a   :  { %3086 = vlog2.f32 %v2428_v8 }
0x1881   :  { %v2362_v10 = vpop.permute.xlu0 %2361 }
0x1882   :  { %vm2364_vm9 = vcmp.eq.s32.totalorder %v2356_v7, %v2362_v10 }
0x1883   :  { %v2558_v18 = vsel %vm2364_vm9, 1.0, %v3144_v1 }
0x1884   :  { %v2376_v33 = vmul.f32 %v2559_v19, %v2558_v18  ;;  %v2384_v25 = vmul.f32 %v2558_v18, %v2354_v24 }
0x1886   :  { %v2380_v2 = vsel %vm2135_vm5, %v2376_v33, 0.0  ;;  %v2388_v1 = vsel %vm2135_vm5, %v2384_v25, 0.0 }
0x1887   :  { %v3087_v3 = vpop.eup %3086  ;;  %2381 = vadd.xlane.f32.xlu0 %v2380_v2 }
0x1888   :  { %v2430_v21 = vmul.f32 0.6931472, %v3087_v3 }
0x188a   :  { %v2431_v27 = vsub.f32 %v2423_v34, %v2430_v21 }
0x188b   :  { %2446 = vadd.xlane.f32.xlu0 %v2445_v22 }
0x188c   :  { %v2448_v58 = vmul.f32 %v2560_v30, %v2431_v27 }
0x188e   :  { %v2449_v38 = vsel %vm2324_vm6, %v2448_v58, 0.0 }
0x188f   :  { %2450 = vadd.xlane.f32.xlu1 %v2449_v38  ;;  %2389 = vadd.xlane.f32.xlu0 %v2388_v1 }
0x1890   :  { %3111 = shalt.err (!%p3108_p4)
}
0x1891   :  { %2485 = dma.vmem_to_hbm [thread:$0]  %s2483_s15, 32, %s4157_s17, [#allocation4]   ;;  %v2328_v28 = vld [vmem:[%s4152_s12] sm:$0xff]  ;;  %v2379_v60 = vpop.xlane.xlu1 %2378  ;;  %v2329_v40 = vld [vmem:[%s4152_s12 + $0x8] sm:$0xff]  ;;  %vm2397_vm10 = vcmask 7168   ;;  %vm2454_vm11 = vcmask 1041408  }
0x1892   :  { %v2393_v5 = vmul.f32 %v2379_v60, %v2328_v28  ;;  %s3157_s12 = smov [#allocation5]   ;;  %vm2472_vm12 = vcmask 0  }
0x1893   :  { %s2492_s17 = sshll.u32 %s3157_s12, 4  ;;  %s2493_s17 = int_to_ptr.vmem [resolvable:$true] %s2492_s17 }
0x1894   :  { %v2407_v4 = vsel %vm2397_vm10, %v2393_v5, 0.0  ;;  %s3120_s1 = scalar_lea.vmem %s2493_s17, 16  ;;  %s3124_s2 = scalar_lea.vmem %s2493_s17, 32 }
0x1895   :  { %v2387_v20 = vpop.xlane.xlu1 %2386  ;;  %p3121_p5 = scmp.ne.s32.totalorder %s2493_s17, %s3120_s1  ;;  %p3125_p6 = scmp.lt.s32.totalorder %s2493_s17, %s2493_s17 }
0x1896   :  { %v2391_v44 = vsub.f32 0.0, %v2387_v20  ;;  %p3126_p7 = scmp.lt.s32.totalorder %s3124_s2, %s3120_s1 }
0x1898   :  { %v2395_v23 = vmul.f32 %v2393_v5, %v2391_v44  ;;  %p3127_p8 = por %p3126_p7, %p3125_p6 }
0x189a   :  { %v2398_v0 = vsel %vm2397_vm10, %v2395_v23, 0.0  ;;  %p3128_p9 = pnand %p3127_p8, %p3121_p5 }
0x1910   :  { %v2382_v17 = vpop.xlane.xlu0 %2381 }
0x1911   :  { %v2394_v13 = vmul.f32 %v2382_v17, %v2329_v40 }
0x1913   :  { %v2408_v47 = vsel %vm2397_vm10, %v2394_v13, 0.0 }
0x1914   :  { %v2409_v50 = vadd.f32 %v2408_v47, %v2407_v4  ;;  %v2447_v12 = vpop.xlane.xlu0 %2446 }
0x1915   :  { %v2462_v56 = vsel %vm2454_vm11, %v2447_v12, 0.0 }
0x1916   :  { %v2410_v51 = vrot.slane %v2409_v50, 4  ;;  %v2463_v54 = vrot.slane %v2462_v56, 4 }
0x1918   :  { %v2411_v39 = vadd.f32 %v2410_v51, %v2409_v50  ;;  %v2464_v46 = vadd.f32 %v2463_v54, %v2462_v56  ;;  %v2451_v61 = vpop.xlane.xlu1 %2450  ;;  %v2390_v15 = vpop.xlane.xlu0 %2389 }
0x1919   :  { %v2452_v63 = vsub.f32 0.0, %v2451_v61  ;;  %v2392_v41 = vsub.f32 0.0, %v2390_v15 }
0x191a   :  { %v2412_v53 = vrot.slane %v2411_v39, 2  ;;  %v2465_v11 = vrot.slane %v2464_v46, 2 }
0x191b   :  { %v2453_v37 = vmul.f32 %v2452_v63, %v2447_v12  ;;  %v2396_v6 = vmul.f32 %v2394_v13, %v2392_v41 }
0x191c   :  { %v2413_v7 = vadd.f32 %v2412_v53, %v2411_v39  ;;  %v2466_v19 = vadd.f32 %v2465_v11, %v2464_v46 }
0x191d   :  { %v2455_v42 = vsel %vm2454_vm11, %v2453_v37, 0.0  ;;  %v2399_v62 = vsel %vm2397_vm10, %v2396_v6, 0.0 }
0x191e   :  { %v2414_v57 = vrot.slane %v2413_v7, 1  ;;  %v2467_v32 = vrot.slane %v2466_v19, 1  ;;  %v2456_v34 = vrot.slane %v2455_v42, 4  ;;  %v2400_v14 = vadd.f32 %v2399_v62, %v2398_v0 }
0x1920   :  { %v2415_v31 = vadd.f32 %v2414_v57, %v2413_v7  ;;  %v2468_v26 = vadd.f32 %v2467_v32, %v2466_v19  ;;  %v2457_v16 = vadd.f32 %v2456_v34, %v2455_v42  ;;  %v2401_v35 = vrot.slane %v2400_v14, 4 }
0x1922   :  { %3088 = vrcp.f32 %v2415_v31  ;;  %v2402_v36 = vadd.f32 %v2401_v35, %v2400_v14  ;;  %v2458_v59 = vrot.slane %v2457_v16, 2 }
0x1923   :  { %3090 = vrcp.f32 %v2468_v26 }
0x1924   :  { %v2403_v45 = vrot.slane %v2402_v36, 2  ;;  %v2459_v52 = vadd.f32 %v2458_v59, %v2457_v16 }
0x1926   :  { %v2404_v48 = vadd.f32 %v2403_v45, %v2402_v36  ;;  %v2460_v43 = vrot.slane %v2459_v52, 1 }
0x1928   :  { %v2405_v8 = vrot.slane %v2404_v48, 1  ;;  %v2461_v55 = vadd.f32 %v2460_v43, %v2459_v52 }
0x192a   :  { %v2406_v9 = vadd.f32 %v2405_v8, %v2404_v48 }
0x192f   :  { %v3089_v10 = vpop.eup %3088 }
0x1930   :  { %v3091_v30 = vpop.eup %3090  ;;  %v2417_v18 = vmul.f32 %v3089_v10, %v2406_v9 }
0x1931   :  { %v2470_v49 = vmul.f32 %v3091_v30, %v2461_v55 }
0x1933   :  { %v2471_v33 = vadd.f32 %v2470_v49, %v2417_v18 }
0x1935   :  { %2473 = vst.msk [vmem:[#allocation5] sm:$0x1] %vm2472_vm12, %v2471_v33 }
0x1936   :  { %3131 = shalt.err (!%p3128_p9)
}
0x1937   :  { %2495 = dma.vmem_to_hbm [thread:$0]  %s2493_s17, 16, %s4158_s18, [#allocation6]  }
0x1938   :  { %3140 = dma.done.wait [#allocation4], 32  }
0x1939   :  { %3141 = vsyncadd [#allocation4], 4294967264 }
0x193a   :  { %3142 = dma.done.wait [#allocation6], 16  }
0x193b   :  { %3143 = vsyncadd [#allocation6], 4294967280 }
0x193c   :  { %2504 = vsyncpa [#allocation4], 1 }
0x193d   :  { %2505 = vsyncpa [#allocation6], 1 }

</bundles_post_ra>
